<compile_context>
chip_gen: v7x
topology: tpu7x:2x2x1
jax: 0.10.0
libtpu: 0.0.40
codegen_flags: <defaults>
</compile_context>

<pallas_src>
import functools

import numpy as np
import jax
import jax.numpy as jnp
from jax.experimental import pallas as pl
from jax.experimental.pallas import tpu as pltpu


# ---------------------------------------------------------------------------
# Fused kernel
# ---------------------------------------------------------------------------

def _fused_kernel(masks_ref, x_ref,
                  w0_ref, b0_ref, w1_ref, b1_ref, w2_ref, b2_ref,
                  w3_ref, b3_ref, w4_ref, b4_ref,
                  o_ref, *, H, W):
    # masks_ref: (9, S) f32  -- per-tap boundary masks (the conv zero padding)
    # x_ref:     (1, 2048, S) f32, channels-first flat input, S = H*W
    # wK_ref:    3x3 layers packed as (9*Cout rounded up to x8, Cin) bf16,
    #            row g*Cout + c = w[dy, dx, :, c] with g = 3*dy + dx;
    #            1x1 layer packed as (Cin, 1) f32
    # bK_ref:    (Cout, 1) f32
    # o_ref:     (1, 1, S) f32  (lane-dense)
    S = H * W
    masks = masks_ref[...]                                  # (9, S) f32
    # Slice the 9 per-tap mask rows once; reused by all four 3x3 layers.
    mask_rows = [masks[g:g + 1, :] for g in range(9)]

    def conv3x3(p, w_ref, b_ref, relu):
        # p: (Cin, S) bf16 channels-first activation.
        cout = b_ref.shape[0]
        taps = jnp.dot(w_ref[...], p,
                       preferred_element_type=jnp.float32)  # (Rw, S) f32
        rw = taps.shape[0]
        acc = jnp.zeros((cout, S), jnp.float32)
        for dy in range(3):
            for dx in range(3):
                g = dy * 3 + dx
                # Tap-group extraction: sublane roll (XLU) + aligned slice.
                t = taps if g == 0 else pltpu.roll(
                    taps, shift=(-g * cout) % rw, axis=0)
                t = t[:cout, :]
                # Spatial shift: out[c, s] needs taps_g[c, s + off].
                off = (dy - 1) * W + (dx - 1)
                if off != 0:
                    t = pltpu.roll(t, shift=(-off) % S, axis=1)
                # Boundary mask == the conv's zero padding.  It is 0 exactly
                # where s+off falls outside the image, which covers every lane
                # a wrapped roll could have contaminated -> rolls are exact.
                if not (dy == 1 and dx == 1):
                    t = t * mask_rows[g]
                acc = acc + t
        acc = acc + b_ref[...]                              # (Cout,1) broadcast
        if relu:
            acc = jnp.maximum(acc, 0.0)
        return acc

    x = x_ref[0].astype(jnp.bfloat16)                                   # (2048, S)
    a = conv3x3(x, w0_ref, b0_ref, relu=False)                          # 2048 -> 12
    a = conv3x3(a.astype(jnp.bfloat16), w1_ref, b1_ref, relu=False)     # 12 -> 12
    a = conv3x3(a.astype(jnp.bfloat16), w2_ref, b2_ref, relu=True)      # 12 -> 6
    a = conv3x3(a.astype(jnp.bfloat16), w3_ref, b3_ref, relu=True)      # 6 -> 3
    # Final 1x1 conv on the VPU/XLU: weight-scale the 3 channel rows and
    # reduce across sublanes; result is already lane-dense (1, S).
    q = jnp.sum(a * w4_ref[...], axis=0, keepdims=True) + b4_ref[...]   # (1, S)
    o_ref[...] = q.reshape(1, 1, S).astype(o_ref.dtype)


# ---------------------------------------------------------------------------
# Parameters
# ---------------------------------------------------------------------------

_LAYERS = [
    # (Cin, Cout, K, relu-after)
    (2048, 12, 3, False),   # predicted_saliency_map_0
    (12,   12, 3, False),   # predicted_saliency_map_1
    (12,    6, 3, True),    # relu(predicted_saliency_mask_s0)
    (6,     3, 3, True),    # relu(predicted_saliency_mask_s1)
    (3,     1, 1, False),   # predicted_saliency_mask (1x1)
]


def init_params(key):
    """PyTorch-style params: (w (K,K,Cin,Cout) f32, b (Cout,) f32) per layer."""
    params = []
    for i, (cin, cout, k, _) in enumerate(_LAYERS):
        kw_key, kb_key = jax.random.split(jax.random.fold_in(key, i))
        scale = 1.0 / float(np.sqrt(k * k * cin))
        w = jax.random.normal(kw_key, (k, k, cin, cout), jnp.float32) * scale
        b = jax.random.normal(kb_key, (cout,), jnp.float32) * 0.1
        params.append((w, b))
    return params


def pack_params(params):
    """One-time repack for the kernel (channels-first / transposed layout):
    3x3 weights -> (9*Cout rounded up to a multiple of 8, Cin) bf16 with row
    g*Cout + c = w[dy, dx, :, c]; 1x1 -> (Cin, 1) f32; biases -> (Cout, 1) f32.
    NOTE: 9*Cout stays <= 128 for every layer, so no extra MXU M-passes are
    introduced on v5e's 128-wide MXU (review's v5e caveat)."""
    packed = []
    for (w, b) in params:
        k, _, cin, cout = w.shape
        if k == 3:
            wt = jnp.transpose(w, (0, 1, 3, 2)).reshape(9 * cout, cin)
            rw = ((9 * cout + 7) // 8) * 8      # pad rows to x8 for clean rolls
            wt = jnp.pad(wt, ((0, rw - 9 * cout), (0, 0)))
            packed.append(wt.astype(jnp.bfloat16))
        else:  # 1x1
            packed.append(w.reshape(cin, cout).astype(jnp.float32))
        packed.append(b.reshape(cout, 1).astype(jnp.float32))
    return packed


def _make_masks(H, W):
    """(9, H*W) f32: mask[g, s] == 1 iff the 3x3 tap g at output position s
    reads an in-bounds input pixel (this replaces explicit zero padding)."""
    S = H * W
    ys, xs = np.divmod(np.arange(S), W)
    m = np.zeros((9, S), np.float32)
    for dy in range(3):
        for dx in range(3):
            yy = ys + dy - 1
            xx = xs + dx - 1
            m[dy * 3 + dx] = ((yy >= 0) & (yy < H) & (xx >= 0) & (xx < W))
    return jnp.asarray(m, jnp.float32)


# ---------------------------------------------------------------------------
# Forward pass
# ---------------------------------------------------------------------------

@jax.jit
def saliency_block(x_nchw, packed):
    """Forward pass of Saliency_Block. Input/output are NCHW like PyTorch."""
    N, C, H, W = x_nchw.shape
    S = H * W

    # Free reshape only -- no transpose, no pad, no cast in the wrapper.
    x = x_nchw.reshape(N, C, S)
    masks = _make_masks(H, W)

    kernel = functools.partial(_fused_kernel, H=H, W=W)
    in_specs = [
        pl.BlockSpec((9, S), lambda n: (0, 0)),          # boundary masks
        pl.BlockSpec((1, C, S), lambda n: (n, 0, 0)),    # layer-0 input (NCHW)
    ]
    for p in packed:                                     # rank-2, grid-invariant
        in_specs.append(pl.BlockSpec(p.shape, lambda n: (0, 0)))

    out = pl.pallas_call(
        kernel,
        out_shape=jax.ShapeDtypeStruct((N, 1, S), jnp.float32),
        grid=(N,),
        in_specs=in_specs,
        out_specs=pl.BlockSpec((1, 1, S), lambda n: (n, 0, 0)),
        compiler_params=pltpu.CompilerParams(
            dimension_semantics=("parallel",),
            vmem_limit_bytes=32 * 1024 * 1024),
    )(masks, x, *packed)

    return out.reshape(N, 1, H, W)


def saliency_block_ref(x_nchw, params):
    """Plain-JAX high-precision reference (lax.conv) for correctness checking."""
    def conv(x, w, b, relu):
        pad = 1 if w.shape[0] == 3 else 0
        y = jax.lax.conv_general_dilated(
            x, w, window_strides=(1, 1),
            padding=[(pad, pad), (pad, pad)],
            dimension_numbers=("NCHW", "HWIO", "NCHW"),
            precision=jax.lax.Precision.HIGHEST)
        y = y + b[None, :, None, None]
        return jnp.maximum(y, 0.0) if relu else y

    x = x_nchw
    for (w, b), (_, _, _, relu) in zip(params, _LAYERS):
        x = conv(x, w, b, relu)
    return x


if __name__ == "__main__":
    key = jax.random.PRNGKey(0)
    params = init_params(jax.random.fold_in(key, 1))
    packed = pack_params(params)
    # Channel count (2048) is fixed by the module; small spatial / batch.
    x = jax.random.normal(jax.random.fold_in(key, 2),
                          (2, 2048, 16, 16), jnp.float32)

    out = jax.block_until_ready(saliency_block(x, packed))
    assert out.shape == (2, 1, 16, 16), out.shape

    ref = jax.block_until_ready(saliency_block_ref(x, params))
    max_err = float(jnp.max(jnp.abs(out - ref)))
    ref_scale = float(jnp.max(jnp.abs(ref))) + 1e-6
    assert max_err / ref_scale < 5e-2, (
        f"mismatch vs reference: max_err={max_err}, ref_scale={ref_scale}")

    print("KERNEL_OK")
</pallas_src>

<mosaic_0001>
module attributes {stable_mosaic.version = 11 : i64} {
  func.func @_fused_kernel(%arg0: i32, %arg1: memref<9x256xf32, #tpu.memory_space<vmem>>, %arg2: memref<1x2048x256xf32, #tpu.memory_space<vmem>>, %arg3: memref<112x2048xbf16, #tpu.memory_space<vmem>>, %arg4: memref<12x1xf32, #tpu.memory_space<vmem>>, %arg5: memref<112x12xbf16, #tpu.memory_space<vmem>>, %arg6: memref<12x1xf32, #tpu.memory_space<vmem>>, %arg7: memref<56x12xbf16, #tpu.memory_space<vmem>>, %arg8: memref<6x1xf32, #tpu.memory_space<vmem>>, %arg9: memref<32x6xbf16, #tpu.memory_space<vmem>>, %arg10: memref<3x1xf32, #tpu.memory_space<vmem>>, %arg11: memref<3x1xf32, #tpu.memory_space<vmem>>, %arg12: memref<1x1xf32, #tpu.memory_space<vmem>>, %arg13: memref<1x1x256xf32, #tpu.memory_space<vmem>>) attributes {dimension_semantics = [#tpu.dimension_semantics<parallel>], iteration_bounds = array<i64: 2>, scalar_prefetch = 0 : i64, scratch_operands = 0 : i64, tpu.core_type = #tpu.core_type<tc>, window_params = [{pipeline_mode = #tpu.pipeline_mode<synchronous>, transform_indices = @transform_0, window_bounds = array<i64: 9, 256>}, {transform_indices = @transform_1, window_bounds = array<i64: 1, 2048, 256>}, {pipeline_mode = #tpu.pipeline_mode<synchronous>, transform_indices = @transform_2, window_bounds = array<i64: 112, 2048>}, {pipeline_mode = #tpu.pipeline_mode<synchronous>, transform_indices = @transform_3, window_bounds = array<i64: 12, 1>}, {pipeline_mode = #tpu.pipeline_mode<synchronous>, transform_indices = @transform_4, window_bounds = array<i64: 112, 12>}, {pipeline_mode = #tpu.pipeline_mode<synchronous>, transform_indices = @transform_5, window_bounds = array<i64: 12, 1>}, {pipeline_mode = #tpu.pipeline_mode<synchronous>, transform_indices = @transform_6, window_bounds = array<i64: 56, 12>}, {pipeline_mode = #tpu.pipeline_mode<synchronous>, transform_indices = @transform_7, window_bounds = array<i64: 6, 1>}, {pipeline_mode = #tpu.pipeline_mode<synchronous>, transform_indices = @transform_8, window_bounds = array<i64: 32, 6>}, {pipeline_mode = #tpu.pipeline_mode<synchronous>, transform_indices = @transform_9, window_bounds = array<i64: 3, 1>}, {pipeline_mode = #tpu.pipeline_mode<synchronous>, transform_indices = @transform_10, window_bounds = array<i64: 3, 1>}, {pipeline_mode = #tpu.pipeline_mode<synchronous>, transform_indices = @transform_11, window_bounds = array<i64: 1, 1>}, {transform_indices = @transform_12, window_bounds = array<i64: 1, 1, 256>}]} {
    %c0 = arith.constant 0 : index
    %c0_0 = arith.constant 0 : index
    %0 = vector.load %arg1[%c0, %c0_0] : memref<9x256xf32, #tpu.memory_space<vmem>>, vector<9x256xf32>
    %1 = vector.extract_strided_slice %0 {offsets = [0, 0], sizes = [1, 256], strides = [1, 1]} : vector<9x256xf32> to vector<1x256xf32>
    %2 = vector.extract_strided_slice %0 {offsets = [1, 0], sizes = [1, 256], strides = [1, 1]} : vector<9x256xf32> to vector<1x256xf32>
    %3 = vector.extract_strided_slice %0 {offsets = [2, 0], sizes = [1, 256], strides = [1, 1]} : vector<9x256xf32> to vector<1x256xf32>
    %4 = vector.extract_strided_slice %0 {offsets = [3, 0], sizes = [1, 256], strides = [1, 1]} : vector<9x256xf32> to vector<1x256xf32>
    %5 = vector.extract_strided_slice %0 {offsets = [5, 0], sizes = [1, 256], strides = [1, 1]} : vector<9x256xf32> to vector<1x256xf32>
    %6 = vector.extract_strided_slice %0 {offsets = [6, 0], sizes = [1, 256], strides = [1, 1]} : vector<9x256xf32> to vector<1x256xf32>
    %7 = vector.extract_strided_slice %0 {offsets = [7, 0], sizes = [1, 256], strides = [1, 1]} : vector<9x256xf32> to vector<1x256xf32>
    %8 = vector.extract_strided_slice %0 {offsets = [8, 0], sizes = [1, 256], strides = [1, 1]} : vector<9x256xf32> to vector<1x256xf32>
    %c0_1 = arith.constant 0 : index
    %c0_2 = arith.constant 0 : index
    %c0_3 = arith.constant 0 : index
    %9 = vector.load %arg2[%c0_1, %c0_2, %c0_3] : memref<1x2048x256xf32, #tpu.memory_space<vmem>>, vector<1x2048x256xf32>
    %10 = vector.shape_cast %9 : vector<1x2048x256xf32> to vector<2048x256xf32>
    %11 = arith.truncf %10 : vector<2048x256xf32> to vector<2048x256xbf16>
    %c0_4 = arith.constant 0 : index
    %c0_5 = arith.constant 0 : index
    %12 = vector.load %arg3[%c0_4, %c0_5] : memref<112x2048xbf16, #tpu.memory_space<vmem>>, vector<112x2048xbf16>
    %cst = arith.constant dense<0.000000e+00> : vector<112x256xf32>
    %13 = tpu.matmul %12, %11, %cst {dimension_numbers = #tpu.dot_dimension_numbers<[1], [0], [0], [1], [0, 0, 1, 1], [], []>} : vector<112x2048xbf16>, vector<2048x256xbf16>, vector<112x256xf32> -> vector<112x256xf32>
    %cst_6 = arith.constant 0.000000e+00 : f32
    %14 = vector.broadcast %cst_6 : f32 to vector<12x256xf32>
    %15 = vector.extract_strided_slice %13 {offsets = [0, 0], sizes = [12, 256], strides = [1, 1]} : vector<112x256xf32> to vector<12x256xf32>
    %c17_i32 = arith.constant 17 : i32
    %16 = tpu.dynamic_rotate %15 by %c17_i32 dim 1 : vector<12x256xf32>, i32 -> vector<12x256xf32>
    %17 = vector.broadcast %1 : vector<1x256xf32> to vector<12x256xf32>
    %18 = arith.mulf %16, %17 : vector<12x256xf32>
    %19 = arith.addf %14, %18 : vector<12x256xf32>
    %c100_i32 = arith.constant 100 : i32
    %20 = tpu.dynamic_rotate %13 by %c100_i32 dim 0 : vector<112x256xf32>, i32 -> vector<112x256xf32>
    %21 = vector.extract_strided_slice %20 {offsets = [0, 0], sizes = [12, 256], strides = [1, 1]} : vector<112x256xf32> to vector<12x256xf32>
    %c16_i32 = arith.constant 16 : i32
    %22 = tpu.dynamic_rotate %21 by %c16_i32 dim 1 : vector<12x256xf32>, i32 -> vector<12x256xf32>
    %23 = vector.broadcast %2 : vector<1x256xf32> to vector<12x256xf32>
    %24 = arith.mulf %22, %23 : vector<12x256xf32>
    %25 = arith.addf %19, %24 : vector<12x256xf32>
    %c88_i32 = arith.constant 88 : i32
    %26 = tpu.dynamic_rotate %13 by %c88_i32 dim 0 : vector<112x256xf32>, i32 -> vector<112x256xf32>
    %27 = vector.extract_strided_slice %26 {offsets = [0, 0], sizes = [12, 256], strides = [1, 1]} : vector<112x256xf32> to vector<12x256xf32>
    %c15_i32 = arith.constant 15 : i32
    %28 = tpu.dynamic_rotate %27 by %c15_i32 dim 1 : vector<12x256xf32>, i32 -> vector<12x256xf32>
    %29 = vector.broadcast %3 : vector<1x256xf32> to vector<12x256xf32>
    %30 = arith.mulf %28, %29 : vector<12x256xf32>
    %31 = arith.addf %25, %30 : vector<12x256xf32>
    %c76_i32 = arith.constant 76 : i32
    %32 = tpu.dynamic_rotate %13 by %c76_i32 dim 0 : vector<112x256xf32>, i32 -> vector<112x256xf32>
    %33 = vector.extract_strided_slice %32 {offsets = [0, 0], sizes = [12, 256], strides = [1, 1]} : vector<112x256xf32> to vector<12x256xf32>
    %c1_i32 = arith.constant 1 : i32
    %34 = tpu.dynamic_rotate %33 by %c1_i32 dim 1 : vector<12x256xf32>, i32 -> vector<12x256xf32>
    %35 = vector.broadcast %4 : vector<1x256xf32> to vector<12x256xf32>
    %36 = arith.mulf %34, %35 : vector<12x256xf32>
    %37 = arith.addf %31, %36 : vector<12x256xf32>
    %c64_i32 = arith.constant 64 : i32
    %38 = tpu.dynamic_rotate %13 by %c64_i32 dim 0 : vector<112x256xf32>, i32 -> vector<112x256xf32>
    %39 = vector.extract_strided_slice %38 {offsets = [0, 0], sizes = [12, 256], strides = [1, 1]} : vector<112x256xf32> to vector<12x256xf32>
    %40 = arith.addf %37, %39 : vector<12x256xf32>
    %c52_i32 = arith.constant 52 : i32
    %41 = tpu.dynamic_rotate %13 by %c52_i32 dim 0 : vector<112x256xf32>, i32 -> vector<112x256xf32>
    %42 = vector.extract_strided_slice %41 {offsets = [0, 0], sizes = [12, 256], strides = [1, 1]} : vector<112x256xf32> to vector<12x256xf32>
    %c255_i32 = arith.constant 255 : i32
    %43 = tpu.dynamic_rotate %42 by %c255_i32 dim 1 : vector<12x256xf32>, i32 -> vector<12x256xf32>
    %44 = vector.broadcast %5 : vector<1x256xf32> to vector<12x256xf32>
    %45 = arith.mulf %43, %44 : vector<12x256xf32>
    %46 = arith.addf %40, %45 : vector<12x256xf32>
    %c40_i32 = arith.constant 40 : i32
    %47 = tpu.dynamic_rotate %13 by %c40_i32 dim 0 : vector<112x256xf32>, i32 -> vector<112x256xf32>
    %48 = vector.extract_strided_slice %47 {offsets = [0, 0], sizes = [12, 256], strides = [1, 1]} : vector<112x256xf32> to vector<12x256xf32>
    %c241_i32 = arith.constant 241 : i32
    %49 = tpu.dynamic_rotate %48 by %c241_i32 dim 1 : vector<12x256xf32>, i32 -> vector<12x256xf32>
    %50 = vector.broadcast %6 : vector<1x256xf32> to vector<12x256xf32>
    %51 = arith.mulf %49, %50 : vector<12x256xf32>
    %52 = arith.addf %46, %51 : vector<12x256xf32>
    %c28_i32 = arith.constant 28 : i32
    %53 = tpu.dynamic_rotate %13 by %c28_i32 dim 0 : vector<112x256xf32>, i32 -> vector<112x256xf32>
    %54 = vector.extract_strided_slice %53 {offsets = [0, 0], sizes = [12, 256], strides = [1, 1]} : vector<112x256xf32> to vector<12x256xf32>
    %c240_i32 = arith.constant 240 : i32
    %55 = tpu.dynamic_rotate %54 by %c240_i32 dim 1 : vector<12x256xf32>, i32 -> vector<12x256xf32>
    %56 = vector.broadcast %7 : vector<1x256xf32> to vector<12x256xf32>
    %57 = arith.mulf %55, %56 : vector<12x256xf32>
    %58 = arith.addf %52, %57 : vector<12x256xf32>
    %c16_i32_7 = arith.constant 16 : i32
    %59 = tpu.dynamic_rotate %13 by %c16_i32_7 dim 0 : vector<112x256xf32>, i32 -> vector<112x256xf32>
    %60 = vector.extract_strided_slice %59 {offsets = [0, 0], sizes = [12, 256], strides = [1, 1]} : vector<112x256xf32> to vector<12x256xf32>
    %c239_i32 = arith.constant 239 : i32
    %61 = tpu.dynamic_rotate %60 by %c239_i32 dim 1 : vector<12x256xf32>, i32 -> vector<12x256xf32>
    %62 = vector.broadcast %8 : vector<1x256xf32> to vector<12x256xf32>
    %63 = arith.mulf %61, %62 : vector<12x256xf32>
    %64 = arith.addf %58, %63 : vector<12x256xf32>
    %c0_8 = arith.constant 0 : index
    %c0_9 = arith.constant 0 : index
    %65 = vector.load %arg4[%c0_8, %c0_9] : memref<12x1xf32, #tpu.memory_space<vmem>>, vector<12x1xf32>
    %66 = vector.broadcast %65 : vector<12x1xf32> to vector<12x256xf32>
    %67 = arith.addf %64, %66 : vector<12x256xf32>
    %68 = arith.truncf %67 : vector<12x256xf32> to vector<12x256xbf16>
    %c0_10 = arith.constant 0 : index
    %c0_11 = arith.constant 0 : index
    %69 = vector.load %arg5[%c0_10, %c0_11] : memref<112x12xbf16, #tpu.memory_space<vmem>>, vector<112x12xbf16>
    %cst_12 = arith.constant dense<0.000000e+00> : vector<112x256xf32>
    %70 = tpu.matmul %69, %68, %cst_12 {dimension_numbers = #tpu.dot_dimension_numbers<[1], [0], [0], [1], [0, 0, 1, 1], [], []>} : vector<112x12xbf16>, vector<12x256xbf16>, vector<112x256xf32> -> vector<112x256xf32>
    %cst_13 = arith.constant 0.000000e+00 : f32
    %71 = vector.broadcast %cst_13 : f32 to vector<12x256xf32>
    %72 = vector.extract_strided_slice %70 {offsets = [0, 0], sizes = [12, 256], strides = [1, 1]} : vector<112x256xf32> to vector<12x256xf32>
    %c17_i32_14 = arith.constant 17 : i32
    %73 = tpu.dynamic_rotate %72 by %c17_i32_14 dim 1 : vector<12x256xf32>, i32 -> vector<12x256xf32>
    %74 = vector.broadcast %1 : vector<1x256xf32> to vector<12x256xf32>
    %75 = arith.mulf %73, %74 : vector<12x256xf32>
    %76 = arith.addf %71, %75 : vector<12x256xf32>
    %c100_i32_15 = arith.constant 100 : i32
    %77 = tpu.dynamic_rotate %70 by %c100_i32_15 dim 0 : vector<112x256xf32>, i32 -> vector<112x256xf32>
    %78 = vector.extract_strided_slice %77 {offsets = [0, 0], sizes = [12, 256], strides = [1, 1]} : vector<112x256xf32> to vector<12x256xf32>
    %c16_i32_16 = arith.constant 16 : i32
    %79 = tpu.dynamic_rotate %78 by %c16_i32_16 dim 1 : vector<12x256xf32>, i32 -> vector<12x256xf32>
    %80 = vector.broadcast %2 : vector<1x256xf32> to vector<12x256xf32>
    %81 = arith.mulf %79, %80 : vector<12x256xf32>
    %82 = arith.addf %76, %81 : vector<12x256xf32>
    %c88_i32_17 = arith.constant 88 : i32
    %83 = tpu.dynamic_rotate %70 by %c88_i32_17 dim 0 : vector<112x256xf32>, i32 -> vector<112x256xf32>
    %84 = vector.extract_strided_slice %83 {offsets = [0, 0], sizes = [12, 256], strides = [1, 1]} : vector<112x256xf32> to vector<12x256xf32>
    %c15_i32_18 = arith.constant 15 : i32
    %85 = tpu.dynamic_rotate %84 by %c15_i32_18 dim 1 : vector<12x256xf32>, i32 -> vector<12x256xf32>
    %86 = vector.broadcast %3 : vector<1x256xf32> to vector<12x256xf32>
    %87 = arith.mulf %85, %86 : vector<12x256xf32>
    %88 = arith.addf %82, %87 : vector<12x256xf32>
    %c76_i32_19 = arith.constant 76 : i32
    %89 = tpu.dynamic_rotate %70 by %c76_i32_19 dim 0 : vector<112x256xf32>, i32 -> vector<112x256xf32>
    %90 = vector.extract_strided_slice %89 {offsets = [0, 0], sizes = [12, 256], strides = [1, 1]} : vector<112x256xf32> to vector<12x256xf32>
    %c1_i32_20 = arith.constant 1 : i32
    %91 = tpu.dynamic_rotate %90 by %c1_i32_20 dim 1 : vector<12x256xf32>, i32 -> vector<12x256xf32>
    %92 = vector.broadcast %4 : vector<1x256xf32> to vector<12x256xf32>
    %93 = arith.mulf %91, %92 : vector<12x256xf32>
    %94 = arith.addf %88, %93 : vector<12x256xf32>
    %c64_i32_21 = arith.constant 64 : i32
    %95 = tpu.dynamic_rotate %70 by %c64_i32_21 dim 0 : vector<112x256xf32>, i32 -> vector<112x256xf32>
    %96 = vector.extract_strided_slice %95 {offsets = [0, 0], sizes = [12, 256], strides = [1, 1]} : vector<112x256xf32> to vector<12x256xf32>
    %97 = arith.addf %94, %96 : vector<12x256xf32>
    %c52_i32_22 = arith.constant 52 : i32
    %98 = tpu.dynamic_rotate %70 by %c52_i32_22 dim 0 : vector<112x256xf32>, i32 -> vector<112x256xf32>
    %99 = vector.extract_strided_slice %98 {offsets = [0, 0], sizes = [12, 256], strides = [1, 1]} : vector<112x256xf32> to vector<12x256xf32>
    %c255_i32_23 = arith.constant 255 : i32
    %100 = tpu.dynamic_rotate %99 by %c255_i32_23 dim 1 : vector<12x256xf32>, i32 -> vector<12x256xf32>
    %101 = vector.broadcast %5 : vector<1x256xf32> to vector<12x256xf32>
    %102 = arith.mulf %100, %101 : vector<12x256xf32>
    %103 = arith.addf %97, %102 : vector<12x256xf32>
    %c40_i32_24 = arith.constant 40 : i32
    %104 = tpu.dynamic_rotate %70 by %c40_i32_24 dim 0 : vector<112x256xf32>, i32 -> vector<112x256xf32>
    %105 = vector.extract_strided_slice %104 {offsets = [0, 0], sizes = [12, 256], strides = [1, 1]} : vector<112x256xf32> to vector<12x256xf32>
    %c241_i32_25 = arith.constant 241 : i32
    %106 = tpu.dynamic_rotate %105 by %c241_i32_25 dim 1 : vector<12x256xf32>, i32 -> vector<12x256xf32>
    %107 = vector.broadcast %6 : vector<1x256xf32> to vector<12x256xf32>
    %108 = arith.mulf %106, %107 : vector<12x256xf32>
    %109 = arith.addf %103, %108 : vector<12x256xf32>
    %c28_i32_26 = arith.constant 28 : i32
    %110 = tpu.dynamic_rotate %70 by %c28_i32_26 dim 0 : vector<112x256xf32>, i32 -> vector<112x256xf32>
    %111 = vector.extract_strided_slice %110 {offsets = [0, 0], sizes = [12, 256], strides = [1, 1]} : vector<112x256xf32> to vector<12x256xf32>
    %c240_i32_27 = arith.constant 240 : i32
    %112 = tpu.dynamic_rotate %111 by %c240_i32_27 dim 1 : vector<12x256xf32>, i32 -> vector<12x256xf32>
    %113 = vector.broadcast %7 : vector<1x256xf32> to vector<12x256xf32>
    %114 = arith.mulf %112, %113 : vector<12x256xf32>
    %115 = arith.addf %109, %114 : vector<12x256xf32>
    %c16_i32_28 = arith.constant 16 : i32
    %116 = tpu.dynamic_rotate %70 by %c16_i32_28 dim 0 : vector<112x256xf32>, i32 -> vector<112x256xf32>
    %117 = vector.extract_strided_slice %116 {offsets = [0, 0], sizes = [12, 256], strides = [1, 1]} : vector<112x256xf32> to vector<12x256xf32>
    %c239_i32_29 = arith.constant 239 : i32
    %118 = tpu.dynamic_rotate %117 by %c239_i32_29 dim 1 : vector<12x256xf32>, i32 -> vector<12x256xf32>
    %119 = vector.broadcast %8 : vector<1x256xf32> to vector<12x256xf32>
    %120 = arith.mulf %118, %119 : vector<12x256xf32>
    %121 = arith.addf %115, %120 : vector<12x256xf32>
    %c0_30 = arith.constant 0 : index
    %c0_31 = arith.constant 0 : index
    %122 = vector.load %arg6[%c0_30, %c0_31] : memref<12x1xf32, #tpu.memory_space<vmem>>, vector<12x1xf32>
    %123 = vector.broadcast %122 : vector<12x1xf32> to vector<12x256xf32>
    %124 = arith.addf %121, %123 : vector<12x256xf32>
    %125 = arith.truncf %124 : vector<12x256xf32> to vector<12x256xbf16>
    %c0_32 = arith.constant 0 : index
    %c0_33 = arith.constant 0 : index
    %126 = vector.load %arg7[%c0_32, %c0_33] : memref<56x12xbf16, #tpu.memory_space<vmem>>, vector<56x12xbf16>
    %cst_34 = arith.constant dense<0.000000e+00> : vector<56x256xf32>
    %127 = tpu.matmul %126, %125, %cst_34 {dimension_numbers = #tpu.dot_dimension_numbers<[1], [0], [0], [1], [0, 0, 1, 1], [], []>} : vector<56x12xbf16>, vector<12x256xbf16>, vector<56x256xf32> -> vector<56x256xf32>
    %cst_35 = arith.constant 0.000000e+00 : f32
    %128 = vector.broadcast %cst_35 : f32 to vector<6x256xf32>
    %129 = vector.extract_strided_slice %127 {offsets = [0, 0], sizes = [6, 256], strides = [1, 1]} : vector<56x256xf32> to vector<6x256xf32>
    %c17_i32_36 = arith.constant 17 : i32
    %130 = tpu.dynamic_rotate %129 by %c17_i32_36 dim 1 : vector<6x256xf32>, i32 -> vector<6x256xf32>
    %131 = vector.broadcast %1 : vector<1x256xf32> to vector<6x256xf32>
    %132 = arith.mulf %130, %131 : vector<6x256xf32>
    %133 = arith.addf %128, %132 : vector<6x256xf32>
    %c50_i32 = arith.constant 50 : i32
    %134 = tpu.dynamic_rotate %127 by %c50_i32 dim 0 : vector<56x256xf32>, i32 -> vector<56x256xf32>
    %135 = vector.extract_strided_slice %134 {offsets = [0, 0], sizes = [6, 256], strides = [1, 1]} : vector<56x256xf32> to vector<6x256xf32>
    %c16_i32_37 = arith.constant 16 : i32
    %136 = tpu.dynamic_rotate %135 by %c16_i32_37 dim 1 : vector<6x256xf32>, i32 -> vector<6x256xf32>
    %137 = vector.broadcast %2 : vector<1x256xf32> to vector<6x256xf32>
    %138 = arith.mulf %136, %137 : vector<6x256xf32>
    %139 = arith.addf %133, %138 : vector<6x256xf32>
    %c44_i32 = arith.constant 44 : i32
    %140 = tpu.dynamic_rotate %127 by %c44_i32 dim 0 : vector<56x256xf32>, i32 -> vector<56x256xf32>
    %141 = vector.extract_strided_slice %140 {offsets = [0, 0], sizes = [6, 256], strides = [1, 1]} : vector<56x256xf32> to vector<6x256xf32>
    %c15_i32_38 = arith.constant 15 : i32
    %142 = tpu.dynamic_rotate %141 by %c15_i32_38 dim 1 : vector<6x256xf32>, i32 -> vector<6x256xf32>
    %143 = vector.broadcast %3 : vector<1x256xf32> to vector<6x256xf32>
    %144 = arith.mulf %142, %143 : vector<6x256xf32>
    %145 = arith.addf %139, %144 : vector<6x256xf32>
    %c38_i32 = arith.constant 38 : i32
    %146 = tpu.dynamic_rotate %127 by %c38_i32 dim 0 : vector<56x256xf32>, i32 -> vector<56x256xf32>
    %147 = vector.extract_strided_slice %146 {offsets = [0, 0], sizes = [6, 256], strides = [1, 1]} : vector<56x256xf32> to vector<6x256xf32>
    %c1_i32_39 = arith.constant 1 : i32
    %148 = tpu.dynamic_rotate %147 by %c1_i32_39 dim 1 : vector<6x256xf32>, i32 -> vector<6x256xf32>
    %149 = vector.broadcast %4 : vector<1x256xf32> to vector<6x256xf32>
    %150 = arith.mulf %148, %149 : vector<6x256xf32>
    %151 = arith.addf %145, %150 : vector<6x256xf32>
    %c32_i32 = arith.constant 32 : i32
    %152 = tpu.dynamic_rotate %127 by %c32_i32 dim 0 : vector<56x256xf32>, i32 -> vector<56x256xf32>
    %153 = vector.extract_strided_slice %152 {offsets = [0, 0], sizes = [6, 256], strides = [1, 1]} : vector<56x256xf32> to vector<6x256xf32>
    %154 = arith.addf %151, %153 : vector<6x256xf32>
    %c26_i32 = arith.constant 26 : i32
    %155 = tpu.dynamic_rotate %127 by %c26_i32 dim 0 : vector<56x256xf32>, i32 -> vector<56x256xf32>
    %156 = vector.extract_strided_slice %155 {offsets = [0, 0], sizes = [6, 256], strides = [1, 1]} : vector<56x256xf32> to vector<6x256xf32>
    %c255_i32_40 = arith.constant 255 : i32
    %157 = tpu.dynamic_rotate %156 by %c255_i32_40 dim 1 : vector<6x256xf32>, i32 -> vector<6x256xf32>
    %158 = vector.broadcast %5 : vector<1x256xf32> to vector<6x256xf32>
    %159 = arith.mulf %157, %158 : vector<6x256xf32>
    %160 = arith.addf %154, %159 : vector<6x256xf32>
    %c20_i32 = arith.constant 20 : i32
    %161 = tpu.dynamic_rotate %127 by %c20_i32 dim 0 : vector<56x256xf32>, i32 -> vector<56x256xf32>
    %162 = vector.extract_strided_slice %161 {offsets = [0, 0], sizes = [6, 256], strides = [1, 1]} : vector<56x256xf32> to vector<6x256xf32>
    %c241_i32_41 = arith.constant 241 : i32
    %163 = tpu.dynamic_rotate %162 by %c241_i32_41 dim 1 : vector<6x256xf32>, i32 -> vector<6x256xf32>
    %164 = vector.broadcast %6 : vector<1x256xf32> to vector<6x256xf32>
    %165 = arith.mulf %163, %164 : vector<6x256xf32>
    %166 = arith.addf %160, %165 : vector<6x256xf32>
    %c14_i32 = arith.constant 14 : i32
    %167 = tpu.dynamic_rotate %127 by %c14_i32 dim 0 : vector<56x256xf32>, i32 -> vector<56x256xf32>
    %168 = vector.extract_strided_slice %167 {offsets = [0, 0], sizes = [6, 256], strides = [1, 1]} : vector<56x256xf32> to vector<6x256xf32>
    %c240_i32_42 = arith.constant 240 : i32
    %169 = tpu.dynamic_rotate %168 by %c240_i32_42 dim 1 : vector<6x256xf32>, i32 -> vector<6x256xf32>
    %170 = vector.broadcast %7 : vector<1x256xf32> to vector<6x256xf32>
    %171 = arith.mulf %169, %170 : vector<6x256xf32>
    %172 = arith.addf %166, %171 : vector<6x256xf32>
    %c8_i32 = arith.constant 8 : i32
    %173 = tpu.dynamic_rotate %127 by %c8_i32 dim 0 : vector<56x256xf32>, i32 -> vector<56x256xf32>
    %174 = vector.extract_strided_slice %173 {offsets = [0, 0], sizes = [6, 256], strides = [1, 1]} : vector<56x256xf32> to vector<6x256xf32>
    %c239_i32_43 = arith.constant 239 : i32
    %175 = tpu.dynamic_rotate %174 by %c239_i32_43 dim 1 : vector<6x256xf32>, i32 -> vector<6x256xf32>
    %176 = vector.broadcast %8 : vector<1x256xf32> to vector<6x256xf32>
    %177 = arith.mulf %175, %176 : vector<6x256xf32>
    %178 = arith.addf %172, %177 : vector<6x256xf32>
    %c0_44 = arith.constant 0 : index
    %c0_45 = arith.constant 0 : index
    %179 = vector.load %arg8[%c0_44, %c0_45] : memref<6x1xf32, #tpu.memory_space<vmem>>, vector<6x1xf32>
    %180 = vector.broadcast %179 : vector<6x1xf32> to vector<6x256xf32>
    %181 = arith.addf %178, %180 : vector<6x256xf32>
    %cst_46 = arith.constant 0.000000e+00 : f32
    %182 = vector.broadcast %cst_46 : f32 to vector<6x256xf32>
    %183 = arith.maximumf %181, %182 : vector<6x256xf32>
    %184 = arith.truncf %183 : vector<6x256xf32> to vector<6x256xbf16>
    %c0_47 = arith.constant 0 : index
    %c0_48 = arith.constant 0 : index
    %185 = vector.load %arg9[%c0_47, %c0_48] : memref<32x6xbf16, #tpu.memory_space<vmem>>, vector<32x6xbf16>
    %cst_49 = arith.constant dense<0.000000e+00> : vector<32x256xf32>
    %186 = tpu.matmul %185, %184, %cst_49 {dimension_numbers = #tpu.dot_dimension_numbers<[1], [0], [0], [1], [0, 0, 1, 1], [], []>} : vector<32x6xbf16>, vector<6x256xbf16>, vector<32x256xf32> -> vector<32x256xf32>
    %cst_50 = arith.constant 0.000000e+00 : f32
    %187 = vector.broadcast %cst_50 : f32 to vector<3x256xf32>
    %188 = vector.extract_strided_slice %186 {offsets = [0, 0], sizes = [3, 256], strides = [1, 1]} : vector<32x256xf32> to vector<3x256xf32>
    %c17_i32_51 = arith.constant 17 : i32
    %189 = tpu.dynamic_rotate %188 by %c17_i32_51 dim 1 : vector<3x256xf32>, i32 -> vector<3x256xf32>
    %190 = vector.broadcast %1 : vector<1x256xf32> to vector<3x256xf32>
    %191 = arith.mulf %189, %190 : vector<3x256xf32>
    %192 = arith.addf %187, %191 : vector<3x256xf32>
    %c29_i32 = arith.constant 29 : i32
    %193 = tpu.dynamic_rotate %186 by %c29_i32 dim 0 : vector<32x256xf32>, i32 -> vector<32x256xf32>
    %194 = vector.extract_strided_slice %193 {offsets = [0, 0], sizes = [3, 256], strides = [1, 1]} : vector<32x256xf32> to vector<3x256xf32>
    %c16_i32_52 = arith.constant 16 : i32
    %195 = tpu.dynamic_rotate %194 by %c16_i32_52 dim 1 : vector<3x256xf32>, i32 -> vector<3x256xf32>
    %196 = vector.broadcast %2 : vector<1x256xf32> to vector<3x256xf32>
    %197 = arith.mulf %195, %196 : vector<3x256xf32>
    %198 = arith.addf %192, %197 : vector<3x256xf32>
    %c26_i32_53 = arith.constant 26 : i32
    %199 = tpu.dynamic_rotate %186 by %c26_i32_53 dim 0 : vector<32x256xf32>, i32 -> vector<32x256xf32>
    %200 = vector.extract_strided_slice %199 {offsets = [0, 0], sizes = [3, 256], strides = [1, 1]} : vector<32x256xf32> to vector<3x256xf32>
    %c15_i32_54 = arith.constant 15 : i32
    %201 = tpu.dynamic_rotate %200 by %c15_i32_54 dim 1 : vector<3x256xf32>, i32 -> vector<3x256xf32>
    %202 = vector.broadcast %3 : vector<1x256xf32> to vector<3x256xf32>
    %203 = arith.mulf %201, %202 : vector<3x256xf32>
    %204 = arith.addf %198, %203 : vector<3x256xf32>
    %c23_i32 = arith.constant 23 : i32
    %205 = tpu.dynamic_rotate %186 by %c23_i32 dim 0 : vector<32x256xf32>, i32 -> vector<32x256xf32>
    %206 = vector.extract_strided_slice %205 {offsets = [0, 0], sizes = [3, 256], strides = [1, 1]} : vector<32x256xf32> to vector<3x256xf32>
    %c1_i32_55 = arith.constant 1 : i32
    %207 = tpu.dynamic_rotate %206 by %c1_i32_55 dim 1 : vector<3x256xf32>, i32 -> vector<3x256xf32>
    %208 = vector.broadcast %4 : vector<1x256xf32> to vector<3x256xf32>
    %209 = arith.mulf %207, %208 : vector<3x256xf32>
    %210 = arith.addf %204, %209 : vector<3x256xf32>
    %c20_i32_56 = arith.constant 20 : i32
    %211 = tpu.dynamic_rotate %186 by %c20_i32_56 dim 0 : vector<32x256xf32>, i32 -> vector<32x256xf32>
    %212 = vector.extract_strided_slice %211 {offsets = [0, 0], sizes = [3, 256], strides = [1, 1]} : vector<32x256xf32> to vector<3x256xf32>
    %213 = arith.addf %210, %212 : vector<3x256xf32>
    %c17_i32_57 = arith.constant 17 : i32
    %214 = tpu.dynamic_rotate %186 by %c17_i32_57 dim 0 : vector<32x256xf32>, i32 -> vector<32x256xf32>
    %215 = vector.extract_strided_slice %214 {offsets = [0, 0], sizes = [3, 256], strides = [1, 1]} : vector<32x256xf32> to vector<3x256xf32>
    %c255_i32_58 = arith.constant 255 : i32
    %216 = tpu.dynamic_rotate %215 by %c255_i32_58 dim 1 : vector<3x256xf32>, i32 -> vector<3x256xf32>
    %217 = vector.broadcast %5 : vector<1x256xf32> to vector<3x256xf32>
    %218 = arith.mulf %216, %217 : vector<3x256xf32>
    %219 = arith.addf %213, %218 : vector<3x256xf32>
    %c14_i32_59 = arith.constant 14 : i32
    %220 = tpu.dynamic_rotate %186 by %c14_i32_59 dim 0 : vector<32x256xf32>, i32 -> vector<32x256xf32>
    %221 = vector.extract_strided_slice %220 {offsets = [0, 0], sizes = [3, 256], strides = [1, 1]} : vector<32x256xf32> to vector<3x256xf32>
    %c241_i32_60 = arith.constant 241 : i32
    %222 = tpu.dynamic_rotate %221 by %c241_i32_60 dim 1 : vector<3x256xf32>, i32 -> vector<3x256xf32>
    %223 = vector.broadcast %6 : vector<1x256xf32> to vector<3x256xf32>
    %224 = arith.mulf %222, %223 : vector<3x256xf32>
    %225 = arith.addf %219, %224 : vector<3x256xf32>
    %c11_i32 = arith.constant 11 : i32
    %226 = tpu.dynamic_rotate %186 by %c11_i32 dim 0 : vector<32x256xf32>, i32 -> vector<32x256xf32>
    %227 = vector.extract_strided_slice %226 {offsets = [0, 0], sizes = [3, 256], strides = [1, 1]} : vector<32x256xf32> to vector<3x256xf32>
    %c240_i32_61 = arith.constant 240 : i32
    %228 = tpu.dynamic_rotate %227 by %c240_i32_61 dim 1 : vector<3x256xf32>, i32 -> vector<3x256xf32>
    %229 = vector.broadcast %7 : vector<1x256xf32> to vector<3x256xf32>
    %230 = arith.mulf %228, %229 : vector<3x256xf32>
    %231 = arith.addf %225, %230 : vector<3x256xf32>
    %c8_i32_62 = arith.constant 8 : i32
    %232 = tpu.dynamic_rotate %186 by %c8_i32_62 dim 0 : vector<32x256xf32>, i32 -> vector<32x256xf32>
    %233 = vector.extract_strided_slice %232 {offsets = [0, 0], sizes = [3, 256], strides = [1, 1]} : vector<32x256xf32> to vector<3x256xf32>
    %c239_i32_63 = arith.constant 239 : i32
    %234 = tpu.dynamic_rotate %233 by %c239_i32_63 dim 1 : vector<3x256xf32>, i32 -> vector<3x256xf32>
    %235 = vector.broadcast %8 : vector<1x256xf32> to vector<3x256xf32>
    %236 = arith.mulf %234, %235 : vector<3x256xf32>
    %237 = arith.addf %231, %236 : vector<3x256xf32>
    %c0_64 = arith.constant 0 : index
    %c0_65 = arith.constant 0 : index
    %238 = vector.load %arg10[%c0_64, %c0_65] : memref<3x1xf32, #tpu.memory_space<vmem>>, vector<3x1xf32>
    %239 = vector.broadcast %238 : vector<3x1xf32> to vector<3x256xf32>
    %240 = arith.addf %237, %239 : vector<3x256xf32>
    %cst_66 = arith.constant 0.000000e+00 : f32
    %241 = vector.broadcast %cst_66 : f32 to vector<3x256xf32>
    %242 = arith.maximumf %240, %241 : vector<3x256xf32>
    %c0_67 = arith.constant 0 : index
    %c0_68 = arith.constant 0 : index
    %243 = vector.load %arg11[%c0_67, %c0_68] : memref<3x1xf32, #tpu.memory_space<vmem>>, vector<3x1xf32>
    %244 = vector.broadcast %243 : vector<3x1xf32> to vector<3x256xf32>
    %245 = arith.mulf %242, %244 : vector<3x256xf32>
    %cst_69 = arith.constant dense<0.000000e+00> : vector<256xf32>
    %246 = vector.multi_reduction <add>, %245, %cst_69 [0] : vector<3x256xf32> to vector<256xf32>
    %247 = vector.shape_cast %246 : vector<256xf32> to vector<1x256xf32>
    %c0_70 = arith.constant 0 : index
    %c0_71 = arith.constant 0 : index
    %248 = vector.load %arg12[%c0_70, %c0_71] : memref<1x1xf32, #tpu.memory_space<vmem>>, vector<1x1xf32>
    %249 = vector.broadcast %248 : vector<1x1xf32> to vector<1x256xf32>
    %250 = arith.addf %247, %249 : vector<1x256xf32>
    %251 = vector.shape_cast %250 : vector<1x256xf32> to vector<1x1x256xf32>
    %c0_72 = arith.constant 0 : index
    %c0_73 = arith.constant 0 : index
    %c0_74 = arith.constant 0 : index
    %252 = vector.load %arg13[%c0_72, %c0_73, %c0_74] : memref<1x1x256xf32, #tpu.memory_space<vmem>>, vector<1x1x256xf32>
    tpu.vector_store %arg13[%c0_72, %c0_73, %c0_74], %251 {strides = array<i32>} : memref<1x1x256xf32, #tpu.memory_space<vmem>>, vector<1x1x256xf32>,
    return
  }
  func.func @transform_0(%arg0: i32) -> (i32, i32) {
    %c0_i32 = arith.constant 0 : i32
    %c0_i32_0 = arith.constant 0 : i32
    %c0_i32_1 = arith.constant 0 : i32
    return %c0_i32, %c0_i32_0 : i32, i32
  }
  func.func @transform_1(%arg0: i32) -> (i32, i32, i32) {
    %c0_i32 = arith.constant 0 : i32
    %c0_i32_0 = arith.constant 0 : i32
    %c0_i32_1 = arith.constant 0 : i32
    return %arg0, %c0_i32, %c0_i32_0 : i32, i32, i32
  }
  func.func @transform_2(%arg0: i32) -> (i32, i32) {
    %c0_i32 = arith.constant 0 : i32
    %c0_i32_0 = arith.constant 0 : i32
    %c0_i32_1 = arith.constant 0 : i32
    return %c0_i32, %c0_i32_0 : i32, i32
  }
  func.func @transform_3(%arg0: i32) -> (i32, i32) {
    %c0_i32 = arith.constant 0 : i32
    %c0_i32_0 = arith.constant 0 : i32
    %c0_i32_1 = arith.constant 0 : i32
    return %c0_i32, %c0_i32_0 : i32, i32
  }
  func.func @transform_4(%arg0: i32) -> (i32, i32) {
    %c0_i32 = arith.constant 0 : i32
    %c0_i32_0 = arith.constant 0 : i32
    %c0_i32_1 = arith.constant 0 : i32
    return %c0_i32, %c0_i32_0 : i32, i32
  }
  func.func @transform_5(%arg0: i32) -> (i32, i32) {
    %c0_i32 = arith.constant 0 : i32
    %c0_i32_0 = arith.constant 0 : i32
    %c0_i32_1 = arith.constant 0 : i32
    return %c0_i32, %c0_i32_0 : i32, i32
  }
  func.func @transform_6(%arg0: i32) -> (i32, i32) {
    %c0_i32 = arith.constant 0 : i32
    %c0_i32_0 = arith.constant 0 : i32
    %c0_i32_1 = arith.constant 0 : i32
    return %c0_i32, %c0_i32_0 : i32, i32
  }
  func.func @transform_7(%arg0: i32) -> (i32, i32) {
    %c0_i32 = arith.constant 0 : i32
    %c0_i32_0 = arith.constant 0 : i32
    %c0_i32_1 = arith.constant 0 : i32
    return %c0_i32, %c0_i32_0 : i32, i32
  }
  func.func @transform_8(%arg0: i32) -> (i32, i32) {
    %c0_i32 = arith.constant 0 : i32
    %c0_i32_0 = arith.constant 0 : i32
    %c0_i32_1 = arith.constant 0 : i32
    return %c0_i32, %c0_i32_0 : i32, i32
  }
  func.func @transform_9(%arg0: i32) -> (i32, i32) {
    %c0_i32 = arith.constant 0 : i32
    %c0_i32_0 = arith.constant 0 : i32
    %c0_i32_1 = arith.constant 0 : i32
    return %c0_i32, %c0_i32_0 : i32, i32
  }
  func.func @transform_10(%arg0: i32) -> (i32, i32) {
    %c0_i32 = arith.constant 0 : i32
    %c0_i32_0 = arith.constant 0 : i32
    %c0_i32_1 = arith.constant 0 : i32
    return %c0_i32, %c0_i32_0 : i32, i32
  }
  func.func @transform_11(%arg0: i32) -> (i32, i32) {
    %c0_i32 = arith.constant 0 : i32
    %c0_i32_0 = arith.constant 0 : i32
    %c0_i32_1 = arith.constant 0 : i32
    return %c0_i32, %c0_i32_0 : i32, i32
  }
  func.func @transform_12(%arg0: i32) -> (i32, i32, i32) {
    %c0_i32 = arith.constant 0 : i32
    %c0_i32_0 = arith.constant 0 : i32
    %c0_i32_1 = arith.constant 0 : i32
    return %arg0, %c0_i32, %c0_i32_0 : i32, i32, i32
  }
}

</mosaic_0001>

<bundles_post_ra>
// kernel: saliency_block.1
= control target key start
LH: loop header
LB: loop body
LE: loop exit
PB: predicated region body
PF: predicated region fallthrough
CT: control target
= control target key end

     0   :  { %s4463_s23 = smov 0   ;;  %s6658_s0 = inlined_call_operand.vmem [shape: f32[9,256], index: 0, kind: input, shape index: {}]   ;;  %s6659_s1 = inlined_call_operand.vmem [shape: f32[2,2048,256], index: 1, kind: input, shape index: {}]   ;;  %s6660_s2 = inlined_call_operand.vmem [shape: bf16[112,2048], index: 2, kind: input, shape index: {}]   ;;  %s6661_s3 = inlined_call_operand.vmem [shape: f32[12,1], index: 3, kind: input, shape index: {}]   ;;  %s6662_s4 = inlined_call_operand.vmem [shape: bf16[112,12], index: 4, kind: input, shape index: {}]   ;;  %s6663_s5 = inlined_call_operand.vmem [shape: f32[12,1], index: 5, kind: input, shape index: {}]   ;;  %s6664_s6 = inlined_call_operand.vmem [shape: bf16[56,12], index: 6, kind: input, shape index: {}]   ;;  %s6665_s7 = inlined_call_operand.vmem [shape: f32[6,1], index: 7, kind: input, shape index: {}]   ;;  %s6666_s8 = inlined_call_operand.vmem [shape: bf16[32,6], index: 8, kind: input, shape index: {}]   ;;  %s6667_s9 = inlined_call_operand.vmem [shape: f32[3,1], index: 9, kind: input, shape index: {}]   ;;  %s6668_s10 = inlined_call_operand.vmem [shape: f32[3,1], index: 10, kind: input, shape index: {}]   ;;  %s6669_s11 = inlined_call_operand.<no memory space> [shape: f32[1,1], index: 11, kind: input, shape index: {}]   ;;  %s6670_s12 = inlined_call_operand.vmem [shape: f32[2,1,256], index: 12, kind: output, shape index: {}]  }
   0x1   :  { %v17_v0 = vstv %s6669_s11 }
   0x2   :  { %18 = vst [vmem:[#allocation2] sm:$0x1] %v17_v0 }
   0x3 LB: > { %s3960_s24 = sadd.s32 4294967295, %s4383_s23   ;;  %p3964_p0 = scmp.ge.s32.totalorder %s4383_s23, 1  ;;  %s4383_s23 = sphi %s4463_s23, %s24_s23  }
   0x4   : > { %p364_p1 = scmp.lt.s32.totalorder %s4383_s23, 3 }
   0x6   : > { %p365_p2 = pnand %p3964_p0, %p364_p1 }
   0x7   : > { %p405_p3 = scmp.lt.s32.totalorder (!%p365_p2), %s3960_s24, 1  ;;  %v4474_v1 = vld [vmem:[%s6660_s2] sm:$0xff] (!%p365_p2)  ;;  %v4484_v3 = vld [vmem:[%s6660_s2 + $0x18] sm:$0xff] (!%p365_p2)  ;;  %s4386_s28 = smov (!%p365_p2), 111   ;;  %vm3053_vm9 = vcmask (!%p365_p2), 1045504   ;;  %vm3031_vm10 = vcmask (!%p365_p2), 97280  }
   0x8   : > { %368 = sbr.rel (%p365_p2) target bundleno = 1922 (0x782), region = 68  ;;  %v4479_v2 = vld [vmem:[%s6660_s2 + $0x40] sm:$0xff] (!%p365_p2)  ;;  %v4493_v6 = vld [vmem:[%s6660_s2 + $0x58] sm:$0xff] (!%p365_p2)  ;;  %s4387_s29 = smov (!%p365_p2), 17   ;;  %vm3652_vm13 = vcmask (!%p365_p2), 1042432   ;;  %vm3645_vm14 = vcmask (!%p365_p2), 48128  }
   0x9   : > { %v3968_v4 = vcombine.low (!%p365_p2), %v4474_v1, %v4479_v2  ;;  %v3969_v5 = vcombine.high (!%p365_p2), %v4474_v1, %v4479_v2  ;;  %v3974_v7 = vcombine.low (!%p365_p2), %v4484_v3, %v4493_v6  ;;  %v3975_v8 = vcombine.high (!%p365_p2), %v4484_v3, %v4493_v6  ;;  %s4388_s30 = smov (!%p365_p2), 15   ;;  %s4390_s13 = smov (!%p365_p2), 1  }
   0xa   : > { %s4392_s15 = smov (!%p365_p2), 127   ;;  %s4393_s16 = smov (!%p365_p2), 112  }
   0xb   : > { %1891 = vmatprep.mubr.bf16.mxu1 (!%p365_p2), %v3969_v5  ;;  %2200 = vmatprep.mubr.bf16.mxu0 (!%p365_p2), %v3975_v8 }
   0xf   : > { %s6672_s24 = smov (!%p405_p3, %s3960_s24), 1 }
  0x10   : > { %s4113_s14 = sshll.u32 %s6672_s24, 12 }
  0x11   : > { %s4505_s17 = scalar_lea.vmem %s6659_s1, %s4113_s14  ;;  %s4391_s14 = smov 113  }
  0x12   : > { %v420_v9 = vld [vmem:[%s4505_s17 + $0x8] sm:$0xff]  ;;  %v422_v10 = vld [vmem:[%s4505_s17 + $0x18] sm:$0xff]  ;;  %v419_v14 = vld [vmem:[%s4505_s17] sm:$0xff] }
  0x13   : > { %v612_v11 = vld [vmem:[%s4505_s17 + $0x608] sm:$0xff]  ;;  %v932_v12 = vpack.c.bf16 %v422_v10, %v420_v9  ;;  %v614_v13 = vld [vmem:[%s4505_s17 + $0x618] sm:$0xff]  ;;  %v421_v15 = vld [vmem:[%s4505_s17 + $0x10] sm:$0xff] }
  0x14   : > { %v1028_v16 = vpack.c.bf16 %v614_v13, %v612_v11  ;;  %v931_v17 = vpack.c.bf16 %v421_v15, %v419_v14  ;;  %v611_v18 = vld [vmem:[%s4505_s17 + $0x600] sm:$0xff]  ;;  %v613_v19 = vld [vmem:[%s4505_s17 + $0x610] sm:$0xff]  ;;  %v424_v20 = vld [vmem:[%s4505_s17 + $0x28] sm:$0xff] }
  0x15   : > { %1859 = vmatprep.subr.bf16.mxu1 %v932_v12  ;;  %v1027_v21 = vpack.c.bf16 %v613_v19, %v611_v18  ;;  %v426_v22 = vld [vmem:[%s4505_s17 + $0x38] sm:$0xff]  ;;  %v616_v23 = vld [vmem:[%s4505_s17 + $0x628] sm:$0xff]  ;;  %v423_v27 = vld [vmem:[%s4505_s17 + $0x20] sm:$0xff] }
  0x16   : > { %v618_v24 = vld [vmem:[%s4505_s17 + $0x638] sm:$0xff]  ;;  %2168 = vmatprep.subr.bf16.mxu0 %v1028_v16  ;;  %1860 = vmatpush1.bf16.msra.mxu1 %v931_v17  ;;  %v934_v25 = vpack.c.bf16 %v426_v22, %v424_v20  ;;  %v425_v28 = vld [vmem:[%s4505_s17 + $0x30] sm:$0xff]  ;;  %v615_v29 = vld [vmem:[%s4505_s17 + $0x620] sm:$0xff] }
  0x17   : > { %v1030_v26 = vpack.c.bf16 %v618_v24, %v616_v23  ;;  %2169 = vmatpush1.bf16.msra.mxu0 %v1027_v21  ;;  %v933_v30 = vpack.c.bf16 %v425_v28, %v423_v27  ;;  %v617_v31 = vld [vmem:[%s4505_s17 + $0x630] sm:$0xff]  ;;  %v428_v32 = vld [vmem:[%s4505_s17 + $0x48] sm:$0xff]  ;;  %v430_v33 = vld [vmem:[%s4505_s17 + $0x58] sm:$0xff] }
  0x18   : > { %1861 = vmatprep.subr.bf16.mxu1 %v934_v25  ;;  %v1029_v34 = vpack.c.bf16 %v617_v31, %v615_v29  ;;  %v936_v35 = vpack.c.bf16 %v430_v33, %v428_v32  ;;  %v620_v36 = vld [vmem:[%s4505_s17 + $0x648] sm:$0xff]  ;;  %v622_v37 = vld [vmem:[%s4505_s17 + $0x658] sm:$0xff]  ;;  %v427_v38 = vld [vmem:[%s4505_s17 + $0x40] sm:$0xff] }
  0x19   : > { %2170 = vmatprep.subr.bf16.mxu0 %v1030_v26  ;;  %v1032_v39 = vpack.c.bf16 %v622_v37, %v620_v36  ;;  %v429_v40 = vld [vmem:[%s4505_s17 + $0x50] sm:$0xff]  ;;  %v619_v41 = vld [vmem:[%s4505_s17 + $0x640] sm:$0xff]  ;;  %v432_v44 = vld [vmem:[%s4505_s17 + $0x68] sm:$0xff] }
  0x1a   : > { %v621_v42 = vld [vmem:[%s4505_s17 + $0x650] sm:$0xff]  ;;  %1862 = vmatpush1.bf16.msra.mxu1 %v933_v30  ;;  %v935_v43 = vpack.c.bf16 %v429_v40, %v427_v38  ;;  %v434_v45 = vld [vmem:[%s4505_s17 + $0x78] sm:$0xff]  ;;  %v624_v46 = vld [vmem:[%s4505_s17 + $0x668] sm:$0xff] }
  0x1b   : > { %2171 = vmatpush1.bf16.msra.mxu0 %v1029_v34  ;;  %1863 = vmatprep.subr.bf16.mxu1 %v936_v35  ;;  %v1031_v47 = vpack.c.bf16 %v621_v42, %v619_v41  ;;  %v938_v48 = vpack.c.bf16 %v434_v45, %v432_v44  ;;  %v626_v49 = vld [vmem:[%s4505_s17 + $0x678] sm:$0xff]  ;;  %v431_v50 = vld [vmem:[%s4505_s17 + $0x60] sm:$0xff]  ;;  %v433_v51 = vld [vmem:[%s4505_s17 + $0x70] sm:$0xff] }
  0x1c   : > { %2172 = vmatprep.subr.bf16.mxu0 %v1032_v39  ;;  %v1034_v52 = vpack.c.bf16 %v626_v49, %v624_v46  ;;  %v623_v53 = vld [vmem:[%s4505_s17 + $0x660] sm:$0xff]  ;;  %v625_v54 = vld [vmem:[%s4505_s17 + $0x670] sm:$0xff]  ;;  %v436_v55 = vld [vmem:[%s4505_s17 + $0x88] sm:$0xff]  ;;  %v937_v59 = vpack.c.bf16 %v433_v51, %v431_v50 }
  0x1d   : > { %v438_v56 = vld [vmem:[%s4505_s17 + $0x98] sm:$0xff]  ;;  %v628_v57 = vld [vmem:[%s4505_s17 + $0x688] sm:$0xff]  ;;  %v1033_v60 = vpack.c.bf16 %v625_v54, %v623_v53  ;;  %v435_v62 = vld [vmem:[%s4505_s17 + $0x80] sm:$0xff] }
  0x1e   : > { %v630_v58 = vld [vmem:[%s4505_s17 + $0x698] sm:$0xff]  ;;  %1864 = vmatpush1.bf16.msra.mxu1 %v935_v43  ;;  %v940_v61 = vpack.c.bf16 %v438_v56, %v436_v55  ;;  %v437_v63 = vld [vmem:[%s4505_s17 + $0x90] sm:$0xff]  ;;  %v627_v0 = vld [vmem:[%s4505_s17 + $0x680] sm:$0xff] }
  0x1f   : > { %2173 = vmatpush1.bf16.msra.mxu0 %v1031_v47  ;;  %1865 = vmatprep.subr.bf16.mxu1 %v938_v48  ;;  %v1036_v5 = vpack.c.bf16 %v630_v58, %v628_v57  ;;  %v629_v8 = vld [vmem:[%s4505_s17 + $0x690] sm:$0xff]  ;;  %v440_v9 = vld [vmem:[%s4505_s17 + $0xa8] sm:$0xff]  ;;  %v442_v10 = vld [vmem:[%s4505_s17 + $0xb8] sm:$0xff]  ;;  %v939_v13 = vpack.c.bf16 %v437_v63, %v435_v62 }
  0x20   : > { %2174 = vmatprep.subr.bf16.mxu0 %v1034_v52  ;;  %v632_v11 = vld [vmem:[%s4505_s17 + $0x6a8] sm:$0xff]  ;;  %v634_v12 = vld [vmem:[%s4505_s17 + $0x6b8] sm:$0xff]  ;;  %v1035_v14 = vpack.c.bf16 %v629_v8, %v627_v0  ;;  %v942_v15 = vpack.c.bf16 %v442_v10, %v440_v9  ;;  %v439_v16 = vld [vmem:[%s4505_s17 + $0xa0] sm:$0xff] }
  0x21   : > { %v441_v17 = vld [vmem:[%s4505_s17 + $0xb0] sm:$0xff]  ;;  %v631_v18 = vld [vmem:[%s4505_s17 + $0x6a0] sm:$0xff]  ;;  %v1038_v19 = vpack.c.bf16 %v634_v12, %v632_v11  ;;  %v444_v21 = vld [vmem:[%s4505_s17 + $0xc8] sm:$0xff] }
  0x22   : > { %1866 = vmatpush1.bf16.msra.mxu1 %v937_v59  ;;  %v633_v20 = vld [vmem:[%s4505_s17 + $0x6b0] sm:$0xff]  ;;  %v446_v22 = vld [vmem:[%s4505_s17 + $0xd8] sm:$0xff]  ;;  %v636_v23 = vld [vmem:[%s4505_s17 + $0x6c8] sm:$0xff]  ;;  %v941_v25 = vpack.c.bf16 %v441_v17, %v439_v16 }
  0x23   : > { %2175 = vmatpush1.bf16.msra.mxu0 %v1033_v60  ;;  %1867 = vmatprep.subr.bf16.mxu1 %v940_v61  ;;  %v638_v24 = vld [vmem:[%s4505_s17 + $0x6d8] sm:$0xff]  ;;  %v1037_v26 = vpack.c.bf16 %v633_v20, %v631_v18  ;;  %v944_v27 = vpack.c.bf16 %v446_v22, %v444_v21  ;;  %v443_v28 = vld [vmem:[%s4505_s17 + $0xc0] sm:$0xff]  ;;  %v445_v29 = vld [vmem:[%s4505_s17 + $0xd0] sm:$0xff] }
  0x24   : > { %2176 = vmatprep.subr.bf16.mxu0 %v1036_v5  ;;  %v635_v30 = vld [vmem:[%s4505_s17 + $0x6c0] sm:$0xff]  ;;  %v1040_v31 = vpack.c.bf16 %v638_v24, %v636_v23  ;;  %v637_v32 = vld [vmem:[%s4505_s17 + $0x6d0] sm:$0xff]  ;;  %v448_v33 = vld [vmem:[%s4505_s17 + $0xe8] sm:$0xff]  ;;  %v943_v37 = vpack.c.bf16 %v445_v29, %v443_v28 }
  0x25   : > { %v450_v34 = vld [vmem:[%s4505_s17 + $0xf8] sm:$0xff]  ;;  %v640_v35 = vld [vmem:[%s4505_s17 + $0x6e8] sm:$0xff]  ;;  %v1039_v38 = vpack.c.bf16 %v637_v32, %v635_v30  ;;  %v447_v40 = vld [vmem:[%s4505_s17 + $0xe0] sm:$0xff] }
  0x26   : > { %1868 = vmatpush1.bf16.msra.mxu1 %v939_v13  ;;  %v642_v36 = vld [vmem:[%s4505_s17 + $0x6f8] sm:$0xff]  ;;  %v946_v39 = vpack.c.bf16 %v450_v34, %v448_v33  ;;  %v449_v41 = vld [vmem:[%s4505_s17 + $0xf0] sm:$0xff]  ;;  %v639_v42 = vld [vmem:[%s4505_s17 + $0x6e0] sm:$0xff] }
  0x27   : > { %2177 = vmatpush1.bf16.msra.mxu0 %v1035_v14  ;;  %1869 = vmatprep.subr.bf16.mxu1 %v942_v15  ;;  %v1042_v43 = vpack.c.bf16 %v642_v36, %v640_v35  ;;  %v641_v44 = vld [vmem:[%s4505_s17 + $0x6f0] sm:$0xff]  ;;  %v452_v45 = vld [vmem:[%s4505_s17 + $0x108] sm:$0xff]  ;;  %v454_v46 = vld [vmem:[%s4505_s17 + $0x118] sm:$0xff]  ;;  %v945_v49 = vpack.c.bf16 %v449_v41, %v447_v40 }
  0x28   : > { %2178 = vmatprep.subr.bf16.mxu0 %v1038_v19  ;;  %v644_v47 = vld [vmem:[%s4505_s17 + $0x708] sm:$0xff]  ;;  %v646_v48 = vld [vmem:[%s4505_s17 + $0x718] sm:$0xff]  ;;  %v1041_v50 = vpack.c.bf16 %v641_v44, %v639_v42  ;;  %v948_v51 = vpack.c.bf16 %v454_v46, %v452_v45  ;;  %v451_v52 = vld [vmem:[%s4505_s17 + $0x100] sm:$0xff] }
  0x29   : > { %v453_v53 = vld [vmem:[%s4505_s17 + $0x110] sm:$0xff]  ;;  %v643_v54 = vld [vmem:[%s4505_s17 + $0x700] sm:$0xff]  ;;  %v1044_v55 = vpack.c.bf16 %v646_v48, %v644_v47  ;;  %v456_v57 = vld [vmem:[%s4505_s17 + $0x128] sm:$0xff] }
  0x2a   : > { %1870 = vmatpush1.bf16.msra.mxu1 %v941_v25  ;;  %v645_v56 = vld [vmem:[%s4505_s17 + $0x710] sm:$0xff]  ;;  %v458_v58 = vld [vmem:[%s4505_s17 + $0x138] sm:$0xff]  ;;  %v648_v59 = vld [vmem:[%s4505_s17 + $0x728] sm:$0xff]  ;;  %v947_v61 = vpack.c.bf16 %v453_v53, %v451_v52 }
  0x2b   : > { %2179 = vmatpush1.bf16.msra.mxu0 %v1037_v26  ;;  %1871 = vmatprep.subr.bf16.mxu1 %v944_v27  ;;  %v650_v60 = vld [vmem:[%s4505_s17 + $0x738] sm:$0xff]  ;;  %v1043_v62 = vpack.c.bf16 %v645_v56, %v643_v54  ;;  %v950_v63 = vpack.c.bf16 %v458_v58, %v456_v57  ;;  %v455_v0 = vld [vmem:[%s4505_s17 + $0x120] sm:$0xff]  ;;  %v457_v5 = vld [vmem:[%s4505_s17 + $0x130] sm:$0xff] }
  0x2c   : > { %2180 = vmatprep.subr.bf16.mxu0 %v1040_v31  ;;  %v647_v8 = vld [vmem:[%s4505_s17 + $0x720] sm:$0xff]  ;;  %v1046_v9 = vpack.c.bf16 %v650_v60, %v648_v59  ;;  %v649_v10 = vld [vmem:[%s4505_s17 + $0x730] sm:$0xff]  ;;  %v460_v11 = vld [vmem:[%s4505_s17 + $0x148] sm:$0xff]  ;;  %v949_v15 = vpack.c.bf16 %v457_v5, %v455_v0 }
  0x2d   : > { %v462_v12 = vld [vmem:[%s4505_s17 + $0x158] sm:$0xff]  ;;  %v652_v13 = vld [vmem:[%s4505_s17 + $0x748] sm:$0xff]  ;;  %v1045_v16 = vpack.c.bf16 %v649_v10, %v647_v8  ;;  %v459_v18 = vld [vmem:[%s4505_s17 + $0x140] sm:$0xff] }
  0x2e   : > { %1872 = vmatpush1.bf16.msra.mxu1 %v943_v37  ;;  %v654_v14 = vld [vmem:[%s4505_s17 + $0x758] sm:$0xff]  ;;  %v952_v17 = vpack.c.bf16 %v462_v12, %v460_v11  ;;  %v461_v19 = vld [vmem:[%s4505_s17 + $0x150] sm:$0xff]  ;;  %v651_v20 = vld [vmem:[%s4505_s17 + $0x740] sm:$0xff] }
  0x2f   : > { %2181 = vmatpush1.bf16.msra.mxu0 %v1039_v38  ;;  %1873 = vmatprep.subr.bf16.mxu1 %v946_v39  ;;  %v1048_v21 = vpack.c.bf16 %v654_v14, %v652_v13  ;;  %v653_v22 = vld [vmem:[%s4505_s17 + $0x750] sm:$0xff]  ;;  %v464_v23 = vld [vmem:[%s4505_s17 + $0x168] sm:$0xff]  ;;  %v466_v24 = vld [vmem:[%s4505_s17 + $0x178] sm:$0xff]  ;;  %v951_v27 = vpack.c.bf16 %v461_v19, %v459_v18 }
  0x30   : > { %2182 = vmatprep.subr.bf16.mxu0 %v1042_v43  ;;  %v656_v25 = vld [vmem:[%s4505_s17 + $0x768] sm:$0xff]  ;;  %v658_v26 = vld [vmem:[%s4505_s17 + $0x778] sm:$0xff]  ;;  %v1047_v28 = vpack.c.bf16 %v653_v22, %v651_v20  ;;  %v954_v29 = vpack.c.bf16 %v466_v24, %v464_v23  ;;  %v463_v30 = vld [vmem:[%s4505_s17 + $0x160] sm:$0xff] }
  0x31   : > { %v465_v31 = vld [vmem:[%s4505_s17 + $0x170] sm:$0xff]  ;;  %v655_v32 = vld [vmem:[%s4505_s17 + $0x760] sm:$0xff]  ;;  %v1050_v33 = vpack.c.bf16 %v658_v26, %v656_v25  ;;  %v468_v35 = vld [vmem:[%s4505_s17 + $0x188] sm:$0xff] }
  0x32   : > { %1874 = vmatpush1.bf16.msra.mxu1 %v945_v49  ;;  %v657_v34 = vld [vmem:[%s4505_s17 + $0x770] sm:$0xff]  ;;  %v470_v36 = vld [vmem:[%s4505_s17 + $0x198] sm:$0xff]  ;;  %v660_v37 = vld [vmem:[%s4505_s17 + $0x788] sm:$0xff]  ;;  %v953_v39 = vpack.c.bf16 %v465_v31, %v463_v30 }
  0x33   : > { %2183 = vmatpush1.bf16.msra.mxu0 %v1041_v50  ;;  %1875 = vmatprep.subr.bf16.mxu1 %v948_v51  ;;  %v662_v38 = vld [vmem:[%s4505_s17 + $0x798] sm:$0xff]  ;;  %v1049_v40 = vpack.c.bf16 %v657_v34, %v655_v32  ;;  %v956_v41 = vpack.c.bf16 %v470_v36, %v468_v35  ;;  %v467_v42 = vld [vmem:[%s4505_s17 + $0x180] sm:$0xff]  ;;  %v469_v43 = vld [vmem:[%s4505_s17 + $0x190] sm:$0xff] }
  0x34   : > { %2184 = vmatprep.subr.bf16.mxu0 %v1044_v55  ;;  %v659_v44 = vld [vmem:[%s4505_s17 + $0x780] sm:$0xff]  ;;  %v1052_v45 = vpack.c.bf16 %v662_v38, %v660_v37  ;;  %v661_v46 = vld [vmem:[%s4505_s17 + $0x790] sm:$0xff]  ;;  %v472_v47 = vld [vmem:[%s4505_s17 + $0x1a8] sm:$0xff]  ;;  %v955_v51 = vpack.c.bf16 %v469_v43, %v467_v42 }
  0x35   : > { %v474_v48 = vld [vmem:[%s4505_s17 + $0x1b8] sm:$0xff]  ;;  %v664_v49 = vld [vmem:[%s4505_s17 + $0x7a8] sm:$0xff]  ;;  %v1051_v52 = vpack.c.bf16 %v661_v46, %v659_v44  ;;  %v471_v54 = vld [vmem:[%s4505_s17 + $0x1a0] sm:$0xff] }
  0x36   : > { %1876 = vmatpush1.bf16.msra.mxu1 %v947_v61  ;;  %v666_v50 = vld [vmem:[%s4505_s17 + $0x7b8] sm:$0xff]  ;;  %v958_v53 = vpack.c.bf16 %v474_v48, %v472_v47  ;;  %v473_v55 = vld [vmem:[%s4505_s17 + $0x1b0] sm:$0xff]  ;;  %v663_v56 = vld [vmem:[%s4505_s17 + $0x7a0] sm:$0xff] }
  0x37   : > { %2185 = vmatpush1.bf16.msra.mxu0 %v1043_v62  ;;  %1877 = vmatprep.subr.bf16.mxu1 %v950_v63  ;;  %v1054_v57 = vpack.c.bf16 %v666_v50, %v664_v49  ;;  %v665_v58 = vld [vmem:[%s4505_s17 + $0x7b0] sm:$0xff]  ;;  %v476_v59 = vld [vmem:[%s4505_s17 + $0x1c8] sm:$0xff]  ;;  %v478_v60 = vld [vmem:[%s4505_s17 + $0x1d8] sm:$0xff]  ;;  %v957_v63 = vpack.c.bf16 %v473_v55, %v471_v54 }
  0x38   : > { %2186 = vmatprep.subr.bf16.mxu0 %v1046_v9  ;;  %v668_v61 = vld [vmem:[%s4505_s17 + $0x7c8] sm:$0xff]  ;;  %v670_v62 = vld [vmem:[%s4505_s17 + $0x7d8] sm:$0xff]  ;;  %v1053_v0 = vpack.c.bf16 %v665_v58, %v663_v56  ;;  %v960_v5 = vpack.c.bf16 %v478_v60, %v476_v59  ;;  %v475_v8 = vld [vmem:[%s4505_s17 + $0x1c0] sm:$0xff] }
  0x39   : > { %v477_v9 = vld [vmem:[%s4505_s17 + $0x1d0] sm:$0xff]  ;;  %v667_v10 = vld [vmem:[%s4505_s17 + $0x7c0] sm:$0xff]  ;;  %v1056_v11 = vpack.c.bf16 %v670_v62, %v668_v61  ;;  %v480_v13 = vld [vmem:[%s4505_s17 + $0x1e8] sm:$0xff] }
  0x3a   : > { %1878 = vmatpush1.bf16.msra.mxu1 %v949_v15  ;;  %v669_v12 = vld [vmem:[%s4505_s17 + $0x7d0] sm:$0xff]  ;;  %v482_v14 = vld [vmem:[%s4505_s17 + $0x1f8] sm:$0xff]  ;;  %v672_v15 = vld [vmem:[%s4505_s17 + $0x7e8] sm:$0xff] }
  0x3b   : > { %2187 = vmatpush1.bf16.msra.mxu0 %v1045_v16  ;;  %1879 = vmatprep.subr.bf16.mxu1 %v952_v17  ;;  %v674_v16 = vld [vmem:[%s4505_s17 + $0x7f8] sm:$0xff]  ;;  %v959_v17 = vpack.c.bf16 %v477_v9, %v475_v8  ;;  %v1055_v18 = vpack.c.bf16 %v669_v12, %v667_v10  ;;  %v962_v19 = vpack.c.bf16 %v482_v14, %v480_v13  ;;  %v479_v20 = vld [vmem:[%s4505_s17 + $0x1e0] sm:$0xff]  ;;  %v673_v24 = vld [vmem:[%s4505_s17 + $0x7f0] sm:$0xff] }
  0x3c   : > { %2188 = vmatprep.subr.bf16.mxu0 %v1048_v21  ;;  %v481_v21 = vld [vmem:[%s4505_s17 + $0x1f0] sm:$0xff]  ;;  %v671_v22 = vld [vmem:[%s4505_s17 + $0x7e0] sm:$0xff]  ;;  %v1058_v23 = vpack.c.bf16 %v674_v16, %v672_v15  ;;  %v484_v25 = vld [vmem:[%s4505_s17 + $0x208] sm:$0xff] }
  0x3d   : > { %v486_v26 = vld [vmem:[%s4505_s17 + $0x218] sm:$0xff]  ;;  %v1057_v30 = vpack.c.bf16 %v673_v24, %v671_v22  ;;  %v483_v32 = vld [vmem:[%s4505_s17 + $0x200] sm:$0xff]  ;;  %v677_v37 = vld [vmem:[%s4505_s17 + $0x810] sm:$0xff] }
  0x3e   : > { %1880 = vmatpush1.bf16.msra.mxu1 %v951_v27  ;;  %v676_v27 = vld [vmem:[%s4505_s17 + $0x808] sm:$0xff]  ;;  %v964_v31 = vpack.c.bf16 %v486_v26, %v484_v25  ;;  %v675_v34 = vld [vmem:[%s4505_s17 + $0x800] sm:$0xff]  ;;  %v4660_v44 = vld [vmem:[%s6660_s2 + $0x98] sm:$0xff] }
  0x3f   : > { %2189 = vmatpush1.bf16.msra.mxu0 %v1047_v28  ;;  %1881 = vmatprep.subr.bf16.mxu1 %v954_v29  ;;  %v678_v28 = vld [vmem:[%s4505_s17 + $0x818] sm:$0xff]  ;;  %v961_v29 = vpack.c.bf16 %v481_v21, %v479_v20  ;;  %v4645_v35 = vld [vmem:[%s6660_s2 + $0x80] sm:$0xff]  ;;  %v488_v38 = vld [vmem:[%s4505_s17 + $0x228] sm:$0xff]  ;;  %v1059_v46 = vpack.c.bf16 %v677_v37, %v675_v34 }
  0x40   : > { %2190 = vmatprep.subr.bf16.mxu0 %v1050_v33  ;;  %v485_v33 = vld [vmem:[%s4505_s17 + $0x210] sm:$0xff]  ;;  %v1060_v36 = vpack.c.bf16 %v678_v28, %v676_v27  ;;  %v4655_v42 = vld [vmem:[%s6660_s2 + $0xc0] sm:$0xff]  ;;  %v494_v54 = vld [vmem:[%s4505_s17 + $0x258] sm:$0xff] }
  0x41   : > { %v963_v43 = vpack.c.bf16 %v485_v33, %v483_v32  ;;  %v487_v48 = vld [vmem:[%s4505_s17 + $0x220] sm:$0xff]  ;;  %v489_v49 = vld [vmem:[%s4505_s17 + $0x230] sm:$0xff]  ;;  %v3985_v55 = vcombine.high %v4645_v35, %v4655_v42  ;;  %v684_v56 = vld [vmem:[%s4505_s17 + $0x848] sm:$0xff]  ;;  %v3984_v8 = vcombine.low %v4645_v35, %v4655_v42 }
  0x42   : > { %1882 = vmatpush1.bf16.msra.mxu1 %v953_v39  ;;  %v490_v39 = vld [vmem:[%s4505_s17 + $0x238] sm:$0xff]  ;;  %v679_v50 = vld [vmem:[%s4505_s17 + $0x820] sm:$0xff]  ;;  %v965_v59 = vpack.c.bf16 %v489_v49, %v487_v48  ;;  %v493_v60 = vld [vmem:[%s4505_s17 + $0x250] sm:$0xff] }
  0x43   : > { %2191 = vmatpush1.bf16.msra.mxu0 %v1049_v40  ;;  %1883 = vmatprep.subr.bf16.mxu1 %v956_v41  ;;  %v680_v40 = vld [vmem:[%s4505_s17 + $0x828] sm:$0xff]  ;;  %v682_v41 = vld [vmem:[%s4505_s17 + $0x838] sm:$0xff]  ;;  %v966_v47 = vpack.c.bf16 %v490_v39, %v488_v38  ;;  %v683_v61 = vld [vmem:[%s4505_s17 + $0x840] sm:$0xff] }
  0x44   : > { %2192 = vmatprep.subr.bf16.mxu0 %v1052_v45  ;;  %v4665_v45 = vld [vmem:[%s6660_s2 + $0xd8] sm:$0xff]  ;;  %v4691_v62 = vld [vmem:[%s6660_s2 + $0x100] sm:$0xff]  ;;  %v496_v3 = vld [vmem:[%s4505_s17 + $0x268] sm:$0xff] }
  0x45   : > { %v3991_v58 = vcombine.high %v4660_v44, %v4665_v45  ;;  %v498_v6 = vld [vmem:[%s4505_s17 + $0x278] sm:$0xff]  ;;  %v4703_v9 = vld [vmem:[%s6660_s2 + $0x140] sm:$0xff]  ;;  %v689_v20 = vld [vmem:[%s4505_s17 + $0x870] sm:$0xff] }
  0x46   : > { %1884 = vmatpush1.bf16.msra.mxu1 %v955_v51  ;;  %v1062_v51 = vpack.c.bf16 %v682_v41, %v680_v40  ;;  %v4710_v12 = vld [vmem:[%s6660_s2 + $0x118] sm:$0xff]  ;;  %v970_v15 = vpack.c.bf16 %v498_v6, %v496_v3  ;;  %v495_v16 = vld [vmem:[%s4505_s17 + $0x260] sm:$0xff]  ;;  %v500_v21 = vld [vmem:[%s4505_s17 + $0x288] sm:$0xff]  ;;  %v4000_v40 = vcombine.low %v4691_v62, %v4703_v9 }
  0x47   : > { %2193 = vmatpush1.bf16.msra.mxu0 %v1051_v52  ;;  %1885 = vmatprep.subr.bf16.mxu1 %v958_v53  ;;  %v681_v52 = vld [vmem:[%s4505_s17 + $0x830] sm:$0xff]  ;;  %v492_v53 = vld [vmem:[%s4505_s17 + $0x248] sm:$0xff]  ;;  %v4715_v13 = vld [vmem:[%s6660_s2 + $0x158] sm:$0xff] }
  0x48   : > { %2194 = vmatprep.subr.bf16.mxu0 %v1054_v57  ;;  %v686_v57 = vld [vmem:[%s4505_s17 + $0x858] sm:$0xff]  ;;  %v1061_v1 = vpack.c.bf16 %v681_v52, %v679_v50  ;;  %v968_v2 = vpack.c.bf16 %v494_v54, %v492_v53  ;;  %v692_v24 = vld [vmem:[%s4505_s17 + $0x888] sm:$0xff]  ;;  %v4007_v26 = vcombine.high %v4710_v12, %v4715_v13  ;;  %v691_v32 = vld [vmem:[%s4505_s17 + $0x880] sm:$0xff] }
  0x49   : > { %v502_v22 = vld [vmem:[%s4505_s17 + $0x298] sm:$0xff]  ;;  %v4735_v33 = vld [vmem:[%s6660_s2 + $0x180] sm:$0xff]  ;;  %v693_v35 = vld [vmem:[%s4505_s17 + $0x890] sm:$0xff] }
  0x4a   : > { %1886 = vmatpush1.bf16.msra.mxu1 %v957_v63  ;;  %v1064_v63 = vpack.c.bf16 %v686_v57, %v684_v56  ;;  %v694_v25 = vld [vmem:[%s4505_s17 + $0x898] sm:$0xff]  ;;  %v696_v38 = vld [vmem:[%s4505_s17 + $0x8a8] sm:$0xff]  ;;  %v4747_v41 = vld [vmem:[%s6660_s2 + $0x1c0] sm:$0xff] }
  0x4b   : > { %2195 = vmatpush1.bf16.msra.mxu0 %v1053_v0  ;;  %1887 = vmatprep.subr.bf16.mxu1 %v960_v5  ;;  %v685_v0 = vld [vmem:[%s4505_s17 + $0x850] sm:$0xff]  ;;  %v690_v5 = vld [vmem:[%s4505_s17 + $0x878] sm:$0xff]  ;;  %v1068_v34 = vpack.c.bf16 %v694_v25, %v692_v24  ;;  %v503_v48 = vld [vmem:[%s4505_s17 + $0x2a0] sm:$0xff] }
  0x4c   : > { %2196 = vmatprep.subr.bf16.mxu0 %v1056_v11  ;;  %v3990_v11 = vcombine.low %v4660_v44, %v4665_v45  ;;  %v1063_v14 = vpack.c.bf16 %v685_v0, %v683_v61  ;;  %v506_v37 = vld [vmem:[%s4505_s17 + $0x2b8] sm:$0xff]  ;;  %v505_v49 = vld [vmem:[%s4505_s17 + $0x2b0] sm:$0xff]  ;;  %v695_v50 = vld [vmem:[%s4505_s17 + $0x8a0] sm:$0xff] }
  0x4d   : > { %v698_v39 = vld [vmem:[%s4505_s17 + $0x8b8] sm:$0xff]  ;;  %v697_v52 = vld [vmem:[%s4505_s17 + $0x8b0] sm:$0xff]  ;;  %v508_v53 = vld [vmem:[%s4505_s17 + $0x2c8] sm:$0xff] }
  0x4e   : > { %1888 = vmatpush1.bf16.msra.mxu1 %v959_v17  ;;  %v497_v17 = vld [vmem:[%s4505_s17 + $0x270] sm:$0xff]  ;;  %v4754_v44 = vld [vmem:[%s6660_s2 + $0x198] sm:$0xff]  ;;  %v700_v56 = vld [vmem:[%s4505_s17 + $0x8c8] sm:$0xff] }
  0x4f   : > { %2197 = vmatpush1.bf16.msra.mxu0 %v1055_v18  ;;  %1889 = vmatprep.subr.bf16.mxu1 %v962_v19  ;;  %v687_v18 = vld [vmem:[%s4505_s17 + $0x860] sm:$0xff]  ;;  %v969_v27 = vpack.c.bf16 %v497_v17, %v495_v16  ;;  %v4759_v45 = vld [vmem:[%s6660_s2 + $0x1d8] sm:$0xff]  ;;  %v701_v0 = vld [vmem:[%s4505_s17 + $0x8d0] sm:$0xff] }
  0x50   : > { %2198 = vmatprep.subr.bf16.mxu0 %v1058_v23  ;;  %v4001_v23 = vcombine.high %v4691_v62, %v4703_v9  ;;  %v1065_v28 = vpack.c.bf16 %v689_v20, %v687_v18  ;;  %v510_v54 = vld [vmem:[%s4505_s17 + $0x2d8] sm:$0xff]  ;;  %v699_v61 = vld [vmem:[%s4505_s17 + $0x8c0] sm:$0xff]  ;;  %v512_v3 = vld [vmem:[%s4505_s17 + $0x2e8] sm:$0xff] }
  0x51   : > { %v702_v57 = vld [vmem:[%s4505_s17 + $0x8d8] sm:$0xff]  ;;  %v4779_v62 = vld [vmem:[%s6660_s2 + $0x200] sm:$0xff]  ;;  %v513_v17 = vld [vmem:[%s4505_s17 + $0x2f0] sm:$0xff] }
  0x52   : > { %1890 = vmatpush1.bf16.msra.mxu1 %v961_v29  ;;  %v972_v29 = vpack.c.bf16 %v502_v22, %v500_v21  ;;  %v514_v6 = vld [vmem:[%s4505_s17 + $0x2f8] sm:$0xff]  ;;  %v4791_v9 = vld [vmem:[%s6660_s2 + $0x240] sm:$0xff]  ;;  %v705_v20 = vld [vmem:[%s4505_s17 + $0x8f0] sm:$0xff] }
  0x53   : > { %2199 = vmatpush1.bf16.msra.mxu0 %v1057_v30  ;;  %1962 = vmatprep.subr.bf16.mxu1 %v964_v31  ;;  %v499_v30 = vld [vmem:[%s4505_s17 + $0x280] sm:$0xff]  ;;  %v501_v31 = vld [vmem:[%s4505_s17 + $0x290] sm:$0xff]  ;;  %v516_v21 = vld [vmem:[%s4505_s17 + $0x308] sm:$0xff] }
  0x54   : > { %2271 = vmatprep.subr.bf16.mxu0 %v1060_v36  ;;  %v504_v36 = vld [vmem:[%s4505_s17 + $0x2a8] sm:$0xff]  ;;  %v971_v42 = vpack.c.bf16 %v501_v31, %v499_v30  ;;  %v511_v16 = vld [vmem:[%s4505_s17 + $0x2e0] sm:$0xff]  ;;  %v518_v22 = vld [vmem:[%s4505_s17 + $0x318] sm:$0xff] }
  0x55   : > { %1892 = vmatmul.mubr.bf16.vlgmr.msra.gmra.mrb[0].mxu1 %v3968_v4  ;;  %v491_v4 = vld [vmem:[%s4505_s17 + $0x240] sm:$0xff]  ;;  %v708_v24 = vld [vmem:[%s4505_s17 + $0x908] sm:$0xff]  ;;  %v710_v25 = vld [vmem:[%s4505_s17 + $0x918] sm:$0xff]  ;;  %v980_v30 = vpack.c.bf16 %v518_v22, %v516_v21 }
  0x56   : > { %1963 = vmatpush1.bf16.msra.mxu1 %v963_v43  ;;  %2201 = vmatmul.mubr.bf16.vlgmr.msra.gmra.mrb[0].mxu0 %v3974_v7  ;;  %v688_v7 = vld [vmem:[%s4505_s17 + $0x868] sm:$0xff]  ;;  %v967_v10 = vpack.c.bf16 %v493_v60, %v491_v4  ;;  %v4006_v43 = vcombine.low %v4710_v12, %v4715_v13  ;;  %v507_v4 = vld [vmem:[%s4505_s17 + $0x2c0] sm:$0xff]  ;;  %v509_v60 = vld [vmem:[%s4505_s17 + $0x2d0] sm:$0xff] }
  0x57   : > { %2272 = vmatpush1.bf16.msra.mxu0 %v1059_v46  ;;  %1964 = vmatprep.subr.bf16.mxu1 %v966_v47  ;;  %v1066_v19 = vpack.c.bf16 %v690_v5, %v688_v7  ;;  %v1067_v46 = vpack.c.bf16 %v693_v35, %v691_v32  ;;  %v974_v47 = vpack.c.bf16 %v506_v37, %v504_v36  ;;  %v704_v7 = vld [vmem:[%s4505_s17 + $0x8e8] sm:$0xff]  ;;  %v706_v5 = vld [vmem:[%s4505_s17 + $0x8f8] sm:$0xff]  ;;  %v703_v18 = vld [vmem:[%s4505_s17 + $0x8e0] sm:$0xff] }
  0x58   : > { %2273 = vmatprep.subr.bf16.mxu0 %v1062_v51  ;;  %1901 = vmatprep.mubr.bf16.mxu1 %v3985_v55  ;;  %v1070_v51 = vpack.c.bf16 %v698_v39, %v696_v38  ;;  %v4017_v55 = vcombine.high %v4735_v33, %v4747_v41  ;;  %v4798_v12 = vld [vmem:[%s6660_s2 + $0x218] sm:$0xff]  ;;  %v517_v31 = vld [vmem:[%s4505_s17 + $0x310] sm:$0xff]  ;;  %v707_v32 = vld [vmem:[%s4505_s17 + $0x900] sm:$0xff]  ;;  %v4032_v39 = vcombine.low %v4779_v62, %v4791_v9 }
  0x59   : > { %2210 = vmatprep.mubr.bf16.mxu0 %v3991_v58  ;;  %v4023_v58 = vcombine.high %v4754_v44, %v4759_v45  ;;  %v4803_v13 = vld [vmem:[%s6660_s2 + $0x258] sm:$0xff]  ;;  %v520_v35 = vld [vmem:[%s4505_s17 + $0x328] sm:$0xff] }
  0x5a   : > { %1965 = vmatpush1.bf16.msra.mxu1 %v965_v59  ;;  %v973_v59 = vpack.c.bf16 %v505_v49, %v503_v48  ;;  %v522_v36 = vld [vmem:[%s4505_s17 + $0x338] sm:$0xff]  ;;  %v712_v37 = vld [vmem:[%s4505_s17 + $0x928] sm:$0xff]  ;;  %v519_v48 = vld [vmem:[%s4505_s17 + $0x320] sm:$0xff] }
  0x5b   : > { %2274 = vmatpush1.bf16.msra.mxu0 %v1061_v1  ;;  %1966 = vmatprep.subr.bf16.mxu1 %v968_v2  ;;  %v1069_v1 = vpack.c.bf16 %v697_v52, %v695_v50  ;;  %v976_v2 = vpack.c.bf16 %v510_v54, %v508_v53  ;;  %v714_v38 = vld [vmem:[%s4505_s17 + $0x938] sm:$0xff]  ;;  %v521_v49 = vld [vmem:[%s4505_s17 + $0x330] sm:$0xff]  ;;  %v711_v50 = vld [vmem:[%s4505_s17 + $0x920] sm:$0xff] }
  0x5c   : > { %2275 = vmatprep.subr.bf16.mxu0 %v1064_v63  ;;  %v1072_v63 = vpack.c.bf16 %v702_v57, %v700_v56  ;;  %v713_v52 = vld [vmem:[%s4505_s17 + $0x930] sm:$0xff]  ;;  %v524_v53 = vld [vmem:[%s4505_s17 + $0x348] sm:$0xff]  ;;  %v526_v54 = vld [vmem:[%s4505_s17 + $0x358] sm:$0xff] }
  0x5d   : > { %1902 = vmatmul.mubr.bf16.gmra.mrb[4].mxu1 %v3984_v8  ;;  %v4016_v8 = vcombine.low %v4735_v33, %v4747_v41  ;;  %v709_v33 = vld [vmem:[%s4505_s17 + $0x910] sm:$0xff]  ;;  %v4835_v41 = vld [vmem:[%s6660_s2 + $0x2c0] sm:$0xff]  ;;  %v716_v56 = vld [vmem:[%s4505_s17 + $0x948] sm:$0xff] }
  0x5e   : > { %1967 = vmatpush1.bf16.msra.mxu1 %v967_v10  ;;  %2211 = vmatmul.mubr.bf16.gmra.mrb[4].mxu0 %v3990_v11  ;;  %v975_v10 = vpack.c.bf16 %v509_v60, %v507_v4  ;;  %v4022_v11 = vcombine.low %v4754_v44, %v4759_v45  ;;  %v4842_v44 = vld [vmem:[%s6660_s2 + $0x298] sm:$0xff]  ;;  %v984_v4 = vpack.c.bf16 %v526_v54, %v524_v53  ;;  %v525_v60 = vld [vmem:[%s4505_s17 + $0x350] sm:$0xff]  ;;  %v532_v21 = vld [vmem:[%s4505_s17 + $0x388] sm:$0xff] }
  0x5f   : > { %2276 = vmatpush1.bf16.msra.mxu0 %v1063_v14  ;;  %1968 = vmatprep.subr.bf16.mxu1 %v970_v15  ;;  %v1071_v14 = vpack.c.bf16 %v701_v0, %v699_v61  ;;  %v978_v15 = vpack.c.bf16 %v514_v6, %v512_v3  ;;  %v4847_v45 = vld [vmem:[%s6660_s2 + $0x2d8] sm:$0xff]  ;;  %v715_v61 = vld [vmem:[%s4505_s17 + $0x940] sm:$0xff]  ;;  %v528_v0 = vld [vmem:[%s4505_s17 + $0x368] sm:$0xff] }
  0x60   : > { %2277 = vmatprep.subr.bf16.mxu0 %v1066_v19  ;;  %1911 = vmatprep.mubr.bf16.mxu1 %v4001_v23  ;;  %v1074_v19 = vpack.c.bf16 %v706_v5, %v704_v7  ;;  %v4033_v23 = vcombine.high %v4779_v62, %v4791_v9  ;;  %v718_v57 = vld [vmem:[%s4505_s17 + $0x958] sm:$0xff]  ;;  %v717_v62 = vld [vmem:[%s4505_s17 + $0x950] sm:$0xff]  ;;  %v720_v6 = vld [vmem:[%s4505_s17 + $0x968] sm:$0xff] }
  0x61   : > { %2220 = vmatprep.mubr.bf16.mxu0 %v4007_v26  ;;  %v4039_v26 = vcombine.high %v4798_v12, %v4803_v13  ;;  %v530_v3 = vld [vmem:[%s4505_s17 + $0x378] sm:$0xff]  ;;  %v4879_v9 = vld [vmem:[%s6660_s2 + $0x340] sm:$0xff]  ;;  %v540_v53 = vld [vmem:[%s4505_s17 + $0x3c8] sm:$0xff] }
  0x62   : > { %1969 = vmatpush1.bf16.msra.mxu1 %v969_v27  ;;  %v977_v27 = vpack.c.bf16 %v513_v17, %v511_v16  ;;  %v722_v7 = vld [vmem:[%s4505_s17 + $0x978] sm:$0xff]  ;;  %v527_v16 = vld [vmem:[%s4505_s17 + $0x360] sm:$0xff]  ;;  %v529_v17 = vld [vmem:[%s4505_s17 + $0x370] sm:$0xff] }
  0x63   : > { %2278 = vmatpush1.bf16.msra.mxu0 %v1065_v28  ;;  %1970 = vmatprep.subr.bf16.mxu1 %v972_v29  ;;  %v515_v28 = vld [vmem:[%s4505_s17 + $0x300] sm:$0xff]  ;;  %v1073_v29 = vpack.c.bf16 %v705_v20, %v703_v18  ;;  %v721_v20 = vld [vmem:[%s4505_s17 + $0x970] sm:$0xff]  ;;  %v534_v22 = vld [vmem:[%s4505_s17 + $0x398] sm:$0xff] }
  0x64   : > { %2279 = vmatprep.subr.bf16.mxu0 %v1068_v34  ;;  %v1076_v34 = vpack.c.bf16 %v710_v25, %v708_v24  ;;  %v719_v18 = vld [vmem:[%s4505_s17 + $0x960] sm:$0xff]  ;;  %v724_v24 = vld [vmem:[%s4505_s17 + $0x988] sm:$0xff]  ;;  %v726_v25 = vld [vmem:[%s4505_s17 + $0x998] sm:$0xff] }
  0x65   : > { %1912 = vmatmul.mubr.bf16.gmra.mrb[8].mxu1 %v4000_v40  ;;  %v4830_v40 = vld [vmem:[%s6660_s2 + $0x280] sm:$0xff]  ;;  %v542_v54 = vld [vmem:[%s4505_s17 + $0x3d8] sm:$0xff] }
  0x66   : > { %1971 = vmatpush1.bf16.msra.mxu1 %v971_v42  ;;  %2221 = vmatmul.mubr.bf16.gmra.mrb[8].mxu0 %v4006_v43  ;;  %v979_v42 = vpack.c.bf16 %v517_v31, %v515_v28  ;;  %v4038_v43 = vcombine.low %v4798_v12, %v4803_v13  ;;  %v4048_v5 = vcombine.low %v4830_v40, %v4835_v41  ;;  %v4886_v12 = vld [vmem:[%s6660_s2 + $0x318] sm:$0xff]  ;;  %v531_v28 = vld [vmem:[%s4505_s17 + $0x380] sm:$0xff]  ;;  %v533_v31 = vld [vmem:[%s4505_s17 + $0x390] sm:$0xff] }
  0x67   : > { %2280 = vmatpush1.bf16.msra.mxu0 %v1067_v46  ;;  %1972 = vmatprep.subr.bf16.mxu1 %v974_v47  ;;  %v1075_v46 = vpack.c.bf16 %v709_v33, %v707_v32  ;;  %v982_v47 = vpack.c.bf16 %v522_v36, %v520_v35  ;;  %v4891_v13 = vld [vmem:[%s6660_s2 + $0x358] sm:$0xff]  ;;  %v723_v32 = vld [vmem:[%s4505_s17 + $0x980] sm:$0xff]  ;;  %v725_v33 = vld [vmem:[%s4505_s17 + $0x990] sm:$0xff] }
  0x68   : > { %2281 = vmatprep.subr.bf16.mxu0 %v1070_v51  ;;  %1921 = vmatprep.mubr.bf16.mxu1 %v4017_v55  ;;  %v1078_v51 = vpack.c.bf16 %v714_v38, %v712_v37  ;;  %v4049_v55 = vcombine.high %v4830_v40, %v4835_v41  ;;  %v536_v35 = vld [vmem:[%s4505_s17 + $0x3a8] sm:$0xff]  ;;  %v538_v36 = vld [vmem:[%s4505_s17 + $0x3b8] sm:$0xff] }
  0x69   : > { %2230 = vmatprep.mubr.bf16.mxu0 %v4023_v58  ;;  %v4055_v58 = vcombine.high %v4842_v44, %v4847_v45  ;;  %v728_v37 = vld [vmem:[%s4505_s17 + $0x9a8] sm:$0xff]  ;;  %v730_v38 = vld [vmem:[%s4505_s17 + $0x9b8] sm:$0xff] }
  0x6a   : > { %1973 = vmatpush1.bf16.msra.mxu1 %v973_v59  ;;  %v981_v59 = vpack.c.bf16 %v521_v49, %v519_v48  ;;  %v4918_v40 = vld [vmem:[%s6660_s2 + $0x8] sm:$0xff]  ;;  %v535_v48 = vld [vmem:[%s4505_s17 + $0x3a0] sm:$0xff]  ;;  %v537_v49 = vld [vmem:[%s4505_s17 + $0x3b0] sm:$0xff] }
  0x6b   : > { %2282 = vmatpush1.bf16.msra.mxu0 %v1069_v1  ;;  %1974 = vmatprep.subr.bf16.mxu1 %v976_v2  ;;  %v523_v1 = vld [vmem:[%s4505_s17 + $0x340] sm:$0xff]  ;;  %v1077_v2 = vpack.c.bf16 %v713_v52, %v711_v50  ;;  %v4923_v41 = vld [vmem:[%s6660_s2 + $0x48] sm:$0xff]  ;;  %v729_v52 = vld [vmem:[%s4505_s17 + $0x9b0] sm:$0xff] }
  0x6c   : > { %2283 = vmatprep.subr.bf16.mxu0 %v1072_v63  ;;  %v1080_v63 = vpack.c.bf16 %v718_v57, %v716_v56  ;;  %v727_v50 = vld [vmem:[%s4505_s17 + $0x9a0] sm:$0xff]  ;;  %v732_v56 = vld [vmem:[%s4505_s17 + $0x9c8] sm:$0xff]  ;;  %v734_v57 = vld [vmem:[%s4505_s17 + $0x9d8] sm:$0xff] }
  0x6d   : > { %1922 = vmatmul.mubr.bf16.gmra.mrb[12].mxu1 %v4016_v8  ;;  %v4874_v8 = vld [vmem:[%s6660_s2 + $0x300] sm:$0xff] }
  0x6e   : > { %1975 = vmatpush1.bf16.msra.mxu1 %v975_v10  ;;  %2231 = vmatmul.mubr.bf16.gmra.mrb[12].mxu0 %v4022_v11  ;;  %v983_v10 = vpack.c.bf16 %v525_v60, %v523_v1  ;;  %v4054_v11 = vcombine.low %v4842_v44, %v4847_v45  ;;  %v4930_v44 = vld [vmem:[%s6660_s2 + $0x20] sm:$0xff]  ;;  %v1085_v1 = vpack.c.bf16 %v729_v52, %v727_v50  ;;  %v541_v60 = vld [vmem:[%s4505_s17 + $0x3d0] sm:$0xff] }
  0x6f   : > { %2284 = vmatpush1.bf16.msra.mxu0 %v1071_v14  ;;  %1976 = vmatprep.subr.bf16.mxu1 %v978_v15  ;;  %v1079_v14 = vpack.c.bf16 %v717_v62, %v715_v61  ;;  %v986_v15 = vpack.c.bf16 %v530_v3, %v528_v0  ;;  %v4935_v45 = vld [vmem:[%s6660_s2 + $0x60] sm:$0xff]  ;;  %v1088_v62 = vpack.c.bf16 %v734_v57, %v732_v56  ;;  %v544_v0 = vld [vmem:[%s4505_s17 + $0x3e8] sm:$0xff]  ;;  %v546_v3 = vld [vmem:[%s4505_s17 + $0x3f8] sm:$0xff] }
  0x70   : > { %2285 = vmatprep.subr.bf16.mxu0 %v1074_v19  ;;  %1931 = vmatprep.mubr.bf16.mxu1 %v4033_v23  ;;  %v1082_v19 = vpack.c.bf16 %v722_v7, %v720_v6  ;;  %v4065_v23 = vcombine.high %v4874_v8, %v4879_v9  ;;  %v731_v61 = vld [vmem:[%s4505_s17 + $0x9c0] sm:$0xff]  ;;  %v736_v6 = vld [vmem:[%s4505_s17 + $0x9e8] sm:$0xff]  ;;  %v738_v7 = vld [vmem:[%s4505_s17 + $0x9f8] sm:$0xff] }
  0x71   : > { %2240 = vmatprep.mubr.bf16.mxu0 %v4039_v26  ;;  %v4071_v26 = vcombine.high %v4886_v12, %v4891_v13  ;;  %v555_v52 = vld [vmem:[%s4505_s17 + $0x440] sm:$0xff]  ;;  %v749_v57 = vld [vmem:[%s4505_s17 + $0xa50] sm:$0xff] }
  0x72   : > { %1977 = vmatpush1.bf16.msra.mxu1 %v977_v27  ;;  %v985_v27 = vpack.c.bf16 %v529_v17, %v527_v16  ;;  %v550_v16 = vld [vmem:[%s4505_s17 + $0x418] sm:$0xff]  ;;  %v740_v17 = vld [vmem:[%s4505_s17 + $0xa08] sm:$0xff]  ;;  %v747_v56 = vld [vmem:[%s4505_s17 + $0xa40] sm:$0xff] }
  0x73   : > { %2286 = vmatpush1.bf16.msra.mxu0 %v1073_v29  ;;  %1978 = vmatprep.subr.bf16.mxu1 %v980_v30  ;;  %v1081_v29 = vpack.c.bf16 %v721_v20, %v719_v18  ;;  %v988_v30 = vpack.c.bf16 %v534_v22, %v532_v21  ;;  %v742_v18 = vld [vmem:[%s4505_s17 + $0xa18] sm:$0xff]  ;;  %v547_v20 = vld [vmem:[%s4505_s17 + $0x400] sm:$0xff] }
  0x74   : > { %2287 = vmatprep.subr.bf16.mxu0 %v1076_v34  ;;  %v1084_v34 = vpack.c.bf16 %v726_v25, %v724_v24  ;;  %v739_v24 = vld [vmem:[%s4505_s17 + $0xa00] sm:$0xff]  ;;  %v741_v25 = vld [vmem:[%s4505_s17 + $0xa10] sm:$0xff] }
  0x75   : > { %1932 = vmatmul.mubr.bf16.gmra.mrb[16].mxu1 %v4032_v39  ;;  %v4064_v39 = vcombine.low %v4874_v8, %v4879_v9  ;;  %v994_v9 = vpack.c.bf16 %v546_v3, %v544_v0  ;;  %v5034_v3 = vld [vmem:[%s6660_s2 + $0x120] sm:$0xff] }
  0x76   : > { %1979 = vmatpush1.bf16.msra.mxu1 %v979_v42  ;;  %2241 = vmatmul.mubr.bf16.gmra.mrb[16].mxu0 %v4038_v43  ;;  %v987_v42 = vpack.c.bf16 %v533_v31, %v531_v28  ;;  %v4070_v43 = vcombine.low %v4886_v12, %v4891_v13  ;;  %v735_v12 = vld [vmem:[%s4505_s17 + $0x9e0] sm:$0xff]  ;;  %v1090_v13 = vpack.c.bf16 %v738_v7, %v736_v6  ;;  %v554_v28 = vld [vmem:[%s4505_s17 + $0x438] sm:$0xff] }
  0x77   : > { %2288 = vmatpush1.bf16.msra.mxu0 %v1075_v46  ;;  %1980 = vmatprep.subr.bf16.mxu1 %v982_v47  ;;  %v1083_v46 = vpack.c.bf16 %v725_v33, %v723_v32  ;;  %v990_v47 = vpack.c.bf16 %v538_v36, %v536_v35  ;;  %v746_v31 = vld [vmem:[%s4505_s17 + $0xa38] sm:$0xff]  ;;  %v4978_v32 = vld [vmem:[%s6660_s2 + $0x88] sm:$0xff]  ;;  %v4990_v36 = vld [vmem:[%s6660_s2 + $0xa0] sm:$0xff]  ;;  %v1095_v7 = vpack.c.bf16 %v749_v57, %v747_v56 }
  0x78   : > { %2289 = vmatprep.subr.bf16.mxu0 %v1078_v51  ;;  %1941 = vmatprep.mubr.bf16.mxu1 %v4049_v55  ;;  %v1086_v51 = vpack.c.bf16 %v730_v38, %v728_v37  ;;  %v3971_v55 = vcombine.high %v4918_v40, %v4923_v41  ;;  %v4983_v33 = vld [vmem:[%s6660_s2 + $0xc8] sm:$0xff]  ;;  %v4995_v37 = vld [vmem:[%s6660_s2 + $0xe0] sm:$0xff]  ;;  %v1091_v38 = vpack.c.bf16 %v741_v25, %v739_v24  ;;  %v757_v25 = vld [vmem:[%s4505_s17 + $0xa90] sm:$0xff] }
  0x79   : > { %2250 = vmatprep.mubr.bf16.mxu0 %v4055_v58  ;;  %v3977_v58 = vcombine.high %v4930_v44, %v4935_v45  ;;  %v3993_v50 = vcombine.high %v4990_v36, %v4995_v37  ;;  %v3992_v0 = vcombine.low %v4990_v36, %v4995_v37  ;;  %v5039_v6 = vld [vmem:[%s6660_s2 + $0x160] sm:$0xff]  ;;  %v765_v57 = vld [vmem:[%s4505_s17 + $0xad0] sm:$0xff] }
  0x7a   : > { %1981 = vmatpush1.bf16.msra.mxu1 %v981_v59  ;;  %v989_v59 = vpack.c.bf16 %v537_v49, %v535_v48  ;;  %v748_v48 = vld [vmem:[%s4505_s17 + $0xa48] sm:$0xff]  ;;  %v750_v49 = vld [vmem:[%s4505_s17 + $0xa58] sm:$0xff]  ;;  %v755_v24 = vld [vmem:[%s4505_s17 + $0xa80] sm:$0xff] }
  0x7b   : > { %2290 = vmatpush1.bf16.msra.mxu0 %v1077_v2  ;;  %1982 = vmatprep.subr.bf16.mxu1 %v984_v4  ;;  %v992_v2 = vpack.c.bf16 %v542_v54, %v540_v53  ;;  %v539_v4 = vld [vmem:[%s4505_s17 + $0x3c0] sm:$0xff] }
  0x7c   : > { %2291 = vmatprep.subr.bf16.mxu0 %v1080_v63  ;;  %v733_v63 = vld [vmem:[%s4505_s17 + $0x9d0] sm:$0xff]  ;;  %v5078_v36 = vld [vmem:[%s6660_s2 + $0x1a0] sm:$0xff] }
  0x7d   : > { %1942 = vmatmul.mubr.bf16.gmra.mrb[20].mxu1 %v4048_v5  ;;  %v991_v5 = vpack.c.bf16 %v541_v60, %v539_v4  ;;  %v1087_v8 = vpack.c.bf16 %v733_v63, %v731_v61  ;;  %v754_v4 = vld [vmem:[%s4505_s17 + $0xa78] sm:$0xff]  ;;  %v3986_v60 = vcombine.low %v4978_v32, %v4983_v33  ;;  %v5022_v61 = vld [vmem:[%s6660_s2 + $0x108] sm:$0xff]  ;;  %v5083_v37 = vld [vmem:[%s6660_s2 + $0x1e0] sm:$0xff] }
  0x7e   : > { %1983 = vmatpush1.bf16.msra.mxu1 %v983_v10  ;;  %2251 = vmatmul.mubr.bf16.gmra.mrb[20].mxu0 %v4054_v11  ;;  %v543_v10 = vld [vmem:[%s4505_s17 + $0x3e0] sm:$0xff]  ;;  %v545_v11 = vld [vmem:[%s4505_s17 + $0x3f0] sm:$0xff] }
  0x7f   : > { %2292 = vmatpush1.bf16.msra.mxu0 %v1079_v14  ;;  %1984 = vmatprep.subr.bf16.mxu1 %v986_v15  ;;  %v737_v14 = vld [vmem:[%s4505_s17 + $0x9f0] sm:$0xff]  ;;  %v548_v15 = vld [vmem:[%s4505_s17 + $0x408] sm:$0xff]  ;;  %v763_v56 = vld [vmem:[%s4505_s17 + $0xac0] sm:$0xff] }
  0x80   : > { %2293 = vmatprep.subr.bf16.mxu0 %v1082_v19  ;;  %1951 = vmatprep.mubr.bf16.mxu1 %v4065_v23  ;;  %v993_v19 = vpack.c.bf16 %v545_v11, %v543_v10  ;;  %v1089_v21 = vpack.c.bf16 %v737_v14, %v735_v12  ;;  %v996_v22 = vpack.c.bf16 %v550_v16, %v548_v15  ;;  %v549_v23 = vld [vmem:[%s4505_s17 + $0x410] sm:$0xff]  ;;  %v751_v10 = vld [vmem:[%s4505_s17 + $0xa60] sm:$0xff]  ;;  %v566_v14 = vld [vmem:[%s4505_s17 + $0x498] sm:$0xff] }
  0x81   : > { %2260 = vmatprep.mubr.bf16.mxu0 %v4071_v26  ;;  %v1092_v26 = vpack.c.bf16 %v742_v18, %v740_v17  ;;  %v995_v35 = vpack.c.bf16 %v549_v23, %v547_v20  ;;  %v753_v12 = vld [vmem:[%s4505_s17 + $0xa70] sm:$0xff]  ;;  %v756_v16 = vld [vmem:[%s4505_s17 + $0xa88] sm:$0xff]  ;;  %v758_v17 = vld [vmem:[%s4505_s17 + $0xa98] sm:$0xff]  ;;  %v4009_v18 = vcombine.high %v5034_v3, %v5039_v6 }
  0x82   : > { %1985 = vmatpush1.bf16.msra.mxu1 %v985_v27  ;;  %v552_v27 = vld [vmem:[%s4505_s17 + $0x428] sm:$0xff]  ;;  %v563_v20 = vld [vmem:[%s4505_s17 + $0x480] sm:$0xff]  ;;  %v565_v23 = vld [vmem:[%s4505_s17 + $0x490] sm:$0xff] }
  0x83   : > { %2294 = vmatpush1.bf16.msra.mxu0 %v1081_v29  ;;  %1986 = vmatprep.subr.bf16.mxu1 %v988_v30  ;;  %v744_v29 = vld [vmem:[%s4505_s17 + $0xa28] sm:$0xff]  ;;  %v3970_v30 = vcombine.low %v4918_v40, %v4923_v41  ;;  %v551_v40 = vld [vmem:[%s4505_s17 + $0x420] sm:$0xff]  ;;  %v553_v41 = vld [vmem:[%s4505_s17 + $0x430] sm:$0xff] }
  0x84   : > { %2295 = vmatprep.subr.bf16.mxu0 %v1084_v34  ;;  %v3976_v34 = vcombine.low %v4930_v44, %v4935_v45  ;;  %v745_v44 = vld [vmem:[%s4505_s17 + $0xa30] sm:$0xff]  ;;  %v556_v45 = vld [vmem:[%s4505_s17 + $0x448] sm:$0xff] }
  0x85   : > { %1952 = vmatmul.mubr.bf16.gmra.mrb[24].mxu1 %v4064_v39  ;;  %v998_v39 = vpack.c.bf16 %v554_v28, %v552_v27  ;;  %v568_v27 = vld [vmem:[%s4505_s17 + $0x4a8] sm:$0xff]  ;;  %v570_v28 = vld [vmem:[%s4505_s17 + $0x4b8] sm:$0xff] }
  0x86   : > { %1987 = vmatpush1.bf16.msra.mxu1 %v987_v42  ;;  %2261 = vmatmul.mubr.bf16.gmra.mrb[24].mxu0 %v4070_v43  ;;  %v743_v42 = vld [vmem:[%s4505_s17 + $0xa20] sm:$0xff]  ;;  %v1094_v43 = vpack.c.bf16 %v746_v31, %v744_v29  ;;  %v760_v29 = vld [vmem:[%s4505_s17 + $0xaa8] sm:$0xff] }
  0x87   : > { %2296 = vmatpush1.bf16.msra.mxu0 %v1083_v46  ;;  %1988 = vmatprep.subr.bf16.mxu1 %v990_v47  ;;  %v558_v46 = vld [vmem:[%s4505_s17 + $0x458] sm:$0xff]  ;;  %v3987_v47 = vcombine.high %v4978_v32, %v4983_v33  ;;  %v1093_v53 = vpack.c.bf16 %v745_v44, %v743_v42  ;;  %v5066_v32 = vld [vmem:[%s6660_s2 + $0x188] sm:$0xff]  ;;  %v759_v42 = vld [vmem:[%s4505_s17 + $0xaa0] sm:$0xff] }
  0x88   : > { %2297 = vmatprep.subr.bf16.mxu0 %v1086_v51  ;;  %1994 = vmatprep.mubr.bf16.mxu1 %v3971_v55  ;;  %v997_v51 = vpack.c.bf16 %v553_v41, %v551_v40  ;;  %v1000_v54 = vpack.c.bf16 %v558_v46, %v556_v45  ;;  %v557_v55 = vld [vmem:[%s4505_s17 + $0x450] sm:$0xff]  ;;  %v5071_v33 = vld [vmem:[%s6660_s2 + $0x1c8] sm:$0xff]  ;;  %v567_v40 = vld [vmem:[%s4505_s17 + $0x4a0] sm:$0xff] }
  0x89   : > { %2303 = vmatprep.mubr.bf16.mxu0 %v3977_v58  ;;  %v1096_v58 = vpack.c.bf16 %v750_v49, %v748_v48  ;;  %v999_v63 = vpack.c.bf16 %v557_v55, %v555_v52  ;;  %v569_v41 = vld [vmem:[%s4505_s17 + $0x4b0] sm:$0xff]  ;;  %v572_v45 = vld [vmem:[%s4505_s17 + $0x4c8] sm:$0xff]  ;;  %v574_v46 = vld [vmem:[%s4505_s17 + $0x4d8] sm:$0xff] }
  0x8a   : > { %1989 = vmatpush1.bf16.msra.mxu1 %v989_v59  ;;  %v560_v59 = vld [vmem:[%s4505_s17 + $0x468] sm:$0xff]  ;;  %v761_v44 = vld [vmem:[%s4505_s17 + $0xab0] sm:$0xff]  ;;  %v766_v49 = vld [vmem:[%s4505_s17 + $0xad8] sm:$0xff] }
  0x8b   : > { %2298 = vmatpush1.bf16.msra.mxu0 %v1085_v1  ;;  %1990 = vmatprep.subr.bf16.mxu1 %v992_v2  ;;  %v562_v1 = vld [vmem:[%s4505_s17 + $0x478] sm:$0xff]  ;;  %v752_v2 = vld [vmem:[%s4505_s17 + $0xa68] sm:$0xff]  ;;  %v571_v52 = vld [vmem:[%s4505_s17 + $0x4c0] sm:$0xff] }
  0x8c   : > { %2299 = vmatprep.subr.bf16.mxu0 %v1088_v62  ;;  %v5027_v62 = vld [vmem:[%s6660_s2 + $0x148] sm:$0xff]  ;;  %v1098_v11 = vpack.c.bf16 %v754_v4, %v752_v2  ;;  %v573_v55 = vld [vmem:[%s4505_s17 + $0x4d0] sm:$0xff]  ;;  %v770_v4 = vld [vmem:[%s4505_s17 + $0xaf8] sm:$0xff] }
  0x8d   : > { %v4003_v15 = vcombine.high %v5022_v61, %v5027_v62  ;;  %v4002_v31 = vcombine.low %v5022_v61, %v5027_v62  ;;  %v764_v48 = vld [vmem:[%s4505_s17 + $0xac8] sm:$0xff] }
  0x8e   : > { %1991 = vmatpush1.bf16.msra.mxu1 %v991_v5  ;;  %v1002_v5 = vpack.c.bf16 %v562_v1, %v560_v59  ;;  %v576_v59 = vld [vmem:[%s4505_s17 + $0x4e8] sm:$0xff]  ;;  %v578_v1 = vld [vmem:[%s4505_s17 + $0x4f8] sm:$0xff] }
  0x8f   : > { %2300 = vmatpush1.bf16.msra.mxu0 %v1087_v8  ;;  %1992 = vmatprep.subr.bf16.mxu1 %v994_v9  ;;  %v559_v8 = vld [vmem:[%s4505_s17 + $0x460] sm:$0xff]  ;;  %v561_v9 = vld [vmem:[%s4505_s17 + $0x470] sm:$0xff]  ;;  %v768_v2 = vld [vmem:[%s4505_s17 + $0xae8] sm:$0xff] }
  0x90   : > { %2301 = vmatprep.subr.bf16.mxu0 %v1090_v13  ;;  %v564_v13 = vld [vmem:[%s4505_s17 + $0x488] sm:$0xff] }
  0x91   : > { %v5110_v61 = vld [vmem:[%s6660_s2 + $0x208] sm:$0xff] }
  0x92   : > { %1993 = vmatpush1.bf16.msra.mxu1 %v993_v19  ;;  %v1001_v19 = vpack.c.bf16 %v561_v9, %v559_v8  ;;  %v5115_v62 = vld [vmem:[%s6660_s2 + $0x248] sm:$0xff]  ;;  %v575_v8 = vld [vmem:[%s4505_s17 + $0x4e0] sm:$0xff]  ;;  %v577_v9 = vld [vmem:[%s4505_s17 + $0x4f0] sm:$0xff] }
  0x93   : > { %2302 = vmatpush1.bf16.msra.mxu0 %v1089_v21  ;;  %2065 = vmatprep.subr.bf16.mxu1 %v996_v22  ;;  %v1097_v21 = vpack.c.bf16 %v753_v12, %v751_v10  ;;  %v1004_v22 = vpack.c.bf16 %v566_v14, %v564_v13  ;;  %v767_v10 = vld [vmem:[%s4505_s17 + $0xae0] sm:$0xff]  ;;  %v769_v12 = vld [vmem:[%s4505_s17 + $0xaf0] sm:$0xff]  ;;  %v580_v13 = vld [vmem:[%s4505_s17 + $0x508] sm:$0xff] }
  0x94   : > { %2374 = vmatprep.subr.bf16.mxu0 %v1092_v26  ;;  %v1100_v26 = vpack.c.bf16 %v758_v17, %v756_v16  ;;  %v582_v14 = vld [vmem:[%s4505_s17 + $0x518] sm:$0xff]  ;;  %v772_v16 = vld [vmem:[%s4505_s17 + $0xb08] sm:$0xff] }
  0x95   : > { %1995 = vmatmul.mubr.bf16.vlgmr.msra.gmra.mrb[0].mxu1 %v3970_v30  ;;  %v762_v30 = vld [vmem:[%s4505_s17 + $0xab8] sm:$0xff] }
  0x96   : > { %2066 = vmatpush1.bf16.msra.mxu1 %v995_v35  ;;  %2304 = vmatmul.mubr.bf16.vlgmr.msra.gmra.mrb[0].mxu0 %v3976_v34  ;;  %v1003_v34 = vpack.c.bf16 %v565_v23, %v563_v20  ;;  %v4008_v35 = vcombine.low %v5034_v3, %v5039_v6  ;;  %v5122_v3 = vld [vmem:[%s6660_s2 + $0x220] sm:$0xff]  ;;  %v774_v17 = vld [vmem:[%s4505_s17 + $0xb18] sm:$0xff]  ;;  %v581_v23 = vld [vmem:[%s4505_s17 + $0x510] sm:$0xff] }
  0x97   : > { %2375 = vmatpush1.bf16.msra.mxu0 %v1091_v38  ;;  %2067 = vmatprep.subr.bf16.mxu1 %v998_v39  ;;  %v1099_v38 = vpack.c.bf16 %v757_v25, %v755_v24  ;;  %v1006_v39 = vpack.c.bf16 %v570_v28, %v568_v27  ;;  %v5127_v6 = vld [vmem:[%s6660_s2 + $0x260] sm:$0xff]  ;;  %v773_v25 = vld [vmem:[%s4505_s17 + $0xb10] sm:$0xff]  ;;  %v584_v27 = vld [vmem:[%s4505_s17 + $0x528] sm:$0xff] }
  0x98   : > { %2376 = vmatprep.subr.bf16.mxu0 %v1094_v43  ;;  %2004 = vmatprep.mubr.bf16.mxu1 %v3987_v47  ;;  %v1102_v43 = vpack.c.bf16 %v762_v30, %v760_v29  ;;  %v4019_v47 = vcombine.high %v5066_v32, %v5071_v33  ;;  %v579_v20 = vld [vmem:[%s4505_s17 + $0x500] sm:$0xff]  ;;  %v586_v28 = vld [vmem:[%s4505_s17 + $0x538] sm:$0xff]  ;;  %v776_v29 = vld [vmem:[%s4505_s17 + $0xb28] sm:$0xff] }
  0x99   : > { %2313 = vmatprep.mubr.bf16.mxu0 %v3993_v50  ;;  %v4025_v50 = vcombine.high %v5078_v36, %v5083_v37  ;;  %v771_v24 = vld [vmem:[%s4505_s17 + $0xb00] sm:$0xff]  ;;  %v778_v30 = vld [vmem:[%s4505_s17 + $0xb38] sm:$0xff] }
  0x9a   : > { %2068 = vmatpush1.bf16.msra.mxu1 %v997_v51  ;;  %v1005_v51 = vpack.c.bf16 %v569_v41, %v567_v40  ;;  %v583_v40 = vld [vmem:[%s4505_s17 + $0x520] sm:$0xff]  ;;  %v585_v41 = vld [vmem:[%s4505_s17 + $0x530] sm:$0xff] }
  0x9b   : > { %2377 = vmatpush1.bf16.msra.mxu0 %v1093_v53  ;;  %2069 = vmatprep.subr.bf16.mxu1 %v1000_v54  ;;  %v1101_v53 = vpack.c.bf16 %v761_v44, %v759_v42  ;;  %v1008_v54 = vpack.c.bf16 %v574_v46, %v572_v45  ;;  %v775_v42 = vld [vmem:[%s4505_s17 + $0xb20] sm:$0xff]  ;;  %v777_v44 = vld [vmem:[%s4505_s17 + $0xb30] sm:$0xff]  ;;  %v588_v45 = vld [vmem:[%s4505_s17 + $0x548] sm:$0xff] }
  0x9c   : > { %2378 = vmatprep.subr.bf16.mxu0 %v1096_v58  ;;  %v1104_v58 = vpack.c.bf16 %v766_v49, %v764_v48  ;;  %v590_v46 = vld [vmem:[%s4505_s17 + $0x558] sm:$0xff]  ;;  %v780_v48 = vld [vmem:[%s4505_s17 + $0xb48] sm:$0xff] }
  0x9d   : > { %2005 = vmatmul.mubr.bf16.gmra.mrb[4].mxu1 %v3986_v60  ;;  %v4018_v60 = vcombine.low %v5066_v32, %v5071_v33  ;;  %v5154_v32 = vld [vmem:[%s6660_s2 + $0x288] sm:$0xff]  ;;  %v782_v49 = vld [vmem:[%s4505_s17 + $0xb58] sm:$0xff] }
  0x9e   : > { %2070 = vmatpush1.bf16.msra.mxu1 %v999_v63  ;;  %2314 = vmatmul.mubr.bf16.gmra.mrb[4].mxu0 %v3992_v0  ;;  %v1007_v63 = vpack.c.bf16 %v573_v55, %v571_v52  ;;  %v4024_v0 = vcombine.low %v5078_v36, %v5083_v37  ;;  %v5159_v33 = vld [vmem:[%s6660_s2 + $0x2c8] sm:$0xff]  ;;  %v5166_v36 = vld [vmem:[%s6660_s2 + $0x2a0] sm:$0xff]  ;;  %v589_v55 = vld [vmem:[%s4505_s17 + $0x550] sm:$0xff] }
  0x9f   : > { %2379 = vmatpush1.bf16.msra.mxu0 %v1095_v7  ;;  %2071 = vmatprep.subr.bf16.mxu1 %v1002_v5  ;;  %v1103_v7 = vpack.c.bf16 %v765_v57, %v763_v56  ;;  %v1010_v5 = vpack.c.bf16 %v578_v1, %v576_v59  ;;  %v5171_v37 = vld [vmem:[%s6660_s2 + $0x2e0] sm:$0xff]  ;;  %v781_v57 = vld [vmem:[%s4505_s17 + $0xb50] sm:$0xff]  ;;  %v592_v59 = vld [vmem:[%s4505_s17 + $0x568] sm:$0xff] }
  0xa0   : > { %2380 = vmatprep.subr.bf16.mxu0 %v1098_v11  ;;  %2014 = vmatprep.mubr.bf16.mxu1 %v4003_v15  ;;  %v1106_v11 = vpack.c.bf16 %v770_v4, %v768_v2  ;;  %v4035_v15 = vcombine.high %v5110_v61, %v5115_v62  ;;  %v587_v52 = vld [vmem:[%s4505_s17 + $0x540] sm:$0xff]  ;;  %v594_v1 = vld [vmem:[%s4505_s17 + $0x578] sm:$0xff]  ;;  %v784_v2 = vld [vmem:[%s4505_s17 + $0xb68] sm:$0xff] }
  0xa1   : > { %2323 = vmatprep.mubr.bf16.mxu0 %v4009_v18  ;;  %v4041_v18 = vcombine.high %v5122_v3, %v5127_v6  ;;  %v779_v56 = vld [vmem:[%s4505_s17 + $0xb40] sm:$0xff]  ;;  %v786_v4 = vld [vmem:[%s4505_s17 + $0xb78] sm:$0xff] }
  0xa2   : > { %2072 = vmatpush1.bf16.msra.mxu1 %v1001_v19  ;;  %v1009_v19 = vpack.c.bf16 %v577_v9, %v575_v8  ;;  %v591_v8 = vld [vmem:[%s4505_s17 + $0x560] sm:$0xff]  ;;  %v593_v9 = vld [vmem:[%s4505_s17 + $0x570] sm:$0xff] }
  0xa3   : > { %2381 = vmatpush1.bf16.msra.mxu0 %v1097_v21  ;;  %2073 = vmatprep.subr.bf16.mxu1 %v1004_v22  ;;  %v1105_v21 = vpack.c.bf16 %v769_v12, %v767_v10  ;;  %v1012_v22 = vpack.c.bf16 %v582_v14, %v580_v13  ;;  %v783_v10 = vld [vmem:[%s4505_s17 + $0xb60] sm:$0xff]  ;;  %v785_v12 = vld [vmem:[%s4505_s17 + $0xb70] sm:$0xff]  ;;  %v596_v13 = vld [vmem:[%s4505_s17 + $0x588] sm:$0xff] }
  0xa4   : > { %2382 = vmatprep.subr.bf16.mxu0 %v1100_v26  ;;  %v1108_v26 = vpack.c.bf16 %v774_v17, %v772_v16  ;;  %v598_v14 = vld [vmem:[%s4505_s17 + $0x598] sm:$0xff]  ;;  %v788_v16 = vld [vmem:[%s4505_s17 + $0xb88] sm:$0xff] }
  0xa5   : > { %2015 = vmatmul.mubr.bf16.gmra.mrb[8].mxu1 %v4002_v31  ;;  %v4034_v31 = vcombine.low %v5110_v61, %v5115_v62  ;;  %v5198_v61 = vld [vmem:[%s6660_s2 + $0x308] sm:$0xff]  ;;  %v790_v17 = vld [vmem:[%s4505_s17 + $0xb98] sm:$0xff] }
  0xa6   : > { %2074 = vmatpush1.bf16.msra.mxu1 %v1003_v34  ;;  %2324 = vmatmul.mubr.bf16.gmra.mrb[8].mxu0 %v4008_v35  ;;  %v1011_v34 = vpack.c.bf16 %v581_v23, %v579_v20  ;;  %v4040_v35 = vcombine.low %v5122_v3, %v5127_v6  ;;  %v5203_v62 = vld [vmem:[%s6660_s2 + $0x348] sm:$0xff]  ;;  %v5210_v3 = vld [vmem:[%s6660_s2 + $0x320] sm:$0xff]  ;;  %v597_v23 = vld [vmem:[%s4505_s17 + $0x590] sm:$0xff] }
  0xa7   : > { %2383 = vmatpush1.bf16.msra.mxu0 %v1099_v38  ;;  %2075 = vmatprep.subr.bf16.mxu1 %v1006_v39  ;;  %v1107_v38 = vpack.c.bf16 %v773_v25, %v771_v24  ;;  %v1014_v39 = vpack.c.bf16 %v586_v28, %v584_v27  ;;  %v5215_v6 = vld [vmem:[%s6660_s2 + $0x360] sm:$0xff]  ;;  %v789_v25 = vld [vmem:[%s4505_s17 + $0xb90] sm:$0xff]  ;;  %v600_v27 = vld [vmem:[%s4505_s17 + $0x5a8] sm:$0xff] }
  0xa8   : > { %2384 = vmatprep.subr.bf16.mxu0 %v1102_v43  ;;  %2024 = vmatprep.mubr.bf16.mxu1 %v4019_v47  ;;  %v1110_v43 = vpack.c.bf16 %v778_v30, %v776_v29  ;;  %v4051_v47 = vcombine.high %v5154_v32, %v5159_v33  ;;  %v595_v20 = vld [vmem:[%s4505_s17 + $0x580] sm:$0xff]  ;;  %v602_v28 = vld [vmem:[%s4505_s17 + $0x5b8] sm:$0xff]  ;;  %v792_v29 = vld [vmem:[%s4505_s17 + $0xba8] sm:$0xff] }
  0xa9   : > { %2333 = vmatprep.mubr.bf16.mxu0 %v4025_v50  ;;  %v4057_v50 = vcombine.high %v5166_v36, %v5171_v37  ;;  %v787_v24 = vld [vmem:[%s4505_s17 + $0xb80] sm:$0xff]  ;;  %v794_v30 = vld [vmem:[%s4505_s17 + $0xbb8] sm:$0xff] }
  0xaa   : > { %2076 = vmatpush1.bf16.msra.mxu1 %v1005_v51  ;;  %v1013_v51 = vpack.c.bf16 %v585_v41, %v583_v40  ;;  %v599_v40 = vld [vmem:[%s4505_s17 + $0x5a0] sm:$0xff]  ;;  %v601_v41 = vld [vmem:[%s4505_s17 + $0x5b0] sm:$0xff] }
  0xab   : > { %2385 = vmatpush1.bf16.msra.mxu0 %v1101_v53  ;;  %2077 = vmatprep.subr.bf16.mxu1 %v1008_v54  ;;  %v1109_v53 = vpack.c.bf16 %v777_v44, %v775_v42  ;;  %v1016_v54 = vpack.c.bf16 %v590_v46, %v588_v45  ;;  %v791_v42 = vld [vmem:[%s4505_s17 + $0xba0] sm:$0xff]  ;;  %v793_v44 = vld [vmem:[%s4505_s17 + $0xbb0] sm:$0xff]  ;;  %v604_v45 = vld [vmem:[%s4505_s17 + $0x5c8] sm:$0xff] }
  0xac   : > { %2386 = vmatprep.subr.bf16.mxu0 %v1104_v58  ;;  %v1112_v58 = vpack.c.bf16 %v782_v49, %v780_v48  ;;  %v606_v46 = vld [vmem:[%s4505_s17 + $0x5d8] sm:$0xff]  ;;  %v796_v48 = vld [vmem:[%s4505_s17 + $0xbc8] sm:$0xff] }
  0xad   : > { %2025 = vmatmul.mubr.bf16.gmra.mrb[12].mxu1 %v4018_v60  ;;  %v4050_v60 = vcombine.low %v5154_v32, %v5159_v33  ;;  %v5242_v32 = vld [vmem:[%s6660_s2 + $0x10] sm:$0xff]  ;;  %v798_v49 = vld [vmem:[%s4505_s17 + $0xbd8] sm:$0xff] }
  0xae   : > { %2078 = vmatpush1.bf16.msra.mxu1 %v1007_v63  ;;  %2334 = vmatmul.mubr.bf16.gmra.mrb[12].mxu0 %v4024_v0  ;;  %v1015_v63 = vpack.c.bf16 %v589_v55, %v587_v52  ;;  %v4056_v0 = vcombine.low %v5166_v36, %v5171_v37  ;;  %v5247_v33 = vld [vmem:[%s6660_s2 + $0x50] sm:$0xff]  ;;  %v5254_v36 = vld [vmem:[%s6660_s2 + $0x28] sm:$0xff]  ;;  %v1117_v52 = vpack.c.bf16 %v793_v44, %v791_v42 }
  0xaf   : > { %2387 = vmatpush1.bf16.msra.mxu0 %v1103_v7  ;;  %2079 = vmatprep.subr.bf16.mxu1 %v1010_v5  ;;  %v1111_v7 = vpack.c.bf16 %v781_v57, %v779_v56  ;;  %v1018_v5 = vpack.c.bf16 %v594_v1, %v592_v59  ;;  %v5259_v37 = vld [vmem:[%s6660_s2 + $0x68] sm:$0xff]  ;;  %v605_v55 = vld [vmem:[%s4505_s17 + $0x5d0] sm:$0xff]  ;;  %v795_v56 = vld [vmem:[%s4505_s17 + $0xbc0] sm:$0xff]  ;;  %v1120_v57 = vpack.c.bf16 %v798_v49, %v796_v48 }
  0xb0   : > { %2388 = vmatprep.subr.bf16.mxu0 %v1106_v11  ;;  %2034 = vmatprep.mubr.bf16.mxu1 %v4035_v15  ;;  %v1114_v11 = vpack.c.bf16 %v786_v4, %v784_v2  ;;  %v4067_v15 = vcombine.high %v5198_v61, %v5203_v62  ;;  %v608_v59 = vld [vmem:[%s4505_s17 + $0x5e8] sm:$0xff]  ;;  %v610_v1 = vld [vmem:[%s4505_s17 + $0x5f8] sm:$0xff]  ;;  %v813_v42 = vld [vmem:[%s4505_s17 + $0xc50] sm:$0xff] }
  0xb1   : > { %2343 = vmatprep.mubr.bf16.mxu0 %v4041_v18  ;;  %v4073_v18 = vcombine.high %v5210_v3, %v5215_v6  ;;  %v800_v2 = vld [vmem:[%s4505_s17 + $0xbe8] sm:$0xff]  ;;  %v802_v4 = vld [vmem:[%s4505_s17 + $0xbf8] sm:$0xff]  ;;  %v5352_v49 = vld [vmem:[%s6660_s2 + $0x150] sm:$0xff] }
  0xb2   : > { %2080 = vmatpush1.bf16.msra.mxu1 %v1009_v19  ;;  %v1017_v19 = vpack.c.bf16 %v593_v9, %v591_v8  ;;  %v870_v8 = vld [vmem:[%s4505_s17 + $0xe18] sm:$0xff]  ;;  %v804_v9 = vld [vmem:[%s4505_s17 + $0xc08] sm:$0xff] }
  0xb3   : > { %2389 = vmatpush1.bf16.msra.mxu0 %v1105_v21  ;;  %2081 = vmatprep.subr.bf16.mxu1 %v1012_v22  ;;  %v1113_v21 = vpack.c.bf16 %v785_v12, %v783_v10  ;;  %v1020_v22 = vpack.c.bf16 %v598_v14, %v596_v13  ;;  %v806_v10 = vld [vmem:[%s4505_s17 + $0xc18] sm:$0xff]  ;;  %v803_v12 = vld [vmem:[%s4505_s17 + $0xc00] sm:$0xff]  ;;  %v805_v14 = vld [vmem:[%s4505_s17 + $0xc10] sm:$0xff] }
  0xb4   : > { %2390 = vmatprep.subr.bf16.mxu0 %v1108_v26  ;;  %v1116_v26 = vpack.c.bf16 %v790_v17, %v788_v16  ;;  %v5299_v16 = vld [vmem:[%s6660_s2 + $0xd0] sm:$0xff]  ;;  %v876_v44 = vld [vmem:[%s4505_s17 + $0xe48] sm:$0xff]  ;;  %v818_v48 = vld [vmem:[%s4505_s17 + $0xc78] sm:$0xff] }
  0xb5   : > { %2035 = vmatmul.mubr.bf16.gmra.mrb[16].mxu1 %v4034_v31  ;;  %v4066_v31 = vcombine.low %v5198_v61, %v5203_v62  ;;  %v1026_v62 = vpack.c.bf16 %v610_v1, %v608_v59  ;;  %v882_v59 = vld [vmem:[%s4505_s17 + $0xe78] sm:$0xff]  ;;  %v815_v1 = vld [vmem:[%s4505_s17 + $0xc60] sm:$0xff] }
  0xb6   : > { %2082 = vmatpush1.bf16.msra.mxu1 %v1011_v34  ;;  %2344 = vmatmul.mubr.bf16.gmra.mrb[16].mxu0 %v4040_v35  ;;  %v1019_v34 = vpack.c.bf16 %v597_v23, %v595_v20  ;;  %v4072_v35 = vcombine.low %v5210_v3, %v5215_v6  ;;  %v799_v3 = vld [vmem:[%s4505_s17 + $0xbe0] sm:$0xff]  ;;  %v1122_v6 = vpack.c.bf16 %v802_v4, %v800_v2  ;;  %v5307_v20 = vld [vmem:[%s6660_s2 + $0xa8] sm:$0xff]  ;;  %v810_v23 = vld [vmem:[%s4505_s17 + $0xc38] sm:$0xff] }
  0xb7   : > { %2391 = vmatpush1.bf16.msra.mxu0 %v1107_v38  ;;  %2083 = vmatprep.subr.bf16.mxu1 %v1014_v39  ;;  %v1115_v38 = vpack.c.bf16 %v789_v25, %v787_v24  ;;  %v1022_v39 = vpack.c.bf16 %v602_v28, %v600_v27  ;;  %v867_v24 = vld [vmem:[%s4505_s17 + $0xe00] sm:$0xff]  ;;  %v869_v25 = vld [vmem:[%s4505_s17 + $0xe10] sm:$0xff]  ;;  %v872_v28 = vld [vmem:[%s4505_s17 + $0xe28] sm:$0xff] }
  0xb8   : > { %2392 = vmatprep.subr.bf16.mxu0 %v1110_v43  ;;  %2044 = vmatprep.mubr.bf16.mxu1 %v4051_v47  ;;  %v1118_v43 = vpack.c.bf16 %v794_v30, %v792_v29  ;;  %v3973_v47 = vcombine.high %v5242_v32, %v5247_v33  ;;  %v874_v29 = vld [vmem:[%s4505_s17 + $0xe38] sm:$0xff]  ;;  %v1123_v30 = vpack.c.bf16 %v805_v14, %v803_v12  ;;  %v817_v2 = vld [vmem:[%s4505_s17 + $0xc70] sm:$0xff]  ;;  %v5414_v14 = vld [vmem:[%s6660_s2 + $0x1e8] sm:$0xff] }
  0xb9   : > { %2353 = vmatprep.mubr.bf16.mxu0 %v4057_v50  ;;  %v3979_v50 = vcombine.high %v5254_v36, %v5259_v37  ;;  %v821_v12 = vld [vmem:[%s4505_s17 + $0xc90] sm:$0xff] }
  0xba   : > { %2084 = vmatpush1.bf16.msra.mxu1 %v1013_v51  ;;  %v1021_v51 = vpack.c.bf16 %v601_v41, %v599_v40  ;;  %v873_v40 = vld [vmem:[%s4505_s17 + $0xe30] sm:$0xff]  ;;  %v811_v41 = vld [vmem:[%s4505_s17 + $0xc40] sm:$0xff] }
  0xbb   : > { %2393 = vmatpush1.bf16.msra.mxu0 %v1109_v53  ;;  %2085 = vmatprep.subr.bf16.mxu1 %v1016_v54  ;;  %v1024_v53 = vpack.c.bf16 %v606_v46, %v604_v45  ;;  %v603_v54 = vld [vmem:[%s4505_s17 + $0x5c0] sm:$0xff]  ;;  %v878_v45 = vld [vmem:[%s4505_s17 + $0xe58] sm:$0xff] }
  0xbc   : > { %2394 = vmatprep.subr.bf16.mxu0 %v1112_v58  ;;  %v797_v58 = vld [vmem:[%s4505_s17 + $0xbd0] sm:$0xff] }
  0xbd   : > { %2045 = vmatmul.mubr.bf16.gmra.mrb[20].mxu1 %v4050_v60  ;;  %v1023_v60 = vpack.c.bf16 %v605_v55, %v603_v54  ;;  %v1119_v61 = vpack.c.bf16 %v797_v58, %v795_v56  ;;  %v875_v54 = vld [vmem:[%s4505_s17 + $0xe40] sm:$0xff]  ;;  %v877_v55 = vld [vmem:[%s4505_s17 + $0xe50] sm:$0xff]  ;;  %v880_v56 = vld [vmem:[%s4505_s17 + $0xe68] sm:$0xff]  ;;  %v5373_v58 = vpack.c.bf16 %v878_v45, %v876_v44 }
  0xbe   : > { %2086 = vmatpush1.bf16.msra.mxu1 %v1015_v63  ;;  %2354 = vmatmul.mubr.bf16.gmra.mrb[20].mxu0 %v4056_v0  ;;  %v607_v63 = vld [vmem:[%s4505_s17 + $0x5e0] sm:$0xff]  ;;  %v609_v0 = vld [vmem:[%s4505_s17 + $0x5f0] sm:$0xff]  ;;  %v892_v45 = vld [vmem:[%s4505_s17 + $0xec8] sm:$0xff] }
  0xbf   : > { %2395 = vmatpush1.bf16.msra.mxu0 %v1111_v7  ;;  %2087 = vmatprep.subr.bf16.mxu1 %v1018_v5  ;;  %v801_v7 = vld [vmem:[%s4505_s17 + $0xbf0] sm:$0xff]  ;;  %v868_v5 = vld [vmem:[%s4505_s17 + $0xe08] sm:$0xff]  ;;  %v827_v44 = vld [vmem:[%s4505_s17 + $0xcc0] sm:$0xff] }
  0xc0   : > { %2396 = vmatprep.subr.bf16.mxu0 %v1114_v11  ;;  %2054 = vmatprep.mubr.bf16.mxu1 %v4067_v15  ;;  %v1025_v11 = vpack.c.bf16 %v609_v0, %v607_v63  ;;  %v1121_v13 = vpack.c.bf16 %v801_v7, %v799_v3  ;;  %v5294_v15 = vld [vmem:[%s6660_s2 + $0x90] sm:$0xff]  ;;  %v5301_v17 = vpack.c.bf16 %v870_v8, %v868_v5  ;;  %v822_v63 = vld [vmem:[%s4505_s17 + $0xc98] sm:$0xff]  ;;  %v879_v3 = vld [vmem:[%s4505_s17 + $0xe60] sm:$0xff] }
  0xc1   : > { %2363 = vmatprep.mubr.bf16.mxu0 %v4073_v18  ;;  %v1124_v18 = vpack.c.bf16 %v806_v10, %v804_v9  ;;  %v3989_v27 = vcombine.high %v5294_v15, %v5299_v16  ;;  %v5389_v5 = vpack.c.bf16 %v877_v55, %v875_v54  ;;  %v5394_v8 = vld [vmem:[%s6660_s2 + $0x190] sm:$0xff]  ;;  %v5402_v10 = vpack.c.bf16 %v882_v59, %v880_v56  ;;  %v5468_v54 = vld [vmem:[%s6660_s2 + $0x228] sm:$0xff]  ;;  %v834_v59 = vld [vmem:[%s4505_s17 + $0xcf8] sm:$0xff] }
  0xc2   : > { %2088 = vmatpush1.bf16.msra.mxu1 %v1017_v19  ;;  %v808_v19 = vld [vmem:[%s4505_s17 + $0xc28] sm:$0xff]  ;;  %v5399_v9 = vld [vmem:[%s6660_s2 + $0x1d0] sm:$0xff] }
  0xc3   : > { %2397 = vmatpush1.bf16.msra.mxu0 %v1113_v21  ;;  %2089 = vmatprep.subr.bf16.mxu1 %v1020_v22  ;;  %v5312_v21 = vld [vmem:[%s6660_s2 + $0xe8] sm:$0xff]  ;;  %v3972_v22 = vcombine.low %v5242_v32, %v5247_v33  ;;  %v1126_v32 = vpack.c.bf16 %v810_v23, %v808_v19  ;;  %v807_v33 = vld [vmem:[%s4505_s17 + $0xc20] sm:$0xff] }
  0xc4   : > { %2398 = vmatprep.subr.bf16.mxu0 %v1116_v26  ;;  %v3978_v26 = vcombine.low %v5254_v36, %v5259_v37  ;;  %v5331_v36 = vpack.c.bf16 %v869_v25, %v867_v24  ;;  %v814_v37 = vld [vmem:[%s4505_s17 + $0xc58] sm:$0xff]  ;;  %v824_v19 = vld [vmem:[%s4505_s17 + $0xca8] sm:$0xff] }
  0xc5   : > { %2055 = vmatmul.mubr.bf16.gmra.mrb[24].mxu1 %v4066_v31  ;;  %v3995_v31 = vcombine.high %v5307_v20, %v5312_v21  ;;  %v5473_v55 = vld [vmem:[%s6660_s2 + $0x268] sm:$0xff] }
  0xc6   : > { %2090 = vmatpush1.bf16.msra.mxu1 %v1019_v34  ;;  %2364 = vmatmul.mubr.bf16.gmra.mrb[24].mxu0 %v4072_v35  ;;  %v809_v34 = vld [vmem:[%s4505_s17 + $0xc30] sm:$0xff]  ;;  %v812_v35 = vld [vmem:[%s4505_s17 + $0xc48] sm:$0xff] }
  0xc7   : > { %2399 = vmatpush1.bf16.msra.mxu0 %v1115_v38  ;;  %2091 = vmatprep.subr.bf16.mxu1 %v1022_v39  ;;  %v5334_v38 = vpack.c.bf16 %v874_v29, %v872_v28  ;;  %v871_v39 = vld [vmem:[%s4505_s17 + $0xe20] sm:$0xff]  ;;  %v1125_v46 = vpack.c.bf16 %v809_v34, %v807_v33  ;;  %v888_v29 = vld [vmem:[%s4505_s17 + $0xea8] sm:$0xff] }
  0xc8   : > { %2400 = vmatprep.subr.bf16.mxu0 %v1118_v43  ;;  %2097 = vmatprep.mubr.bf16.mxu1 %v3973_v47  ;;  %v5343_v43 = vld [vmem:[%s6660_s2 + $0x110] sm:$0xff]  ;;  %v816_v47 = vld [vmem:[%s4505_s17 + $0xc68] sm:$0xff]  ;;  %v823_v34 = vld [vmem:[%s4505_s17 + $0xca0] sm:$0xff] }
  0xc9   : > { %2406 = vmatprep.mubr.bf16.mxu0 %v3979_v50  ;;  %v5357_v50 = vld [vmem:[%s6660_s2 + $0x128] sm:$0xff]  ;;  %v4005_v4 = vcombine.high %v5343_v43, %v5352_v49  ;;  %v1130_v7 = vpack.c.bf16 %v818_v48, %v816_v47  ;;  %v4004_v25 = vcombine.low %v5343_v43, %v5352_v49  ;;  %v889_v43 = vld [vmem:[%s4505_s17 + $0xeb0] sm:$0xff] }
  0xca   : > { %2092 = vmatpush1.bf16.msra.mxu1 %v1021_v51  ;;  %v5362_v51 = vld [vmem:[%s6660_s2 + $0x168] sm:$0xff]  ;;  %v829_v48 = vld [vmem:[%s4505_s17 + $0xcd0] sm:$0xff] }
  0xcb   : > { %2401 = vmatpush1.bf16.msra.mxu0 %v1117_v52  ;;  %2093 = vmatprep.subr.bf16.mxu1 %v1024_v53  ;;  %v1128_v52 = vpack.c.bf16 %v814_v37, %v812_v35  ;;  %v5365_v53 = vpack.c.bf16 %v873_v40, %v871_v39  ;;  %v4011_v0 = vcombine.high %v5357_v50, %v5362_v51  ;;  %v825_v35 = vld [vmem:[%s4505_s17 + $0xcb0] sm:$0xff]  ;;  %v828_v37 = vld [vmem:[%s4505_s17 + $0xcc8] sm:$0xff]  ;;  %v830_v40 = vld [vmem:[%s4505_s17 + $0xcd8] sm:$0xff] }
  0xcc   : > { %2402 = vmatprep.subr.bf16.mxu0 %v1120_v57  ;;  %v3988_v57 = vcombine.low %v5294_v15, %v5299_v16  ;;  %v884_v15 = vld [vmem:[%s4505_s17 + $0xe88] sm:$0xff]  ;;  %v886_v16 = vld [vmem:[%s4505_s17 + $0xe98] sm:$0xff]  ;;  %v4010_v28 = vcombine.low %v5357_v50, %v5362_v51  ;;  %v1133_v47 = vpack.c.bf16 %v825_v35, %v823_v34  ;;  %v5457_v49 = vld [vmem:[%s6660_s2 + $0x210] sm:$0xff]  ;;  %v1136_v51 = vpack.c.bf16 %v830_v40, %v828_v37 }
  0xcd   : > { %v5462_v50 = vld [vmem:[%s6660_s2 + $0x250] sm:$0xff]  ;;  %v899_v34 = vld [vmem:[%s4505_s17 + $0xf00] sm:$0xff]  ;;  %v4042_v40 = vcombine.low %v5468_v54, %v5473_v55 }
  0xce   : > { %2094 = vmatpush1.bf16.msra.mxu1 %v1023_v60  ;;  %v3994_v60 = vcombine.low %v5307_v20, %v5312_v21  ;;  %v826_v20 = vld [vmem:[%s4505_s17 + $0xcb8] sm:$0xff]  ;;  %v883_v21 = vld [vmem:[%s4505_s17 + $0xe80] sm:$0xff]  ;;  %v901_v35 = vld [vmem:[%s4505_s17 + $0xf10] sm:$0xff] }
  0xcf   : > { %2403 = vmatpush1.bf16.msra.mxu0 %v1119_v61  ;;  %2095 = vmatprep.subr.bf16.mxu1 %v1026_v62  ;;  %v1127_v61 = vpack.c.bf16 %v813_v42, %v811_v41  ;;  %v820_v62 = vld [vmem:[%s4505_s17 + $0xc88] sm:$0xff]  ;;  %v1134_v33 = vpack.c.bf16 %v826_v20, %v824_v19  ;;  %v887_v42 = vld [vmem:[%s4505_s17 + $0xea0] sm:$0xff]  ;;  %v902_v19 = vld [vmem:[%s4505_s17 + $0xf18] sm:$0xff] }
  0xd0   : > { %2404 = vmatprep.subr.bf16.mxu0 %v1122_v6  ;;  %v881_v6 = vld [vmem:[%s4505_s17 + $0xe70] sm:$0xff]  ;;  %v1132_v23 = vpack.c.bf16 %v822_v63, %v820_v62  ;;  %v5476_v56 = vpack.c.bf16 %v889_v43, %v887_v42  ;;  %v896_v62 = vld [vmem:[%s4505_s17 + $0xee8] sm:$0xff]  ;;  %v898_v63 = vld [vmem:[%s4505_s17 + $0xef8] sm:$0xff] }
  0xd1   : > { %v5423_v24 = vpack.c.bf16 %v881_v6, %v879_v3  ;;  %v4043_v3 = vcombine.high %v5468_v54, %v5473_v55  ;;  %v904_v42 = vld [vmem:[%s4505_s17 + $0xf28] sm:$0xff]  ;;  %v906_v43 = vld [vmem:[%s4505_s17 + $0xf38] sm:$0xff]  ;;  %v903_v54 = vld [vmem:[%s4505_s17 + $0xf20] sm:$0xff] }
  0xd2   : > { %2096 = vmatpush1.bf16.msra.mxu1 %v1025_v11  ;;  %v819_v11 = vld [vmem:[%s4505_s17 + $0xc80] sm:$0xff]  ;;  %v905_v55 = vld [vmem:[%s4505_s17 + $0xf30] sm:$0xff] }
  0xd3   : > { %2405 = vmatpush1.bf16.msra.mxu0 %v1121_v13  ;;  %4114 = vmatprep.subr.bf16.mxu1 %v5301_v17  ;;  %v5409_v13 = vld [vmem:[%s6660_s2 + $0x1a8] sm:$0xff] }
  0xd4   : > { %2477 = vmatprep.subr.bf16.mxu0 %v1124_v18  ;;  %v1129_v18 = vpack.c.bf16 %v817_v2, %v815_v1  ;;  %v891_v2 = vld [vmem:[%s4505_s17 + $0xec0] sm:$0xff] }
  0xd5   : > { %2098 = vmatmul.mubr.bf16.vlgmr.msra.gmra.mrb[0].mxu1 %v3972_v22  ;;  %v885_v22 = vld [vmem:[%s4505_s17 + $0xe90] sm:$0xff] }
  0xd6   : > { %2407 = vmatmul.mubr.bf16.vlgmr.msra.gmra.mrb[0].mxu0 %v3978_v26  ;;  %2107 = vmatprep.mubr.bf16.mxu1 %v3989_v27  ;;  %v5428_v26 = vpack.c.bf16 %v886_v16, %v884_v15  ;;  %v4021_v27 = vcombine.high %v5394_v8, %v5399_v9  ;;  %v5442_v39 = vpack.c.bf16 %v885_v22, %v883_v21  ;;  %v897_v15 = vld [vmem:[%s4505_s17 + $0xef0] sm:$0xff]  ;;  %v835_v16 = vld [vmem:[%s4505_s17 + $0xd00] sm:$0xff] }
  0xd7   : > { %2478 = vmatpush1.bf16.msra.mxu0 %v1123_v30  ;;  %2416 = vmatprep.mubr.bf16.mxu0 %v3995_v31  ;;  %v890_v30 = vld [vmem:[%s4505_s17 + $0xeb8] sm:$0xff]  ;;  %v1131_v31 = vpack.c.bf16 %v821_v12, %v819_v11  ;;  %v837_v21 = vld [vmem:[%s4505_s17 + $0xd10] sm:$0xff] }
  0xd8   : > { %2479 = vmatprep.subr.bf16.mxu0 %v1126_v32  ;;  %4130 = vmatpush1.bf16.msra.mxu1 %v5331_v36  ;;  %v4027_v32 = vcombine.high %v5409_v13, %v5414_v14  ;;  %v5446_v41 = vpack.c.bf16 %v890_v30, %v888_v29  ;;  %v838_v12 = vld [vmem:[%s4505_s17 + $0xd18] sm:$0xff]  ;;  %v5513_v22 = vld [vmem:[%s6660_s2 + $0x290] sm:$0xff]  ;;  %v5529_v29 = vld [vmem:[%s6660_s2 + $0x2e8] sm:$0xff] }
  0xd9   : > { %4115 = vmatprep.subr.bf16.mxu1 %v5334_v38 }
  0xdb   : > { %2480 = vmatpush1.bf16.msra.mxu0 %v1125_v46  ;;  %v894_v46 = vld [vmem:[%s4505_s17 + $0xed8] sm:$0xff] }
  0xdc   : > { %2481 = vmatprep.subr.bf16.mxu0 %v1128_v52  ;;  %4131 = vmatpush1.bf16.msra.mxu1 %v5365_v53  ;;  %v832_v52 = vld [vmem:[%s4505_s17 + $0xce8] sm:$0xff]  ;;  %v5482_v1 = vpack.c.bf16 %v894_v46, %v892_v45 }
  0xdd   : > { %2108 = vmatmul.mubr.bf16.gmra.mrb[4].mxu1 %v3988_v57  ;;  %4116 = vmatprep.subr.bf16.mxu1 %v5373_v58  ;;  %v4020_v57 = vcombine.low %v5394_v8, %v5399_v9  ;;  %v1138_v6 = vpack.c.bf16 %v834_v59, %v832_v52  ;;  %v833_v8 = vld [vmem:[%s4505_s17 + $0xcf0] sm:$0xff]  ;;  %v836_v9 = vld [vmem:[%s4505_s17 + $0xd08] sm:$0xff]  ;;  %v5558_v52 = vpack.c.bf16 %v906_v43, %v904_v42  ;;  %v918_v42 = vld [vmem:[%s4505_s17 + $0xf98] sm:$0xff] }
  0xde   : > { %2117 = vmatprep.mubr.bf16.mxu1 %v4005_v4  ;;  %2417 = vmatmul.mubr.bf16.gmra.mrb[4].mxu0 %v3994_v60  ;;  %v893_v4 = vld [vmem:[%s4505_s17 + $0xed0] sm:$0xff]  ;;  %v4037_v60 = vcombine.high %v5457_v49, %v5462_v50  ;;  %v908_v59 = vld [vmem:[%s4505_s17 + $0xf48] sm:$0xff] }
  0xdf   : > { %2482 = vmatpush1.bf16.msra.mxu0 %v1127_v61  ;;  %2426 = vmatprep.mubr.bf16.mxu0 %v4011_v0  ;;  %v4026_v61 = vcombine.low %v5409_v13, %v5414_v14  ;;  %v1135_v0 = vpack.c.bf16 %v829_v48, %v827_v44  ;;  %v5498_v11 = vpack.c.bf16 %v893_v4, %v891_v2  ;;  %v895_v14 = vld [vmem:[%s4505_s17 + $0xee0] sm:$0xff]  ;;  %v841_v48 = vld [vmem:[%s4505_s17 + $0xd30] sm:$0xff]  ;;  %v910_v2 = vld [vmem:[%s4505_s17 + $0xf58] sm:$0xff] }
  0xe0   : > { %2483 = vmatprep.subr.bf16.mxu0 %v1130_v7  ;;  %4132 = vmatpush1.bf16.msra.mxu1 %v5389_v5  ;;  %v831_v7 = vld [vmem:[%s4505_s17 + $0xce0] sm:$0xff]  ;;  %v5502_v13 = vpack.c.bf16 %v898_v63, %v896_v62  ;;  %v5532_v30 = vpack.c.bf16 %v897_v15, %v895_v14  ;;  %v1139_v44 = vpack.c.bf16 %v837_v21, %v835_v16  ;;  %v5574_v62 = vld [vmem:[%s6660_s2 + $0x350] sm:$0xff] }
  0xe1   : > { %4117 = vmatprep.subr.bf16.mxu1 %v5402_v10  ;;  %v1137_v20 = vpack.c.bf16 %v833_v8, %v831_v7  ;;  %v5588_v7 = vpack.c.bf16 %v905_v55, %v903_v54  ;;  %v907_v14 = vld [vmem:[%s4505_s17 + $0xf40] sm:$0xff]  ;;  %v909_v15 = vld [vmem:[%s4505_s17 + $0xf50] sm:$0xff] }
  0xe3   : > { %2484 = vmatpush1.bf16.msra.mxu0 %v1129_v18  ;;  %v900_v18 = vld [vmem:[%s4505_s17 + $0xf08] sm:$0xff] }
  0xe4   : > { %2485 = vmatprep.subr.bf16.mxu0 %v1132_v23  ;;  %4133 = vmatpush1.bf16.msra.mxu1 %v5423_v24  ;;  %v5518_v23 = vld [vmem:[%s6660_s2 + $0x2d0] sm:$0xff] }
  0xe5   : > { %2118 = vmatmul.mubr.bf16.gmra.mrb[8].mxu1 %v4004_v25  ;;  %4118 = vmatprep.subr.bf16.mxu1 %v5428_v26  ;;  %v1140_v25 = vpack.c.bf16 %v838_v12, %v836_v9  ;;  %v4053_v37 = vcombine.high %v5513_v22, %v5518_v23  ;;  %v4052_v8 = vcombine.low %v5513_v22, %v5518_v23  ;;  %v850_v9 = vld [vmem:[%s4505_s17 + $0xd78] sm:$0xff] }
  0xe6   : > { %2127 = vmatprep.mubr.bf16.mxu1 %v4021_v27  ;;  %2427 = vmatmul.mubr.bf16.gmra.mrb[8].mxu0 %v4010_v28  ;;  %v840_v27 = vld [vmem:[%s4505_s17 + $0xd28] sm:$0xff]  ;;  %v5594_v12 = vpack.c.bf16 %v910_v2, %v908_v59  ;;  %v915_v2 = vld [vmem:[%s4505_s17 + $0xf80] sm:$0xff] }
  0xe7   : > { %2486 = vmatpush1.bf16.msra.mxu0 %v1131_v31  ;;  %2436 = vmatprep.mubr.bf16.mxu0 %v4027_v32  ;;  %v5524_v28 = vld [vmem:[%s6660_s2 + $0x2a8] sm:$0xff]  ;;  %v4036_v31 = vcombine.low %v5457_v49, %v5462_v50  ;;  %v842_v32 = vld [vmem:[%s4505_s17 + $0xd38] sm:$0xff]  ;;  %v5554_v50 = vpack.c.bf16 %v901_v35, %v899_v34  ;;  %v911_v34 = vld [vmem:[%s4505_s17 + $0xf60] sm:$0xff] }
  0xe8   : > { %2487 = vmatprep.subr.bf16.mxu0 %v1134_v33  ;;  %4134 = vmatpush1.bf16.msra.mxu1 %v5442_v39  ;;  %v5538_v33 = vpack.c.bf16 %v902_v19, %v900_v18  ;;  %v4059_v45 = vcombine.high %v5524_v28, %v5529_v29  ;;  %v1142_v46 = vpack.c.bf16 %v842_v32, %v840_v27  ;;  %v844_v49 = vld [vmem:[%s4505_s17 + $0xd48] sm:$0xff]  ;;  %v849_v27 = vld [vmem:[%s4505_s17 + $0xd70] sm:$0xff] }
  0xe9   : > { %4119 = vmatprep.subr.bf16.mxu1 %v5446_v41  ;;  %v4058_v18 = vcombine.low %v5524_v28, %v5529_v29  ;;  %v912_v19 = vld [vmem:[%s4505_s17 + $0xf68] sm:$0xff]  ;;  %v5610_v28 = vpack.c.bf16 %v909_v15, %v907_v14  ;;  %v854_v29 = vld [vmem:[%s4505_s17 + $0xd98] sm:$0xff]  ;;  %v913_v35 = vld [vmem:[%s4505_s17 + $0xf70] sm:$0xff] }
  0xea   : > { %v5644_v54 = vpack.c.bf16 %v913_v35, %v911_v34  ;;  %v855_v14 = vld [vmem:[%s4505_s17 + $0xda0] sm:$0xff]  ;;  %v857_v15 = vld [vmem:[%s4505_s17 + $0xdb0] sm:$0xff]  ;;  %v866_v35 = vld [vmem:[%s4505_s17 + $0xdf8] sm:$0xff] }
  0xeb   : > { %2488 = vmatpush1.bf16.msra.mxu0 %v1133_v47  ;;  %v839_v47 = vld [vmem:[%s4505_s17 + $0xd20] sm:$0xff] }
  0xec   : > { %2489 = vmatprep.subr.bf16.mxu0 %v1136_v51  ;;  %4135 = vmatpush1.bf16.msra.mxu1 %v5476_v56  ;;  %v846_v51 = vld [vmem:[%s4505_s17 + $0xd58] sm:$0xff]  ;;  %v1141_v4 = vpack.c.bf16 %v841_v48, %v839_v47  ;;  %v856_v48 = vld [vmem:[%s4505_s17 + $0xda8] sm:$0xff] }
  0xed   : > { %2128 = vmatmul.mubr.bf16.gmra.mrb[12].mxu1 %v4020_v57  ;;  %4120 = vmatprep.subr.bf16.mxu1 %v5482_v1  ;;  %v843_v57 = vld [vmem:[%s4505_s17 + $0xd40] sm:$0xff]  ;;  %v1144_v63 = vpack.c.bf16 %v846_v51, %v844_v49  ;;  %v5636_v49 = vld [vmem:[%s6660_s2 + $0x30] sm:$0xff] }
  0xee   : > { %2137 = vmatprep.mubr.bf16.mxu1 %v4037_v60  ;;  %2437 = vmatmul.mubr.bf16.gmra.mrb[12].mxu0 %v4026_v61  ;;  %v845_v60 = vld [vmem:[%s4505_s17 + $0xd50] sm:$0xff] }
  0xef   : > { %2490 = vmatpush1.bf16.msra.mxu0 %v1135_v0  ;;  %2446 = vmatprep.mubr.bf16.mxu0 %v4043_v3  ;;  %v5569_v61 = vld [vmem:[%s6660_s2 + $0x310] sm:$0xff]  ;;  %v848_v0 = vld [vmem:[%s4505_s17 + $0xd68] sm:$0xff]  ;;  %v1143_v21 = vpack.c.bf16 %v845_v60, %v843_v57  ;;  %v858_v57 = vld [vmem:[%s4505_s17 + $0xdb8] sm:$0xff] }
  0xf0   : > { %2491 = vmatprep.subr.bf16.mxu0 %v1138_v6  ;;  %4136 = vmatpush1.bf16.msra.mxu1 %v5498_v11  ;;  %v5580_v3 = vld [vmem:[%s6660_s2 + $0x328] sm:$0xff]  ;;  %v4069_v16 = vcombine.high %v5569_v61, %v5574_v62  ;;  %v1146_v23 = vpack.c.bf16 %v850_v9, %v848_v0  ;;  %v5641_v51 = vld [vmem:[%s6660_s2 + $0x70] sm:$0xff]  ;;  %v4068_v55 = vcombine.low %v5569_v61, %v5574_v62  ;;  %v922_v0 = vld [vmem:[%s4505_s17 + $0xfb8] sm:$0xff] }
  0xf1   : > { %4121 = vmatprep.subr.bf16.mxu1 %v5502_v13  ;;  %v5585_v6 = vld [vmem:[%s6660_s2 + $0x368] sm:$0xff]  ;;  %v3981_v62 = vcombine.high %v5636_v49, %v5641_v51  ;;  %v1150_v9 = vpack.c.bf16 %v858_v57, %v856_v48  ;;  %v865_v57 = vld [vmem:[%s4505_s17 + $0xdf0] sm:$0xff] }
  0xf2   : > { %v4075_v22 = vcombine.high %v5580_v3, %v5585_v6  ;;  %v4074_v60 = vcombine.low %v5580_v3, %v5585_v6  ;;  %v862_v6 = vld [vmem:[%s4505_s17 + $0xdd8] sm:$0xff] }
  0xf3   : > { %2492 = vmatpush1.bf16.msra.mxu0 %v1137_v20  ;;  %v914_v20 = vld [vmem:[%s4505_s17 + $0xf78] sm:$0xff] }
  0xf4   : > { %2493 = vmatprep.subr.bf16.mxu0 %v1140_v25  ;;  %4137 = vmatpush1.bf16.msra.mxu1 %v5532_v30  ;;  %v847_v25 = vld [vmem:[%s4505_s17 + $0xd60] sm:$0xff]  ;;  %v5614_v32 = vpack.c.bf16 %v914_v20, %v912_v19  ;;  %v921_v20 = vld [vmem:[%s4505_s17 + $0xfb0] sm:$0xff] }
  0xf5   : > { %2138 = vmatmul.mubr.bf16.gmra.mrb[16].mxu1 %v4036_v31  ;;  %4122 = vmatprep.subr.bf16.mxu1 %v5538_v33  ;;  %v852_v31 = vld [vmem:[%s4505_s17 + $0xd88] sm:$0xff]  ;;  %v1145_v43 = vpack.c.bf16 %v849_v27, %v847_v25  ;;  %v919_v19 = vld [vmem:[%s4505_s17 + $0xfa0] sm:$0xff] }
  0xf6   : > { %2147 = vmatprep.mubr.bf16.mxu1 %v4053_v37  ;;  %2447 = vmatmul.mubr.bf16.gmra.mrb[16].mxu0 %v4042_v40  ;;  %v851_v37 = vld [vmem:[%s4505_s17 + $0xd80] sm:$0xff]  ;;  %v916_v40 = vld [vmem:[%s4505_s17 + $0xf88] sm:$0xff]  ;;  %v1148_v47 = vpack.c.bf16 %v854_v29, %v852_v31  ;;  %v861_v31 = vld [vmem:[%s4505_s17 + $0xdd0] sm:$0xff]  ;;  %v5680_v34 = vpack.c.bf16 %v921_v20, %v919_v19  ;;  %v4385_v20 = vmov 0  }
  0xf7   : > { %2494 = vmatpush1.bf16.msra.mxu0 %v1139_v44  ;;  %2456 = vmatprep.mubr.bf16.mxu0 %v4059_v45  ;;  %v853_v44 = vld [vmem:[%s4505_s17 + $0xd90] sm:$0xff]  ;;  %v5625_v45 = vld [vmem:[%s6660_s2 + $0x338] sm:$0xff]  ;;  %v5650_v59 = vpack.c.bf16 %v918_v42, %v916_v40  ;;  %v859_v27 = vld [vmem:[%s4505_s17 + $0xdc0] sm:$0xff] }
  0xf8   : > { %2495 = vmatprep.subr.bf16.mxu0 %v1142_v46  ;;  %4138 = vmatpush1.bf16.msra.mxu1 %v5554_v50  ;;  %v5630_v46 = vld [vmem:[%s6660_s2 + $0x378] sm:$0xff]  ;;  %v1147_v61 = vpack.c.bf16 %v853_v44, %v851_v37  ;;  %v864_v29 = vld [vmem:[%s4505_s17 + $0xde8] sm:$0xff]  ;;  %v923_v40 = vld [vmem:[%s4505_s17 + $0xfc0] sm:$0xff] }
  0xf9   : > { %4123 = vmatprep.subr.bf16.mxu1 %v5558_v52  ;;  %v925_v42 = vld [vmem:[%s4505_s17 + $0xfd0] sm:$0xff]  ;;  %v930_v44 = vld [vmem:[%s4505_s17 + $0xff8] sm:$0xff]  ;;  %v1154_v48 = vpack.c.bf16 %v866_v35, %v864_v29  ;;  %v2964_v19 = vld [vmem:[%s6661_s3] sm:$0xff]  ;;  %4361 = vset.pattern.permute.xlu1 %v4385_v20 }
  0xfa   : > { %4360 = vset.pattern.permute.xlu0 %v4385_v20  ;;  %v1274_v35 = vld [vmem:[%s6660_s2 + $0x2b8] sm:$0xff] }
  0xfb   : > { %2496 = vmatpush1.bf16.msra.mxu0 %v1141_v4  ;;  %v917_v4 = vld [vmem:[%s4505_s17 + $0xf90] sm:$0xff]  ;;  %2968 = vperm.xlu0 %4360, %v2964_v19   ;;  %v2691_v19 = vlaneseq }
  0xfc   : > { %2497 = vmatprep.subr.bf16.mxu0 %v1144_v63  ;;  %4139 = vmatpush1.bf16.msra.mxu1 %v5588_v7  ;;  %v920_v63 = vld [vmem:[%s4505_s17 + $0xfa8] sm:$0xff]  ;;  %v5666_v3 = vpack.c.bf16 %v917_v4, %v915_v2  ;;  %v5693_v2 = vpack.c.bf16 %v925_v42, %v923_v40 }
  0xfd   : > { %2148 = vmatmul.mubr.bf16.gmra.mrb[20].mxu1 %v4052_v8  ;;  %4124 = vmatprep.subr.bf16.mxu1 %v5594_v12  ;;  %v4079_v8 = vcombine.high %v5625_v45, %v5630_v46 }
  0xfe   : > { %2157 = vmatprep.mubr.bf16.mxu1 %v4069_v16  ;;  %2457 = vmatmul.mubr.bf16.gmra.mrb[20].mxu0 %v4058_v18  ;;  %v860_v16 = vld [vmem:[%s4505_s17 + $0xdc8] sm:$0xff]  ;;  %v5670_v18 = vpack.c.bf16 %v922_v0, %v920_v63  ;;  %v929_v63 = vld [vmem:[%s4505_s17 + $0xff0] sm:$0xff] }
  0xff   : > { %2498 = vmatpush1.bf16.msra.mxu0 %v1143_v21  ;;  %2466 = vmatprep.mubr.bf16.mxu0 %v4075_v22  ;;  %v924_v21 = vld [vmem:[%s4505_s17 + $0xfc8] sm:$0xff]  ;;  %v926_v22 = vld [vmem:[%s4505_s17 + $0xfd8] sm:$0xff]  ;;  %v1152_v25 = vpack.c.bf16 %v862_v6, %v860_v16  ;;  %v1225_v16 = vld [vmem:[%s6660_s2 + $0x130] sm:$0xff] }
 0x100   : > { %2499 = vmatprep.subr.bf16.mxu0 %v1146_v23  ;;  %4140 = vmatpush1.bf16.msra.mxu1 %v5610_v28  ;;  %v1149_v23 = vpack.c.bf16 %v857_v15, %v855_v14  ;;  %v5684_v37 = vpack.c.bf16 %v926_v22, %v924_v21  ;;  %v4078_v15 = vcombine.low %v5625_v45, %v5630_v46  ;;  %v1242_v21 = vld [vmem:[%s6660_s2 + $0x1b8] sm:$0xff] }
 0x101   : > { %4125 = vmatprep.subr.bf16.mxu1 %v5614_v32  ;;  %v1250_v22 = vld [vmem:[%s6660_s2 + $0x1f8] sm:$0xff] }
 0x102   : > { %v4030_v29 = vcombine.low %v1242_v21, %v1250_v22 }
 0x103   : > { %2500 = vmatpush1.bf16.msra.mxu0 %v1145_v43  ;;  %v928_v43 = vld [vmem:[%s4505_s17 + $0xfe8] sm:$0xff] }
 0x104   : > { %2501 = vmatprep.subr.bf16.mxu0 %v1148_v47  ;;  %4141 = vmatpush1.bf16.msra.mxu1 %v5644_v54  ;;  %v1151_v47 = vpack.c.bf16 %v861_v31, %v859_v27  ;;  %v5696_v4 = vpack.c.bf16 %v930_v44, %v928_v43  ;;  %v1258_v27 = vld [vmem:[%s6660_s2 + $0x238] sm:$0xff] }
 0x105   : > { %2158 = vmatmul.mubr.bf16.gmra.mrb[24].mxu1 %v4068_v55  ;;  %4126 = vmatprep.subr.bf16.mxu1 %v5650_v59  ;;  %v863_v55 = vld [vmem:[%s4505_s17 + $0xde0] sm:$0xff]  ;;  %v1266_v31 = vld [vmem:[%s6660_s2 + $0x278] sm:$0xff] }
 0x106   : > { %2467 = vmatmul.mubr.bf16.gmra.mrb[24].mxu0 %v4074_v60  ;;  %2672 = vmatprep.mubr.bf16.mxu1 %v4079_v8  ;;  %v927_v60 = vld [vmem:[%s4505_s17 + $0xfe0] sm:$0xff]  ;;  %v1153_v0 = vpack.c.bf16 %v865_v57, %v863_v55  ;;  %v1209_v8 = vld [vmem:[%s6660_s2 + $0xb0] sm:$0xff]  ;;  %v4046_v40 = vcombine.low %v1258_v27, %v1266_v31  ;;  %s4389_s17 = smov 16  }
 0x107   : > { %2502 = vmatpush1.bf16.msra.mxu0 %v1147_v61  ;;  %2509 = vmatprep.mubr.bf16.mxu0 %v3981_v62  ;;  %v1217_v61 = vld [vmem:[%s6660_s2 + $0xf0] sm:$0xff]  ;;  %v5707_v62 = vpack.c.bf16 %v929_v63, %v927_v60 }
 0x108   : > { %2503 = vmatprep.subr.bf16.mxu0 %v1150_v9  ;;  %4142 = vmatpush1.bf16.msra.mxu1 %v5666_v3  ;;  %v3980_v9 = vcombine.low %v5636_v49, %v5641_v51  ;;  %v3997_v14 = vcombine.high %v1209_v8, %v1217_v61  ;;  %v1233_v49 = vld [vmem:[%s6660_s2 + $0x170] sm:$0xff] }
 0x109   : > { %4127 = vmatprep.subr.bf16.mxu1 %v5670_v18  ;;  %v4013_v51 = vcombine.high %v1225_v16, %v1233_v49  ;;  %v4012_v45 = vcombine.low %v1225_v16, %v1233_v49 }
 0x10b   : > { %2504 = vmatpush1.bf16.msra.mxu0 %v1149_v23 }
 0x10c   : > { %2505 = vmatprep.subr.bf16.mxu0 %v1152_v25  ;;  %4143 = vmatpush1.bf16.msra.mxu1 %v5680_v34  ;;  %v4031_v25 = vcombine.high %v1242_v21, %v1250_v22 }
 0x10d   : > { %4128 = vmatprep.subr.bf16.mxu1 %v5684_v37 }
 0x10f   : > { %2506 = vmatpush1.bf16.msra.mxu0 %v1151_v47 }
 0x110   : > { %2507 = vmatprep.subr.bf16.mxu0 %v1154_v48  ;;  %4144 = vmatpush1.bf16.msra.mxu1 %v5693_v2 }
 0x111   : > { %4129 = vmatprep.subr.bf16.mxu1 %v5696_v4 }
 0x113   : > { %2508 = vmatpush1.bf16.msra.mxu0 %v1153_v0 }
 0x114   : > { %2580 = vmatprep.subr.bf16.mxu0 %v5301_v17  ;;  %4145 = vmatpush1.bf16.msra.mxu1 %v5707_v62  ;;  %v3996_v17 = vcombine.low %v1209_v8, %v1217_v61 }
 0x116   : > { %2510 = vmatmul.mubr.bf16.vlgmr.msra.gmra.mrb[0].mxu0 %v3980_v9 }
 0x117   : > { %2581 = vmatpush1.bf16.msra.mxu0 %v5331_v36  ;;  %2519 = vmatprep.mubr.bf16.mxu0 %v3997_v14  ;;  %v1241_v36 = vld [vmem:[%s6660_s2 + $0x1b0] sm:$0xff] }
 0x118   : > { %2582 = vmatprep.subr.bf16.mxu0 %v5334_v38  ;;  %2673 = vmatmul.mubr.bf16.vlgmr.msra.gmra.mrb[28].mxu1 %v4078_v15  ;;  %v1249_v38 = vld [vmem:[%s6660_s2 + $0x1f0] sm:$0xff] }
 0x119   : > { %3092 = vmatprep.mubr.bf16.mxu1 %v4385_v20 }
 0x11b   : > { %2583 = vmatpush1.bf16.msra.mxu0 %v5365_v53  ;;  %v4029_v53 = vcombine.high %v1241_v36, %v1249_v38 }
 0x11c   : > { %2584 = vmatprep.subr.bf16.mxu0 %v5373_v58  ;;  %v1257_v58 = vld [vmem:[%s6660_s2 + $0x230] sm:$0xff] }
 0x11e   : > { %2520 = vmatmul.mubr.bf16.gmra.mrb[4].mxu0 %v3996_v17 }
 0x11f   : > { %2585 = vmatpush1.bf16.msra.mxu0 %v5389_v5  ;;  %2529 = vmatprep.mubr.bf16.mxu0 %v4013_v51  ;;  %v1265_v5 = vld [vmem:[%s6660_s2 + $0x270] sm:$0xff] }
 0x120   : > { %2586 = vmatprep.subr.bf16.mxu0 %v5402_v10  ;;  %v4028_v10 = vcombine.low %v1241_v36, %v1249_v38 }
 0x123   : > { %2587 = vmatpush1.bf16.msra.mxu0 %v5423_v24  ;;  %v4045_v24 = vcombine.high %v1257_v58, %v1265_v5 }
 0x124   : > { %2588 = vmatprep.subr.bf16.mxu0 %v5428_v26  ;;  %v1273_v26 = vld [vmem:[%s6660_s2 + $0x2b0] sm:$0xff] }
 0x126   : > { %2530 = vmatmul.mubr.bf16.gmra.mrb[8].mxu0 %v4012_v45 }
 0x127   : > { %2589 = vmatpush1.bf16.msra.mxu0 %v5442_v39  ;;  %2539 = vmatprep.mubr.bf16.mxu0 %v4029_v53  ;;  %v1281_v39 = vld [vmem:[%s6660_s2 + $0x2f0] sm:$0xff] }
 0x128   : > { %2590 = vmatprep.subr.bf16.mxu0 %v5446_v41  ;;  %v4044_v41 = vcombine.low %v1257_v58, %v1265_v5 }
 0x12b   : > { %2591 = vmatpush1.bf16.msra.mxu0 %v5476_v56  ;;  %v4061_v56 = vcombine.high %v1273_v26, %v1281_v39 }
 0x12c   : > { %2592 = vmatprep.subr.bf16.mxu0 %v5482_v1  ;;  %v1289_v1 = vld [vmem:[%s6660_s2 + $0x330] sm:$0xff] }
 0x12e   : > { %2540 = vmatmul.mubr.bf16.gmra.mrb[12].mxu0 %v4028_v10 }
 0x12f   : > { %2593 = vmatpush1.bf16.msra.mxu0 %v5498_v11  ;;  %2549 = vmatprep.mubr.bf16.mxu0 %v4045_v24  ;;  %v1297_v11 = vld [vmem:[%s6660_s2 + $0x370] sm:$0xff] }
 0x130   : > { %2594 = vmatprep.subr.bf16.mxu0 %v5502_v13  ;;  %v4060_v13 = vcombine.low %v1273_v26, %v1281_v39 }
 0x133   : > { %2595 = vmatpush1.bf16.msra.mxu0 %v5532_v30  ;;  %v4077_v30 = vcombine.high %v1289_v1, %v1297_v11 }
 0x134   : > { %2596 = vmatprep.subr.bf16.mxu0 %v5538_v33  ;;  %v1194_v33 = vld [vmem:[%s6660_s2 + $0x38] sm:$0xff] }
 0x136   : > { %2550 = vmatmul.mubr.bf16.gmra.mrb[16].mxu0 %v4044_v41 }
 0x137   : > { %2597 = vmatpush1.bf16.msra.mxu0 %v5554_v50  ;;  %2559 = vmatprep.mubr.bf16.mxu0 %v4061_v56  ;;  %v1202_v50 = vld [vmem:[%s6660_s2 + $0x78] sm:$0xff] }
 0x138   : > { %2598 = vmatprep.subr.bf16.mxu0 %v5558_v52  ;;  %v4076_v52 = vcombine.low %v1289_v1, %v1297_v11 }
 0x13b   : > { %2599 = vmatpush1.bf16.msra.mxu0 %v5588_v7  ;;  %v3983_v7 = vcombine.high %v1194_v33, %v1202_v50 }
 0x13c   : > { %2600 = vmatprep.subr.bf16.mxu0 %v5594_v12  ;;  %v1210_v12 = vld [vmem:[%s6660_s2 + $0xb8] sm:$0xff] }
 0x13e   : > { %2560 = vmatmul.mubr.bf16.gmra.mrb[20].mxu0 %v4060_v13 }
 0x13f   : > { %2601 = vmatpush1.bf16.msra.mxu0 %v5610_v28  ;;  %2569 = vmatprep.mubr.bf16.mxu0 %v4077_v30  ;;  %v1218_v28 = vld [vmem:[%s6660_s2 + $0xf8] sm:$0xff] }
 0x140   : > { %2602 = vmatprep.subr.bf16.mxu0 %v5614_v32  ;;  %v3982_v32 = vcombine.low %v1194_v33, %v1202_v50  ;;  %v3999_v46 = vcombine.high %v1210_v12, %v1218_v28 }
 0x143   : > { %2603 = vmatpush1.bf16.msra.mxu0 %v5644_v54  ;;  %v1226_v54 = vld [vmem:[%s6660_s2 + $0x138] sm:$0xff] }
 0x144   : > { %2604 = vmatprep.subr.bf16.mxu0 %v5650_v59  ;;  %v1234_v59 = vld [vmem:[%s6660_s2 + $0x178] sm:$0xff] }
 0x145   : > { %v4015_v6 = vcombine.high %v1226_v54, %v1234_v59  ;;  %v4014_v23 = vcombine.low %v1226_v54, %v1234_v59 }
 0x146   : > { %2570 = vmatmul.mubr.bf16.gmra.mrb[24].mxu0 %v4076_v52 }
 0x147   : > { %2605 = vmatpush1.bf16.msra.mxu0 %v5666_v3  ;;  %2612 = vmatprep.mubr.bf16.mxu0 %v3983_v7  ;;  %v3998_v3 = vcombine.low %v1210_v12, %v1218_v28 }
 0x148   : > { %2606 = vmatprep.subr.bf16.mxu0 %v5670_v18  ;;  %v2965_v18 = vld [vmem:[%s6661_s3 + $0x8] sm:$0xf] }
 0x149   : > { %2973 = vperm.xlu1 %4361, %v2965_v18  }
 0x14b   : > { %2607 = vmatpush1.bf16.msra.mxu0 %v5680_v34  ;;  %v4047_v34 = vcombine.high %v1258_v27, %v1266_v31 }
 0x14c   : > { %2608 = vmatprep.subr.bf16.mxu0 %v5684_v37  ;;  %v1282_v37 = vld [vmem:[%s6660_s2 + $0x2f8] sm:$0xff] }
 0x14d   : > { %v4063_v42 = vcombine.high %v1274_v35, %v1282_v37  ;;  %v4062_v43 = vcombine.low %v1274_v35, %v1282_v37 }
 0x14f   : > { %2609 = vmatpush1.bf16.msra.mxu0 %v5693_v2 }
 0x150   : > { %2610 = vmatprep.subr.bf16.mxu0 %v5696_v4 }
 0x153   : > { %2611 = vmatpush1.bf16.msra.mxu0 %v5707_v62 }
 0x156   : > { %2613 = vmatmul.mubr.bf16.vlgmr.msra.gmra.mrb[0].mxu0 %v3982_v32 }
 0x157   : > { %2622 = vmatprep.mubr.bf16.mxu0 %v3999_v46 }
 0x15e   : > { %2623 = vmatmul.mubr.bf16.gmra.mrb[4].mxu0 %v3998_v3 }
 0x15f   : > { %2632 = vmatprep.mubr.bf16.mxu0 %v4015_v6 }
 0x166   : > { %2633 = vmatmul.mubr.bf16.gmra.mrb[8].mxu0 %v4014_v23 }
 0x167   : > { %2642 = vmatprep.mubr.bf16.mxu0 %v4031_v25  ;;  %v5870_v25 = vshrl.u32 %v2691_v19, 7 }
 0x169   : > { %vm2722_vm0 = vcmp.lt.s32.totalorder %v5870_v25, 4  ;;  %vm3513_vm11 = vcmp.lt.s32.totalorder %v5870_v25, 2  ;;  %vm3546_vm12 = vcmp.lt.s32.totalorder %v5870_v25, 6  ;;  %vm3726_vm15 = vcmp.lt.s32.totalorder %v5870_v25, 5 }
 0x16e   : > { %2643 = vmatmul.mubr.bf16.gmra.mrb[12].mxu0 %v4030_v29 }
 0x16f   : > { %2652 = vmatprep.mubr.bf16.mxu0 %v4047_v34 }
 0x176   : > { %2653 = vmatmul.mubr.bf16.gmra.mrb[16].mxu0 %v4046_v40 }
 0x177   : > { %2662 = vmatprep.mubr.bf16.mxu0 %v4063_v42 }
 0x17e   : > { %2663 = vmatmul.mubr.bf16.gmra.mrb[20].mxu0 %v4062_v43 }
 0x1a8   : > { %v2099_v44 = vpop.f32.mrb[0].mxu1 }
 0x1a9   : > { %v2101_v47 = vpop.f32.mrb[1].mxu1 }
 0x1aa   : > { %v2103_v48 = vpop.f32.mrb[2].mxu1 }
 0x1ab   : > { %v2105_v55 = vpop.f32.mrb[3].mxu1 }
 0x1b0   : > { %v2109_v57 = vpop.f32.mrb[4].mxu1 }
 0x1b1   : > { %v2111_v2 = vpop.f32.mrb[5].mxu1 }
 0x1b2   : > { %v5822_v4 = vpop.f32.mrb[6].mxu1 }
 0x1b3   : > { %v5824_v60 = vpop.f32.mrb[7].mxu1 }
 0x1b8   : > { %v5826_v63 = vpop.f32.mrb[8].mxu1 }
 0x1b9   : > { %v5828_v0 = vpop.f32.mrb[9].mxu1 }
 0x1ba   : > { %v5830_v8 = vpop.f32.mrb[10].mxu1 }
 0x1bb   : > { %v5832_v61 = vpop.f32.mrb[11].mxu1 }
 0x1c0   : > { %v5834_v62 = vpop.f32.mrb[12].mxu1 }
 0x1c1   : > { %v5836_v9 = vpop.f32.mrb[13].mxu1 }
 0x1c2   : > { %v5838_v14 = vpop.f32.mrb[14].mxu1 }
 0x1c3   : > { %v5840_v15 = vpop.f32.mrb[15].mxu1 }
 0x1c8   : > { %v5842_v16 = vpop.f32.mrb[16].mxu1 }
 0x1c9   : > { %v5844_v49 = vpop.f32.mrb[17].mxu1 }
 0x1ca   : > { %v5846_v17 = vpop.f32.mrb[18].mxu1 }
 0x1cb   : > { %v5848_v51 = vpop.f32.mrb[19].mxu1 }
 0x1d0   : > { %v5850_v36 = vpop.f32.mrb[20].mxu1 }
 0x1d1   : > { %v5852_v38 = vpop.f32.mrb[21].mxu1 }
 0x1d2   : > { %v5854_v45 = vpop.f32.mrb[22].mxu1 }
 0x1d3   : > { %v5856_v53 = vpop.f32.mrb[23].mxu1 }
 0x1d8   : > { %v2159_v58 = vpop.f32.mrb[24].mxu1 }
 0x1d9   : > { %v2161_v5 = vpop.f32.mrb[25].mxu1 }
 0x1da   : > { %v2163_v10 = vpop.f32.mrb[26].mxu1 }
 0x1db   : > { %v2165_v24 = vpop.f32.mrb[27].mxu1 }
 0x1eb   : > { %v2674_v26 = vpop.f32.mrb[28].mxu1 }
 0x1ec   : > { %v2676_v39 = vpop.f32.mrb[29].mxu1 }
 0x1ed   : > { %v2678_v41 = vpop.f32.mrb[30].mxu1 }
 0x1ee   : > { %v2680_v56 = vpop.f32.mrb[31].mxu1 }
 0x219   : > { %v2571_v1 = vpop.f32.mrb[24].mxu0 }
 0x21a   : > { %v4170_v11 = vadd.f32 %v2571_v1, %v2159_v58  ;;  %v2573_v13 = vpop.f32.mrb[25].mxu0 }
 0x21b   : > { %v4172_v30 = vadd.f32 %v2573_v13, %v2161_v5  ;;  %v2575_v33 = vpop.f32.mrb[26].mxu0 }
 0x21c   : > { %v4174_v50 = vadd.f32 %v2575_v33, %v2163_v10  ;;  %v5858_v52 = vadd.f32 %v4170_v11, %v2674_v26  ;;  %v2577_v7 = vpop.f32.mrb[27].mxu0 }
 0x21d   : > { %v4176_v12 = vadd.f32 %v2577_v7, %v2165_v24  ;;  %v5860_v28 = vadd.f32 %v4172_v30, %v2676_v39 }
 0x21e   : > { %v4175_v32 = vadd.f32 %v4174_v50, %v2678_v41  ;;  %2935 = vrot.lane.b32.xlu1 %v5858_v52, %s4386_s28 }
 0x21f   : > { %v5864_v46 = vadd.f32 %v4176_v12, %v2680_v56 }
 0x220   : > { %2937 = vrot.lane.b32.xlu0 %v4175_v32, %s4386_s28 }
 0x229   : > { %v2614_v54 = vpop.f32.mrb[0].mxu0 }
 0x22a   : > { %v4146_v59 = vadd.f32 %v2614_v54, %v2099_v44  ;;  %v2616_v3 = vpop.f32.mrb[1].mxu0 }
 0x22b   : > { %v4147_v6 = vadd.f32 %v2616_v3, %v2101_v47  ;;  %v2618_v18 = vpop.f32.mrb[2].mxu0 }
 0x22c   : > { %v4148_v21 = vadd.f32 %v2618_v18, %v2103_v48  ;;  %v2620_v22 = vpop.f32.mrb[3].mxu0  ;;  %2683 = vrot.lane.b32.xlu0 %v4146_v59, %s4387_s29 }
 0x22d   : > { %v4149_v23 = vadd.f32 %v2620_v22, %v2105_v55  ;;  %2687 = vrot.lane.b32.xlu1 %v4147_v6, %s4387_s29 }
 0x22e   : > { %v2714_v37 = vrot.slane %v4148_v21, 4 }
 0x22f   : > { %v2715_v44 = vrot.slane %v4149_v23, 4 }
 0x230   : > { %2685 = vrot.lane.b32.xlu0 %v4148_v21, %s4387_s29 }
 0x231   : > { %v2624_v27 = vpop.f32.mrb[4].mxu0  ;;  %2689 = vrot.lane.b32.xlu1 %v4149_v23, %s4387_s29 }
 0x232   : > { %v4150_v31 = vadd.f32 %v2624_v27, %v2109_v57  ;;  %v2626_v29 = vpop.f32.mrb[5].mxu0 }
 0x233   : > { %v4151_v34 = vadd.f32 %v2626_v29, %v2111_v2  ;;  %v2628_v35 = vpop.f32.mrb[6].mxu0 }
 0x234   : > { %v2716_v40 = vrot.slane %v4150_v31, 4  ;;  %v4152_v42 = vadd.f32 %v2628_v35, %v5822_v4  ;;  %v2630_v43 = vpop.f32.mrb[7].mxu0 }
 0x235   : > { %v2717_v47 = vrot.slane %v4151_v34, 4  ;;  %v4153_v48 = vadd.f32 %v2630_v43, %v5824_v60 }
 0x236   : > { %v2718_v55 = vrot.slane %v4152_v42, 4  ;;  %2756 = vrot.lane.b32.xlu0 %v4152_v42, %s4388_s30  ;;  %v2725_v57 = vsel %vm2722_vm0, %v2714_v37, %v2716_v40 }
 0x237   : > { %v2719_v2 = vrot.slane %v4153_v48, 4  ;;  %v2726_v58 = vsel %vm2722_vm0, %v2715_v44, %v2717_v47 }
 0x238   : > { %v2723_v5 = vsel %vm2722_vm0, %v2716_v40, %v2718_v55 }
 0x239   : > { %v2634_v4 = vpop.f32.mrb[8].mxu0  ;;  %2729 = vrot.lane.b32.xlu1 %v2723_v5, %s4389_s17  ;;  %v2724_v60 = vsel %vm2722_vm0, %v2717_v47, %v2719_v2  ;;  %v2900_v2 = vrot.slane %v5858_v52, 4 }
 0x23a   : > { %v4154_v10 = vadd.f32 %v2634_v4, %v5826_v63  ;;  %v2636_v24 = vpop.f32.mrb[9].mxu0  ;;  %2727 = vrot.lane.b32.xlu0 %v2725_v57, %s4389_s17 }
 0x23b   : > { %v4155_v26 = vadd.f32 %v2636_v24, %v5828_v0  ;;  %v2638_v39 = vpop.f32.mrb[10].mxu0 }
 0x23c   : > { %v4156_v41 = vadd.f32 %v2638_v39, %v5830_v8  ;;  %v2640_v56 = vpop.f32.mrb[11].mxu0  ;;  %v2785_v11 = vrot.slane %v4154_v10, 4  ;;  %v3367_v39 = vld [vmem:[%s6663_s5] sm:$0xff] }
 0x23d   : > { %v4157_v1 = vadd.f32 %v2640_v56, %v5832_v61  ;;  %2733 = vrot.lane.b32.xlu1 %v2724_v60, %s4389_s17  ;;  %v2786_v30 = vrot.slane %v4155_v26, 4  ;;  %v5975_v56 = vpop.permute.xlu1 %2973 }
 0x23e   : > { %v2787_v13 = vrot.slane %v4156_v41, 4  ;;  %2760 = vrot.lane.b32.xlu0 %v4153_v48, %s4388_s30  ;;  %v5973_v41 = vpop.permute.xlu0 %2968 }
 0x23f   : > { %v2788_v33 = vrot.slane %v4157_v1, 4 }
 0x240   : > { %v2793_v63 = vsel %vm2722_vm0, %v2785_v11, %v2787_v13 }
 0x241   : > { %v2644_v50 = vpop.f32.mrb[12].mxu0  ;;  %2758 = vrot.lane.b32.xlu1 %v4154_v10, %s4388_s30  ;;  %v2794_v0 = vsel %vm2722_vm0, %v2786_v30, %v2788_v33 }
 0x242   : > { %v5900_v8 = vadd.f32 %v2644_v50, %v5834_v62  ;;  %v2646_v61 = vpop.f32.mrb[13].mxu0  ;;  %2731 = vrot.lane.b32.xlu0 %v2726_v58, %s4389_s17 }
 0x243   : > { %v5904_v7 = vadd.f32 %v2646_v61, %v5836_v9  ;;  %v2648_v12 = vpop.f32.mrb[14].mxu0 }
 0x244   : > { %v2789_v32 = vrot.slane %v5900_v8, 4  ;;  %v5908_v54 = vadd.f32 %v2648_v12, %v5838_v14  ;;  %v2650_v59 = vpop.f32.mrb[15].mxu0 }
 0x245   : > { %v5911_v3 = vadd.f32 %v2650_v59, %v5840_v15  ;;  %2762 = vrot.lane.b32.xlu1 %v4155_v26, %s4388_s30  ;;  %v2790_v62 = vrot.slane %v5904_v7, 4  ;;  %v3368_v26 = vld [vmem:[%s6663_s5 + $0x8] sm:$0xf] }
 0x246   : > { %2795 = vrot.lane.b32.xlu0 %v2793_v63, %s4390_s13  ;;  %v2791_v9 = vsel %vm2722_vm0, %v2787_v13, %v2789_v32 }
 0x247   : > { %v2792_v27 = vsel %vm2722_vm0, %v2788_v33, %v2790_v62  ;;  %v2829_v4 = vrot.slane %v5911_v3, 4 }
 0x249   : > { %v2654_v6 = vpop.f32.mrb[16].mxu0  ;;  %2797 = vrot.lane.b32.xlu1 %v2791_v9, %s4390_s13  ;;  %v5982_v9 = vand.u32 127, %v2691_v19 }
 0x24a   : > { %v4162_v14 = vadd.f32 %v2654_v6, %v5842_v16  ;;  %v2656_v18 = vpop.f32.mrb[17].mxu0  ;;  %2799 = vrot.lane.b32.xlu0 %v2794_v0, %s4390_s13  ;;  %v2828_v16 = vrot.slane %v5908_v54, 4  ;;  %v5985_v6 = vsub.s32 0, %v5870_v25 }
 0x24b   : > { %v4163_v15 = vadd.f32 %v2656_v18, %v5844_v49  ;;  %v2658_v21 = vpop.f32.mrb[18].mxu0  ;;  %v5990_v18 = vld [vmem:[%s6658_s0] sm:$0xff]  ;;  %vm2693_vm1 = vcmp.lt.s32.totalorder %v5982_v9, 17  ;;  %vm2735_vm2 = vcmp.lt.s32.totalorder %v5982_v9, 16  ;;  %vm2764_vm3 = vcmp.lt.s32.totalorder %v5982_v9, 15 }
 0x24c   : > { %v4164_v22 = vadd.f32 %v2658_v21, %v5846_v17  ;;  %v2660_v23 = vpop.f32.mrb[19].mxu0  ;;  %v2830_v31 = vrot.slane %v4162_v14, 4  ;;  %vm2803_vm4 = vcmp.lt.s32.totalorder %v5982_v9, 1  ;;  %vm2846_vm5 = vcmp.lt.s32.totalorder %v5982_v9, 127 }
 0x24d   : > { %v4165_v29 = vadd.f32 %v2660_v23, %v5848_v51  ;;  %2801 = vrot.lane.b32.xlu1 %v2792_v27, %s4390_s13  ;;  %v2831_v35 = vrot.slane %v4163_v15, 4  ;;  %v2742_v15 = vsub.s32 1, %v5870_v25  ;;  %v2771_v23 = vsub.s32 2, %v5870_v25 }
 0x24e   : > { %v2832_v34 = vrot.slane %v4164_v22, 4  ;;  %2867 = vrot.lane.b32.xlu0 %v4164_v22, %s4391_s14  ;;  %v2836_v51 = vsel %vm2722_vm0, %v2828_v16, %v2830_v31  ;;  %v5996_v22 = vld [vmem:[%s6658_s0 + $0x8] sm:$0xff]  ;;  %v2810_v27 = vsub.s32 3, %v5870_v25  ;;  %vm2875_vm6 = vcmp.lt.s32.totalorder %v5982_v9, 113 }
 0x24f   : > { %v2833_v49 = vrot.slane %v4165_v29, 4  ;;  %v2837_v52 = vsel %vm2722_vm0, %v2829_v4, %v2831_v35  ;;  %v6011_v16 = vrot.slane %v5990_v18, %v2742_v15  ;;  %vm2914_vm7 = vcmp.lt.s32.totalorder %v5982_v9, 112 }
 0x250   : > { %v2834_v17 = vsel %vm2722_vm0, %v2830_v31, %v2832_v34  ;;  %v6003_v31 = vrot.slane %v5990_v18, %v5985_v6  ;;  %v6007_v34 = vrot.slane %v5996_v22, %v5985_v6  ;;  %vm2943_vm8 = vcmp.lt.s32.totalorder %v5982_v9, 111 }
 0x251   : > { %v2664_v37 = vpop.f32.mrb[20].mxu0  ;;  %2840 = vrot.lane.b32.xlu1 %v2834_v17, %s4392_s15  ;;  %v2835_v40 = vsel %vm2722_vm0, %v2831_v35, %v2833_v49  ;;  %v6014_v35 = vrot.slane %v5996_v22, %v2742_v15  ;;  %v6020_v17 = vrot.slane %v5990_v18, %v2771_v23 }
 0x252   : > { %v4166_v42 = vadd.f32 %v2664_v37, %v5850_v36  ;;  %v2666_v43 = vpop.f32.mrb[21].mxu0  ;;  %2838 = vrot.lane.b32.xlu0 %v2836_v51, %s4392_s15  ;;  %v2901_v36 = vrot.slane %v5860_v28, 4  ;;  %v6023_v37 = vrot.slane %v5996_v22, %v2771_v23  ;;  %v2853_v51 = vsub.s32 5, %v5870_v25 }
 0x253   : > { %v4167_v44 = vadd.f32 %v2666_v43, %v5852_v38  ;;  %v2668_v47 = vpop.f32.mrb[22].mxu0  ;;  %v6032_v43 = vrot.slane %v5990_v18, %v2810_v27 }
 0x254   : > { %v4168_v48 = vadd.f32 %v2668_v47, %v5854_v45  ;;  %v2670_v55 = vpop.f32.mrb[23].mxu0  ;;  %v2896_v58 = vrot.slane %v4166_v42, 4 }
 0x255   : > { %v4169_v57 = vadd.f32 %v2670_v55, %v5856_v53  ;;  %2844 = vrot.lane.b32.xlu1 %v2835_v40, %s4392_s15  ;;  %v2897_v60 = vrot.slane %v4167_v44, 4 }
 0x256   : > { %v2898_v5 = vrot.slane %v4168_v48, 4  ;;  %2871 = vrot.lane.b32.xlu0 %v4165_v29, %s4391_s14  ;;  %v6039_v48 = vrot.slane %v5996_v22, %v2810_v27 }
 0x257   : > { %v2899_v38 = vrot.slane %v4169_v57, 4 }
 0x258   : > { %v2904_v45 = vsel %vm2722_vm0, %v2896_v58, %v2898_v5  ;;  %v2902_v53 = vsel %vm2722_vm0, %v2898_v5, %v2900_v2 }
 0x259   : > { %2869 = vrot.lane.b32.xlu1 %v4166_v42, %s4391_s14  ;;  %v2905_v10 = vsel %vm2722_vm0, %v2897_v60, %v2899_v38  ;;  %v2903_v24 = vsel %vm2722_vm0, %v2899_v38, %v2901_v36  ;;  %v6053_v38 = vrot.slane %v5990_v18, %v2853_v51 }
 0x25a   : > { %2842 = vrot.lane.b32.xlu0 %v2837_v52, %s4392_s15 }
 0x25d   : > { %2873 = vrot.lane.b32.xlu1 %v4167_v44, %s4391_s14 }
 0x25e   : > { %2906 = vrot.lane.b32.xlu0 %v2904_v45, %s4393_s16  ;;  %v2882_v45 = vsub.s32 6, %v5870_v25 }
 0x261   : > { %2908 = vrot.lane.b32.xlu1 %v2902_v53, %s4393_s16 }
 0x262   : > { %2910 = vrot.lane.b32.xlu0 %v2905_v10, %s4393_s16 }
 0x265   : > { %2912 = vrot.lane.b32.xlu1 %v2903_v24, %s4393_s16 }
 0x266   : > { %2941 = vrot.lane.b32.xlu0 %v5864_v46, %s4386_s28 }
 0x269   : > { %2939 = vrot.lane.b32.xlu1 %v5860_v28, %s4386_s28 }
 0x26a   : > { %3376 = vperm.xlu0 %4360, %v3368_v26  }
 0x26d   : > { %3371 = vperm.xlu1 %4361, %v3367_v39  }
 0x290   : > { %v5979_v46 = vpop.permute.xlu1 %2935 }
 0x292   : > { %v5977_v1 = vpop.permute.xlu0 %2937 }
 0x29e   : > { %v2684_v11 = vpop.permute.xlu0 %2683 }
 0x29f   : > { %v2688_v13 = vpop.permute.xlu1 %2687 }
 0x2a0   : > { %v2694_v40 = vsel %vm2693_vm1, %v2684_v11, %v2688_v13  ;;  %v2696_v42 = vsel %vm2693_vm1, %v2688_v13, %v2684_v11 }
 0x2a1   : > { %v2706_v4 = vmul.f32 %v6003_v31, %v2696_v42  ;;  %v2707_v60 = vmul.f32 %v6007_v34, %v2694_v40 }
 0x2a2   : > { %v2686_v30 = vpop.permute.xlu0 %2685 }
 0x2a3   : > { %v2690_v33 = vpop.permute.xlu1 %2689 }
 0x2a4   : > { %v2695_v57 = vsel %vm2693_vm1, %v2686_v30, %v2690_v33  ;;  %v2697_v2 = vsel %vm2693_vm1, %v2690_v33, %v2686_v30 }
 0x2a5   : > { %v2708_v26 = vmul.f32 %v6003_v31, %v2697_v2  ;;  %v2709_v39 = vmul.f32 %v6007_v34, %v2695_v57 }
 0x2a8   : > { %v2757_v63 = vpop.permute.xlu0 %2756 }
 0x2ab   : > { %v2730_v28 = vpop.permute.xlu1 %2729 }
 0x2ac   : > { %v2728_v50 = vpop.permute.xlu0 %2727 }
 0x2af   : > { %v2734_v0 = vpop.permute.xlu1 %2733 }
 0x2b0   : > { %v2761_v61 = vpop.permute.xlu0 %2760  ;;  %v2737_v58 = vsel %vm2735_vm2, %v2730_v28, %v2734_v0  ;;  %v2739_v5 = vsel %vm2735_vm2, %v2734_v0, %v2730_v28 }
 0x2b1   : > { %v2750_v11 = vmul.f32 %v6011_v16, %v2739_v5  ;;  %v2751_v13 = vmul.f32 %v6014_v35, %v2737_v58  ;;  %v2765_v33 = vsel %vm2764_vm3, %v2757_v63, %v2761_v61  ;;  %v2767_v28 = vsel %vm2764_vm3, %v2761_v61, %v2757_v63 }
 0x2b2   : > { %v6081_v63 = vrot.slane %v5996_v22, %v2853_v51  ;;  %v2778_v57 = vmul.f32 %v6023_v37, %v2765_v33  ;;  %v6091_v5 = vrot.slane %v5990_v18, %v2882_v45 }
 0x2b3   : > { %v2759_v12 = vpop.permute.xlu1 %2758  ;;  %v2754_v61 = vadd.f32 %v2750_v11, %v2708_v26 }
 0x2b4   : > { %v2732_v32 = vpop.permute.xlu0 %2731 }
 0x2b5   : > { %v2736_v44 = vsel %vm2735_vm2, %v2728_v50, %v2732_v32  ;;  %v2738_v47 = vsel %vm2735_vm2, %v2732_v32, %v2728_v50 }
 0x2b6   : > { %v2748_v53 = vmul.f32 %v6011_v16, %v2738_v47  ;;  %v2749_v52 = vmul.f32 %v6014_v35, %v2736_v44  ;;  %v2777_v47 = vmul.f32 %v6020_v17, %v2767_v28 }
 0x2b7   : > { %v2763_v59 = vpop.permute.xlu1 %2762 }
 0x2b8   : > { %v2796_v62 = vpop.permute.xlu0 %2795  ;;  %v2766_v10 = vsel %vm2764_vm3, %v2759_v12, %v2763_v59  ;;  %v2768_v24 = vsel %vm2764_vm3, %v2763_v59, %v2759_v12  ;;  %v2752_v27 = vadd.f32 %v2748_v53, %v2706_v4  ;;  %v2753_v40 = vadd.f32 %v2749_v52, %v2707_v60 }
 0x2b9   : > { %v2779_v32 = vmul.f32 %v6020_v17, %v2768_v24  ;;  %v2780_v59 = vmul.f32 %v6023_v37, %v2766_v10  ;;  %v2921_v4 = vsub.s32 7, %v5870_v25 }
 0x2ba   : > { %v2781_v60 = vadd.f32 %v2777_v47, %v2752_v27  ;;  %v2782_v53 = vadd.f32 %v2778_v57, %v2753_v40 }
 0x2bb   : > { %v2798_v14 = vpop.permute.xlu1 %2797  ;;  %v2783_v51 = vadd.f32 %v2779_v32, %v2754_v61  ;;  %v6118_v27 = vrot.slane %v5996_v22, %v2921_v4 }
 0x2bc   : > { %v2800_v21 = vpop.permute.xlu0 %2799 }
 0x2bd   : > { %v2804_v15 = vsel %vm2803_vm4, %v2796_v62, %v2800_v21  ;;  %v2806_v23 = vsel %vm2803_vm4, %v2800_v21, %v2796_v62 }
 0x2be   : > { %v2816_v62 = vmul.f32 %v6032_v43, %v2806_v23  ;;  %v2817_v21 = vmul.f32 %v6039_v48, %v2804_v15  ;;  %v6115_v23 = vrot.slane %v5990_v18, %v2921_v4  ;;  %v6147_v4 = vld [vmem:[%s6658_s0 + $0x18] ss:$0 sm:$0xff] }
 0x2bf   : > { %v2802_v29 = vpop.permute.xlu1 %2801 }
 0x2c0   : > { %v6016_v49 = vpop.permute.xlu0 %2867  ;;  %v2805_v50 = vsel %vm2803_vm4, %v2798_v14, %v2802_v29  ;;  %v2807_v0 = vsel %vm2803_vm4, %v2802_v29, %v2798_v14  ;;  %v2755_v14 = vadd.f32 %v2751_v13, %v2709_v39  ;;  %v2820_v33 = vadd.f32 %v2816_v62, %v2781_v60 }
 0x2c1   : > { %v2818_v29 = vmul.f32 %v6032_v43, %v2807_v0  ;;  %v2819_v42 = vmul.f32 %v6039_v48, %v2805_v50  ;;  %v2821_v28 = vadd.f32 %v2817_v21, %v2782_v53 }
 0x2c2   : > { %v2784_v58 = vadd.f32 %v2780_v59, %v2755_v14  ;;  %v6109_v59 = vrot.slane %v5996_v22, %v2882_v45  ;;  %v2824_v22 = vadd.f32 %v5900_v8, %v2820_v33 }
 0x2c3   : > { %v2841_v55 = vpop.permute.xlu1 %2840  ;;  %v2822_v24 = vadd.f32 %v2818_v29, %v2783_v51 }
 0x2c4   : > { %v2839_v36 = vpop.permute.xlu0 %2838  ;;  %v2823_v26 = vadd.f32 %v2819_v42, %v2784_v58  ;;  %v6142_v58 = vld [vmem:[%s6658_s0 + $0x10] ss:$0 sm:$0xff] }
 0x2c5   : > { %v2826_v40 = vadd.f32 %v5908_v54, %v2822_v24 }
 0x2c6   : > { %v2827_v61 = vadd.f32 %v5911_v3, %v2823_v26 }
 0x2c7   : > { %v2845_v30 = vpop.permute.xlu1 %2844 }
 0x2c8   : > { %v2872_v12 = vpop.permute.xlu0 %2871  ;;  %v2848_v52 = vsel %vm2846_vm5, %v2841_v55, %v2845_v30  ;;  %v2850_v10 = vsel %vm2846_vm5, %v2845_v30, %v2841_v55 }
 0x2c9   : > { %v2861_v55 = vmul.f32 %v6053_v38, %v2848_v52  ;;  %v2862_v30 = vmul.f32 %v6081_v63, %v2850_v10  ;;  %v2876_v42 = vsel %vm2875_vm6, %v6016_v49, %v2872_v12  ;;  %v2878_v18 = vsel %vm2875_vm6, %v2872_v12, %v6016_v49 }
 0x2ca   : > { %v2888_v51 = vmul.f32 %v6091_v5, %v2876_v42  ;;  %v2889_v49 = vmul.f32 %v6109_v59, %v2878_v18 }
 0x2cb   : > { %v2870_v44 = vpop.permute.xlu1 %2869  ;;  %v2865_v47 = vadd.f32 %v2861_v55, %v2826_v40  ;;  %v2866_v3 = vadd.f32 %v2862_v30, %v2827_v61 }
 0x2cc   : > { %v2843_v2 = vpop.permute.xlu0 %2842 }
 0x2cd   : > { %v2847_v39 = vsel %vm2846_vm5, %v2839_v36, %v2843_v2  ;;  %v2849_v11 = vsel %vm2846_vm5, %v2843_v2, %v2839_v36 }
 0x2ce   : > { %v2859_v36 = vmul.f32 %v6053_v38, %v2847_v39  ;;  %v2860_v15 = vmul.f32 %v6081_v63, %v2849_v11 }
 0x2cf   : > { %v2874_v13 = vpop.permute.xlu1 %2873 }
 0x2d0   : > { %v2877_v50 = vsel %vm2875_vm6, %v2870_v44, %v2874_v13  ;;  %v2879_v0 = vsel %vm2875_vm6, %v2874_v13, %v2870_v44  ;;  %v2907_v32 = vpop.permute.xlu0 %2906  ;;  %v2825_v44 = vadd.f32 %v5904_v7, %v2821_v28  ;;  %v2863_v21 = vadd.f32 %v2859_v36, %v2824_v22 }
 0x2d1   : > { %v2890_v14 = vmul.f32 %v6091_v5, %v2877_v50  ;;  %v2891_v45 = vmul.f32 %v6109_v59, %v2879_v0 }
 0x2d2   : > { %v2864_v2 = vadd.f32 %v2860_v15, %v2825_v44  ;;  %v2892_v33 = vadd.f32 %v2888_v51, %v2863_v21  ;;  %v4365_v21 = vld [vmem:[%s6662_s4 + $0x18] sm:$0xff]   ;;  %v4367_v51 = vld [vmem:[%s6662_s4 + $0x28] sm:$0xff]  }
 0x2d3   : > { %v2909_v29 = vpop.permute.xlu1 %2908  ;;  %v2894_v8 = vadd.f32 %v2890_v14, %v2865_v47  ;;  %v2895_v12 = vadd.f32 %v2891_v45, %v2866_v3 }
 0x2d4   : > { %v2911_v54 = vpop.permute.xlu0 %2910  ;;  %v2893_v28 = vadd.f32 %v2889_v49, %v2864_v2  ;;  %v4366_v2 = vld [vmem:[%s6662_s4 + $0x20] sm:$0xff]   ;;  %v4368_v49 = vld [vmem:[%s6662_s4 + $0x30] sm:$0xff]  }
 0x2d5   : > { %v2915_v57 = vsel %vm2914_vm7, %v2907_v32, %v2911_v54  ;;  %v2917_v62 = vsel %vm2914_vm7, %v2911_v54, %v2907_v32 }
 0x2d6   : > { %v2927_v60 = vmul.f32 %v6115_v23, %v2915_v57  ;;  %v2928_v53 = vmul.f32 %v6118_v27, %v2917_v62  ;;  %v4362_v62 = vld [vmem:[%s6662_s4] sm:$0xff]  }
 0x2d7   : > { %v2913_v7 = vpop.permute.xlu1 %2912 }
 0x2d8   : > { %v2916_v52 = vsel %vm2914_vm7, %v2909_v29, %v2913_v7  ;;  %v2918_v10 = vsel %vm2914_vm7, %v2913_v7, %v2909_v29  ;;  %v2942_v24 = vpop.permute.xlu0 %2941  ;;  %v2931_v36 = vadd.f32 %v2927_v60, %v2892_v33  ;;  %v2932_v15 = vadd.f32 %v2928_v53, %v2893_v28 }
 0x2d9   : > { %v2929_v26 = vmul.f32 %v6115_v23, %v2916_v52  ;;  %v2930_v39 = vmul.f32 %v6118_v27, %v2918_v10  ;;  %v2945_v11 = vsel %vm2943_vm8, %v5977_v1, %v2942_v24  ;;  %v2947_v13 = vsel %vm2943_vm8, %v2942_v24, %v5977_v1 }
 0x2da   : > { %v2958_v50 = vmul.f32 %v6142_v58, %v2945_v11  ;;  %v2959_v0 = vmul.f32 %v6147_v4, %v2947_v13 }
 0x2db   : > { %v2933_v32 = vadd.f32 %v2929_v26, %v2894_v8  ;;  %v2934_v55 = vadd.f32 %v2930_v39, %v2895_v12  ;;  %v2940_v30 = vpop.permute.xlu1 %2939 }
 0x2dc   : > { %v2944_v40 = vsel %vm2943_vm8, %v5979_v46, %v2940_v30  ;;  %v2946_v61 = vsel %vm2943_vm8, %v2940_v30, %v5979_v46 }
 0x2dd   : > { %v2962_v1 = vadd.f32 %v2958_v50, %v2933_v32  ;;  %v2963_v14 = vadd.f32 %v2959_v0, %v2934_v55  ;;  %v2956_v45 = vmul.f32 %v6142_v58, %v2944_v40  ;;  %v2957_v29 = vmul.f32 %v6147_v4, %v2946_v61 }
 0x2df   : > { %v2960_v42 = vadd.f32 %v2956_v45, %v2931_v36  ;;  %v2961_v18 = vadd.f32 %v2957_v29, %v2932_v15  ;;  %v2978_v22 = vadd.f32 %v5975_v56, %v2962_v1  ;;  %v2979_v44 = vadd.f32 %v5975_v56, %v2963_v14  ;;  %v4364_v56 = vld [vmem:[%s6662_s4 + $0x10] sm:$0xff]  }
 0x2e1   : > { %v2976_v54 = vadd.f32 %v5973_v41, %v2960_v42  ;;  %v2977_v47 = vadd.f32 %v5973_v41, %v2961_v18  ;;  %v4363_v41 = vld [vmem:[%s6662_s4 + $0x8] sm:$0xff]  }
 0x2e3   : > { %v2981_v3 = vpack.c.bf16 %v2979_v44, %v2977_v47  ;;  %v2980_v57 = vpack.c.bf16 %v2978_v22, %v2976_v54 }
 0x2e5   : > { %4089 = vmatprep.subr.msk.bf16.mxu1 %vm3053_vm9, %v2981_v3  ;;  %v3055_v46 = vsel %vm3053_vm9, %v2980_v57, 0 }
 0x2e6   : > { %3061 = vmatpush1.bf16.msra.mxu1 %v3055_v46 }
 0x2e9   : > { %4090 = vmatmul.mubr.msk.bf16.vlgmr.msra.gmra.mrb[32].mxu1 %vm3031_vm10, %v4362_v62 }
 0x2ea   : > { %3102 = vmatprep.mubr.bf16.mxu1 %v4385_v20 }
 0x2f1   : > { %4091 = vmatmul.mubr.msk.bf16.gmra.mrb[36].mxu1 %vm3031_vm10, %v4363_v41 }
 0x2f2   : > { %3112 = vmatprep.mubr.bf16.mxu1 %v4385_v20 }
 0x2f9   : > { %4092 = vmatmul.mubr.msk.bf16.gmra.mrb[40].mxu1 %vm3031_vm10, %v4364_v56 }
 0x2fa   : > { %3122 = vmatprep.mubr.bf16.mxu1 %v4385_v20 }
 0x301   : > { %4093 = vmatmul.mubr.msk.bf16.gmra.mrb[44].mxu1 %vm3031_vm10, %v4365_v21 }
 0x302   : > { %3132 = vmatprep.mubr.bf16.mxu1 %v4385_v20 }
 0x309   : > { %4094 = vmatmul.mubr.msk.bf16.gmra.mrb[48].mxu1 %vm3031_vm10, %v4366_v2 }
 0x30a   : > { %3142 = vmatprep.mubr.bf16.mxu1 %v4385_v20 }
 0x311   : > { %4095 = vmatmul.mubr.msk.bf16.gmra.mrb[52].mxu1 %vm3031_vm10, %v4367_v51 }
 0x312   : > { %3152 = vmatprep.mubr.bf16.mxu1 %v4385_v20 }
 0x319   : > { %4096 = vmatmul.mubr.msk.bf16.gmra.mrb[56].mxu1 %vm3031_vm10, %v4368_v49 }
 0x31a   : > { %3460 = vmatprep.mubr.bf16.mxu1 %v4385_v20 }
 0x3bc   : > { %v3094_v8 = vpop.f32.mrb[32].mxu1 }
 0x3bd   : > { %3163 = vrot.lane.b32.xlu1 %v3094_v8, %s4387_s29  ;;  %v3096_v12 = vpop.f32.mrb[33].mxu1 }
 0x3be   : > { %v3098_v7 = vpop.f32.mrb[34].mxu1 }
 0x3bf   : > { %3165 = vrot.lane.b32.xlu0 %v3098_v7, %s4387_s29  ;;  %v3100_v60 = vpop.f32.mrb[35].mxu1  ;;  %v3183_v52 = vrot.slane %v3098_v7, 4 }
 0x3c0   : > { %v3184_v26 = vrot.slane %v3100_v60, 4 }
 0x3c1   : > { %3167 = vrot.lane.b32.xlu1 %v3096_v12, %s4387_s29 }
 0x3c3   : > { %3169 = vrot.lane.b32.xlu0 %v3100_v60, %s4387_s29 }
 0x3c4   : > { %v3104_v53 = vpop.f32.mrb[36].mxu1 }
 0x3c5   : > { %v3185_v10 = vrot.slane %v3104_v53, 4  ;;  %v3106_v24 = vpop.f32.mrb[37].mxu1 }
 0x3c6   : > { %v3186_v39 = vrot.slane %v3106_v24, 4  ;;  %v3108_v11 = vpop.f32.mrb[38].mxu1 }
 0x3c7   : > { %v3187_v13 = vrot.slane %v3108_v11, 4  ;;  %3213 = vrot.lane.b32.xlu1 %v3108_v11, %s4388_s30  ;;  %v3110_v33 = vpop.f32.mrb[39].mxu1  ;;  %v3191_v28 = vsel %vm2722_vm0, %v3183_v52, %v3185_v10 }
 0x3c8   : > { %v3188_v50 = vrot.slane %v3110_v33, 4  ;;  %v3192_v0 = vsel %vm2722_vm0, %v3184_v26, %v3186_v39 }
 0x3c9   : > { %v3189_v32 = vsel %vm2722_vm0, %v3185_v10, %v3187_v13 }
 0x3ca   : > { %3195 = vrot.lane.b32.xlu0 %v3189_v32, %s4389_s17  ;;  %v3190_v55 = vsel %vm2722_vm0, %v3186_v39, %v3188_v50 }
 0x3cb   : > { %3193 = vrot.lane.b32.xlu1 %v3191_v28, %s4389_s17 }
 0x3cc   : > { %v3114_v30 = vpop.f32.mrb[40].mxu1 }
 0x3cd   : > { %v3116_v36 = vpop.f32.mrb[41].mxu1  ;;  %v3233_v40 = vrot.slane %v3114_v30, 4 }
 0x3ce   : > { %3199 = vrot.lane.b32.xlu0 %v3190_v55, %s4389_s17  ;;  %v3118_v15 = vpop.f32.mrb[42].mxu1  ;;  %v3234_v14 = vrot.slane %v3116_v36, 4 }
 0x3cf   : > { %v3235_v61 = vrot.slane %v3118_v15, 4  ;;  %3217 = vrot.lane.b32.xlu1 %v3110_v33, %s4388_s30  ;;  %v3120_v1 = vpop.f32.mrb[43].mxu1 }
 0x3d0   : > { %v3236_v45 = vrot.slane %v3120_v1, 4 }
 0x3d1   : > { %v3241_v29 = vsel %vm2722_vm0, %v3233_v40, %v3235_v61 }
 0x3d2   : > { %3215 = vrot.lane.b32.xlu0 %v3114_v30, %s4388_s30  ;;  %v3242_v42 = vsel %vm2722_vm0, %v3234_v14, %v3236_v45 }
 0x3d3   : > { %3197 = vrot.lane.b32.xlu1 %v3192_v0, %s4389_s17 }
 0x3d4   : > { %v6237_v18 = vpop.f32.mrb[44].mxu1 }
 0x3d5   : > { %v3237_v22 = vrot.slane %v6237_v18, 4  ;;  %v6240_v44 = vpop.f32.mrb[45].mxu1 }
 0x3d6   : > { %v3238_v54 = vrot.slane %v6240_v44, 4  ;;  %3219 = vrot.lane.b32.xlu0 %v3116_v36, %s4388_s30  ;;  %v6244_v47 = vpop.f32.mrb[46].mxu1 }
 0x3d7   : > { %3243 = vrot.lane.b32.xlu1 %v3241_v29, %s4390_s13  ;;  %v6247_v3 = vpop.f32.mrb[47].mxu1  ;;  %v3239_v57 = vsel %vm2722_vm0, %v3235_v61, %v3237_v22  ;;  %v3267_v41 = vrot.slane %v6244_v47, 4  ;;  %v6293_v29 = vpop.permute.xlu1 %3371 }
 0x3d8   : > { %v3240_v46 = vsel %vm2722_vm0, %v3236_v45, %v3238_v54  ;;  %v3268_v2 = vrot.slane %v6247_v3, 4  ;;  %v3619_v45 = vld [vmem:[%s6665_s7] sm:$0x3f] }
 0x3da   : > { %3245 = vrot.lane.b32.xlu0 %v3239_v57, %s4390_s13 }
 0x3db   : > { %3247 = vrot.lane.b32.xlu1 %v3242_v42, %s4390_s13  ;;  %v6295_v42 = vpop.permute.xlu0 %3376 }
 0x3dc   : > { %v3134_v62 = vpop.f32.mrb[48].mxu1 }
 0x3dd   : > { %v3269_v56 = vrot.slane %v3134_v62, 4  ;;  %v3136_v21 = vpop.f32.mrb[49].mxu1 }
 0x3de   : > { %v3270_v51 = vrot.slane %v3136_v21, 4  ;;  %3249 = vrot.lane.b32.xlu0 %v3240_v46, %s4390_s13  ;;  %v3138_v49 = vpop.f32.mrb[50].mxu1 }
 0x3df   : > { %v3271_v8 = vrot.slane %v3138_v49, 4  ;;  %3297 = vrot.lane.b32.xlu1 %v3138_v49, %s4391_s14  ;;  %v3140_v12 = vpop.f32.mrb[51].mxu1  ;;  %v3275_v7 = vsel %vm2722_vm0, %v3267_v41, %v3269_v56 }
 0x3e0   : > { %v3272_v60 = vrot.slane %v3140_v12, 4  ;;  %v3276_v53 = vsel %vm2722_vm0, %v3268_v2, %v3270_v51 }
 0x3e1   : > { %v3273_v52 = vsel %vm2722_vm0, %v3269_v56, %v3271_v8 }
 0x3e2   : > { %3279 = vrot.lane.b32.xlu0 %v3273_v52, %s4392_s15  ;;  %v3274_v10 = vsel %vm2722_vm0, %v3270_v51, %v3272_v60 }
 0x3e3   : > { %3277 = vrot.lane.b32.xlu1 %v3275_v7, %s4392_s15 }
 0x3e4   : > { %v3144_v24 = vpop.f32.mrb[52].mxu1 }
 0x3e5   : > { %v3317_v26 = vrot.slane %v3144_v24, 4  ;;  %v3146_v39 = vpop.f32.mrb[53].mxu1 }
 0x3e6   : > { %v3318_v11 = vrot.slane %v3146_v39, 4  ;;  %3283 = vrot.lane.b32.xlu0 %v3274_v10, %s4392_s15  ;;  %v3148_v13 = vpop.f32.mrb[54].mxu1 }
 0x3e7   : > { %v3319_v33 = vrot.slane %v3148_v13, 4  ;;  %3301 = vrot.lane.b32.xlu1 %v3140_v12, %s4391_s14  ;;  %v3150_v28 = vpop.f32.mrb[55].mxu1 }
 0x3e8   : > { %v3320_v50 = vrot.slane %v3150_v28, 4 }
 0x3e9   : > { %v3325_v0 = vsel %vm2722_vm0, %v3317_v26, %v3319_v33 }
 0x3ea   : > { %3299 = vrot.lane.b32.xlu0 %v3144_v24, %s4391_s14  ;;  %v3326_v32 = vsel %vm2722_vm0, %v3318_v11, %v3320_v50 }
 0x3eb   : > { %3281 = vrot.lane.b32.xlu1 %v3276_v53, %s4392_s15 }
 0x3ec   : > { %v3154_v55 = vpop.f32.mrb[56].mxu1 }
 0x3ed   : > { %v3321_v30 = vrot.slane %v3154_v55, 4  ;;  %v3156_v36 = vpop.f32.mrb[57].mxu1 }
 0x3ee   : > { %v3322_v15 = vrot.slane %v3156_v36, 4  ;;  %3303 = vrot.lane.b32.xlu0 %v3146_v39, %s4391_s14  ;;  %v3158_v40 = vpop.f32.mrb[58].mxu1 }
 0x3ef   : > { %3327 = vrot.lane.b32.xlu1 %v3325_v0, %s4393_s16  ;;  %v3160_v61 = vpop.f32.mrb[59].mxu1  ;;  %v3323_v1 = vsel %vm2722_vm0, %v3319_v33, %v3321_v30 }
 0x3f0   : > { %v3324_v14 = vsel %vm2722_vm0, %v3320_v50, %v3322_v15 }
 0x3f2   : > { %3349 = vrot.lane.b32.xlu0 %v3158_v40, %s4386_s28 }
 0x3f3   : > { %3331 = vrot.lane.b32.xlu1 %v3326_v32, %s4393_s16 }
 0x3f6   : > { %3329 = vrot.lane.b32.xlu0 %v3323_v1, %s4393_s16 }
 0x3f7   : > { %3347 = vrot.lane.b32.xlu1 %v3154_v55, %s4386_s28 }
 0x3fa   : > { %3333 = vrot.lane.b32.xlu0 %v3324_v14, %s4393_s16 }
 0x3fb   : > { %3351 = vrot.lane.b32.xlu1 %v3156_v36, %s4386_s28 }
 0x3fe   : > { %3353 = vrot.lane.b32.xlu0 %v3160_v61, %s4386_s28 }
 0x3ff   : > { %3622 = vperm.xlu1 %4361, %v3619_v45  }
 0x42f   : > { %v3164_v22 = vpop.permute.xlu1 %3163 }
 0x431   : > { %v3166_v54 = vpop.permute.xlu0 %3165 }
 0x433   : > { %v3168_v57 = vpop.permute.xlu1 %3167 }
 0x434   : > { %v3171_v11 = vsel %vm2693_vm1, %v3164_v22, %v3168_v57  ;;  %v3173_v13 = vsel %vm2693_vm1, %v3168_v57, %v3164_v22 }
 0x435   : > { %v3170_v46 = vpop.permute.xlu0 %3169  ;;  %v3175_v30 = vmul.f32 %v3173_v13, %v6003_v31  ;;  %v3176_v36 = vmul.f32 %v3171_v11, %v6007_v34 }
 0x436   : > { %v3172_v15 = vsel %vm2693_vm1, %v3166_v54, %v3170_v46  ;;  %v3174_v40 = vsel %vm2693_vm1, %v3170_v46, %v3166_v54 }
 0x439   : > { %v3214_v62 = vpop.permute.xlu1 %3213 }
 0x43c   : > { %v3196_v41 = vpop.permute.xlu0 %3195 }
 0x43d   : > { %v3194_v56 = vpop.permute.xlu1 %3193 }
 0x440   : > { %v3200_v21 = vpop.permute.xlu0 %3199 }
 0x441   : > { %v3218_v2 = vpop.permute.xlu1 %3217  ;;  %v3202_v28 = vsel %vm2735_vm2, %v3196_v41, %v3200_v21  ;;  %v3204_v50 = vsel %vm2735_vm2, %v3200_v21, %v3196_v41 }
 0x442   : > { %v3221_v61 = vsel %vm2764_vm3, %v3214_v62, %v3218_v2  ;;  %v3223_v1 = vsel %vm2764_vm3, %v3218_v2, %v3214_v62  ;;  %v3207_v14 = vmul.f32 %v3204_v50, %v6011_v16  ;;  %v3208_v45 = vmul.f32 %v3202_v28, %v6014_v35 }
 0x443   : > { %v3177_v2 = vmul.f32 %v3174_v40, %v6003_v31 }
 0x444   : > { %v3216_v51 = vpop.permute.xlu0 %3215 }
 0x445   : > { %v3198_v49 = vpop.permute.xlu1 %3197  ;;  %v3211_v50 = vadd.f32 %v3207_v14, %v3177_v2 }
 0x446   : > { %v3201_v26 = vsel %vm2735_vm2, %v3194_v56, %v3198_v49  ;;  %v3203_v39 = vsel %vm2735_vm2, %v3198_v49, %v3194_v56  ;;  %v3178_v49 = vmul.f32 %v3172_v15, %v6007_v34 }
 0x447   : > { %v3205_v0 = vmul.f32 %v3203_v39, %v6011_v16  ;;  %v3206_v32 = vmul.f32 %v3201_v26, %v6014_v35  ;;  %v3225_v26 = vmul.f32 %v3223_v1, %v6020_v17  ;;  %v3226_v39 = vmul.f32 %v3221_v61, %v6023_v37 }
 0x448   : > { %v3220_v8 = vpop.permute.xlu0 %3219 }
 0x449   : > { %v3244_v12 = vpop.permute.xlu1 %3243  ;;  %v3209_v56 = vadd.f32 %v3205_v0, %v3175_v30  ;;  %v3210_v21 = vadd.f32 %v3206_v32, %v3176_v36  ;;  %v3222_v54 = vsel %vm2764_vm3, %v3216_v51, %v3220_v8  ;;  %v3224_v46 = vsel %vm2764_vm3, %v3220_v8, %v3216_v51 }
 0x44a   : > { %v3227_v51 = vmul.f32 %v3224_v46, %v6020_v17  ;;  %v3228_v8 = vmul.f32 %v3222_v54, %v6023_v37  ;;  %v3212_v0 = vadd.f32 %v3208_v45, %v3178_v49 }
 0x44b   : > { %v3229_v32 = vadd.f32 %v3225_v26, %v3209_v56  ;;  %v3230_v30 = vadd.f32 %v3226_v39, %v3210_v21 }
 0x44c   : > { %v3246_v7 = vpop.permute.xlu0 %3245 }
 0x44d   : > { %v3248_v60 = vpop.permute.xlu1 %3247 }
 0x44e   : > { %v3251_v22 = vsel %vm2803_vm4, %v3244_v12, %v3248_v60  ;;  %v3253_v57 = vsel %vm2803_vm4, %v3248_v60, %v3244_v12 }
 0x44f   : > { %v3255_v12 = vmul.f32 %v3253_v57, %v6032_v43  ;;  %v3256_v60 = vmul.f32 %v3251_v22, %v6039_v48  ;;  %v3231_v22 = vadd.f32 %v3227_v51, %v3211_v50  ;;  %v3232_v57 = vadd.f32 %v3228_v8, %v3212_v0 }
 0x450   : > { %v3250_v53 = vpop.permute.xlu0 %3249 }
 0x451   : > { %v6297_v52 = vpop.permute.xlu1 %3297  ;;  %v3252_v11 = vsel %vm2803_vm4, %v3246_v7, %v3250_v53  ;;  %v3254_v13 = vsel %vm2803_vm4, %v3250_v53, %v3246_v7  ;;  %v3259_v53 = vadd.f32 %v3255_v12, %v3229_v32  ;;  %v3260_v1 = vadd.f32 %v3256_v60, %v3230_v30 }
 0x452   : > { %v3257_v15 = vmul.f32 %v3254_v13, %v6032_v43  ;;  %v3258_v40 = vmul.f32 %v3252_v11, %v6039_v48 }
 0x453   : > { %v3263_v26 = vadd.f32 %v3259_v53, %v6237_v18  ;;  %v3264_v39 = vadd.f32 %v3260_v1, %v6240_v44 }
 0x454   : > { %v3280_v10 = vpop.permute.xlu0 %3279  ;;  %v3261_v2 = vadd.f32 %v3257_v15, %v3231_v22  ;;  %v3262_v49 = vadd.f32 %v3258_v40, %v3232_v57 }
 0x455   : > { %v3278_v24 = vpop.permute.xlu1 %3277 }
 0x456   : > { %v3265_v50 = vadd.f32 %v3261_v2, %v6244_v47 }
 0x458   : > { %v3284_v33 = vpop.permute.xlu0 %3283 }
 0x459   : > { %v3302_v55 = vpop.permute.xlu1 %3301  ;;  %v3286_v14 = vsel %vm2846_vm5, %v3280_v10, %v3284_v33  ;;  %v3288_v45 = vsel %vm2846_vm5, %v3284_v33, %v3280_v10 }
 0x45a   : > { %v3305_v10 = vsel %vm2875_vm6, %v6297_v52, %v3302_v55  ;;  %v3307_v33 = vsel %vm2875_vm6, %v3302_v55, %v6297_v52  ;;  %v3266_v52 = vadd.f32 %v3262_v49, %v6247_v3 }
 0x45b   : > { %v3309_v55 = vmul.f32 %v3305_v10, %v6091_v5  ;;  %v3310_v0 = vmul.f32 %v3307_v33, %v6109_v59 }
 0x45c   : > { %v3300_v41 = vpop.permute.xlu0 %3299 }
 0x45d   : > { %v3282_v62 = vpop.permute.xlu1 %3281 }
 0x45e   : > { %v3285_v61 = vsel %vm2846_vm5, %v3278_v24, %v3282_v62  ;;  %v3287_v7 = vsel %vm2846_vm5, %v3282_v62, %v3278_v24  ;;  %v3291_v24 = vmul.f32 %v3286_v14, %v6053_v38  ;;  %v3292_v62 = vmul.f32 %v3288_v45, %v6081_v63 }
 0x45f   : > { %v3289_v21 = vmul.f32 %v3285_v61, %v6053_v38  ;;  %v3290_v54 = vmul.f32 %v3287_v7, %v6081_v63 }
 0x460   : > { %v3304_v28 = vpop.permute.xlu0 %3303  ;;  %v3295_v32 = vadd.f32 %v3291_v24, %v3265_v50  ;;  %v3296_v30 = vadd.f32 %v3292_v62, %v3266_v52 }
 0x461   : > { %v3328_v36 = vpop.permute.xlu1 %3327  ;;  %v3306_v12 = vsel %vm2875_vm6, %v3300_v41, %v3304_v28  ;;  %v3308_v60 = vsel %vm2875_vm6, %v3304_v28, %v3300_v41  ;;  %v3293_v13 = vadd.f32 %v3289_v21, %v3263_v26  ;;  %v3294_v51 = vadd.f32 %v3290_v54, %v3264_v39 }
 0x462   : > { %v3311_v41 = vmul.f32 %v3306_v12, %v6091_v5  ;;  %v3312_v28 = vmul.f32 %v3308_v60, %v6109_v59 }
 0x463   : > { %v3313_v61 = vadd.f32 %v3309_v55, %v3293_v13  ;;  %v3314_v7 = vadd.f32 %v3310_v0, %v3294_v51  ;;  %v4369_v0 = vld [vmem:[%s6664_s6] sm:$0xff]  }
 0x464   : > { %v3350_v56 = vpop.permute.xlu0 %3349  ;;  %v3315_v45 = vadd.f32 %v3311_v41, %v3295_v32  ;;  %v3316_v21 = vadd.f32 %v3312_v28, %v3296_v30  ;;  %v4372_v41 = vld [vmem:[%s6664_s6 + $0x18] ss:$0 sps:$4 sm:$0xff]  }
 0x465   : > { %v3332_v46 = vpop.permute.xlu1 %3331 }
 0x466   : > { %v3335_v18 = vsel %vm2914_vm7, %v3328_v36, %v3332_v46  ;;  %v3337_v44 = vsel %vm2914_vm7, %v3332_v46, %v3328_v36 }
 0x467   : > { %v3339_v15 = vmul.f32 %v3335_v18, %v6115_v23  ;;  %v3340_v40 = vmul.f32 %v3337_v44, %v6118_v27 }
 0x468   : > { %v3330_v11 = vpop.permute.xlu0 %3329 }
 0x469   : > { %v3348_v8 = vpop.permute.xlu1 %3347  ;;  %v3343_v2 = vadd.f32 %v3339_v15, %v3313_v61  ;;  %v3344_v49 = vadd.f32 %v3340_v40, %v3314_v7 }
 0x46c   : > { %v3334_v36 = vpop.permute.xlu0 %3333 }
 0x46d   : > { %v3336_v47 = vsel %vm2914_vm7, %v3330_v11, %v3334_v36  ;;  %v3338_v3 = vsel %vm2914_vm7, %v3334_v36, %v3330_v11  ;;  %v3352_v53 = vpop.permute.xlu1 %3351 }
 0x46e   : > { %v3341_v1 = vmul.f32 %v3336_v47, %v6115_v23  ;;  %v3342_v22 = vmul.f32 %v3338_v3, %v6118_v27  ;;  %v3355_v57 = vsel %vm2943_vm8, %v3348_v8, %v3352_v53  ;;  %v3357_v14 = vsel %vm2943_vm8, %v3352_v53, %v3348_v8 }
 0x46f   : > { %v3359_v54 = vmul.f32 %v6142_v58, %v3355_v57  ;;  %v3360_v46 = vmul.f32 %v6147_v4, %v3357_v14 }
 0x470   : > { %v3354_v24 = vpop.permute.xlu0 %3353  ;;  %v3345_v62 = vadd.f32 %v3341_v1, %v3315_v45  ;;  %v3346_v26 = vadd.f32 %v3342_v22, %v3316_v21 }
 0x471   : > { %v3356_v39 = vsel %vm2943_vm8, %v3350_v56, %v3354_v24  ;;  %v3358_v10 = vsel %vm2943_vm8, %v3354_v24, %v3350_v56  ;;  %v3363_v33 = vadd.f32 %v3359_v54, %v3343_v2  ;;  %v3364_v12 = vadd.f32 %v3360_v46, %v3344_v49 }
 0x472   : > { %v3361_v60 = vmul.f32 %v6142_v58, %v3356_v39  ;;  %v3362_v11 = vmul.f32 %v6147_v4, %v3358_v10 }
 0x473   : > { %v3379_v18 = vadd.f32 %v6293_v29, %v3363_v33  ;;  %v3380_v44 = vadd.f32 %v6293_v29, %v3364_v12  ;;  %v4370_v29 = vld [vmem:[%s6664_s6 + $0x8] sm:$0xff]  }
 0x474   : > { %v3365_v13 = vadd.f32 %v3361_v60, %v3345_v62  ;;  %v3366_v51 = vadd.f32 %v3362_v11, %v3346_v26 }
 0x476   : > { %v3381_v8 = vadd.f32 %v6295_v42, %v3365_v13  ;;  %v3382_v50 = vadd.f32 %v6295_v42, %v3366_v51  ;;  %v4371_v42 = vld [vmem:[%s6664_s6 + $0x10] sm:$0xff]  }
 0x478   : > { %v3384_v52 = vpack.c.bf16 %v3382_v50, %v3380_v44  ;;  %v3383_v55 = vpack.c.bf16 %v3381_v8, %v3379_v18 }
 0x47a   : > { %4101 = vmatprep.subr.msk.bf16.mxu1 %vm3053_vm9, %v3384_v52  ;;  %v3423_v56 = vsel %vm3053_vm9, %v3383_v55, 0  ;;  %vm3759_vm9 = vcmp.lt.s32.totalorder %v5870_v25, 7 }
 0x47b   : > { %3429 = vmatpush1.bf16.msra.mxu1 %v3423_v56 }
 0x47e   : > { %4102 = vmatmul.mubr.msk.bf16.vlgmr.msra.gmra.mrb[60].mxu1 %vm3031_vm10, %v4369_v0 }
 0x47f   : > { %3470 = vmatprep.mubr.bf16.mxu1 %v4385_v20 }
 0x486   : > { %4103 = vmatmul.mubr.msk.bf16.gmra.mrb[64].mxu1 %vm3031_vm10, %v4370_v29 }
 0x487   : > { %3480 = vmatprep.mubr.bf16.mxu1 %v4385_v20 }
 0x48e   : > { %4104 = vmatmul.mubr.msk.bf16.gmra.mrb[68].mxu1 %vm3031_vm10, %v4371_v42 }
 0x48f   : > { %3490 = vmatprep.mubr.bf16.mxu1 %v4385_v20 }
 0x496   : > { %4105 = vmatmul.mubr.msk.bf16.gmra.mrb[72].mxu1 %vm3031_vm10, %v4372_v41  ;;  %vm3784_vm10 = vcmp.lt.s32.totalorder %v5870_v25, 1 }
 0x497   : > { %3691 = vmatprep.mubr.bf16.mxu1 %v4385_v20 }
 0x551   : > { %v3462_v28 = vpop.f32.mrb[60].mxu1 }
 0x552   : > { %v3464_v32 = vpop.f32.mrb[61].mxu1  ;;  %3499 = vrot.lane.b32.xlu1 %v3462_v28, %s4387_s29  ;;  %v3509_v15 = vrot.slane %v3462_v28, 6 }
 0x553   : > { %v3466_v30 = vpop.f32.mrb[62].mxu1  ;;  %3501 = vrot.lane.b32.xlu0 %v3464_v32, %s4387_s29  ;;  %v3510_v61 = vrot.slane %v3464_v32, 6 }
 0x554   : > { %v3511_v40 = vrot.slane %v3466_v30, 6  ;;  %v3468_v36 = vpop.f32.mrb[63].mxu1  ;;  %v3526_v1 = vrot.slane %v3466_v30, 4 }
 0x555   : > { %v3512_v7 = vrot.slane %v3468_v36, 6  ;;  %v3527_v14 = vrot.slane %v3468_v36, 4 }
 0x556   : > { %v3514_v47 = vsel %vm3513_vm11, %v3509_v15, %v3511_v40 }
 0x557   : > { %3516 = vrot.lane.b32.xlu1 %v3514_v47, %s4389_s17  ;;  %v3515_v3 = vsel %vm3513_vm11, %v3510_v61, %v3512_v7 }
 0x558   : > { %3518 = vrot.lane.b32.xlu0 %v3515_v3, %s4389_s17  ;;  %v3840_v3 = vld [vmem:[%s6667_s9] sm:$0x7] }
 0x559   : > { %v3472_v53 = vpop.f32.mrb[64].mxu1 }
 0x55a   : > { %v3528_v22 = vrot.slane %v3472_v53, 4  ;;  %v3474_v57 = vpop.f32.mrb[65].mxu1  ;;  %v3542_v54 = vrot.slane %v3472_v53, 2  ;;  %v6480_v53 = vpop.permute.xlu1 %3622 }
 0x55b   : > { %v3529_v45 = vrot.slane %v3474_v57, 4  ;;  %v6436_v21 = vpop.f32.mrb[66].mxu1  ;;  %v3543_v24 = vrot.slane %v3474_v57, 2 }
 0x55c   : > { %v3544_v46 = vrot.slane %v6436_v21, 2  ;;  %v3530_v2 = vsel %vm2722_vm0, %v3526_v1, %v3528_v22  ;;  %v6442_v49 = vpop.f32.mrb[67].mxu1  ;;  %v3561_v12 = vrot.slane %v6436_v21, 6 }
 0x55d   : > { %3532 = vrot.lane.b32.xlu1 %v3530_v2, %s4388_s30  ;;  %v3531_v62 = vsel %vm2722_vm0, %v3527_v14, %v3529_v45  ;;  %v3545_v26 = vrot.slane %v6442_v49, 2  ;;  %v3562_v13 = vrot.slane %v6442_v49, 6 }
 0x55e   : > { %3534 = vrot.lane.b32.xlu0 %v3531_v62, %s4388_s30  ;;  %v3547_v39 = vsel %vm3546_vm12, %v3542_v54, %v3544_v46 }
 0x55f   : > { %v3548_v10 = vsel %vm3546_vm12, %v3543_v24, %v3545_v26 }
 0x561   : > { %v3482_v33 = vpop.f32.mrb[68].mxu1  ;;  %3549 = vrot.lane.b32.xlu1 %v3547_v39, %s4390_s13 }
 0x562   : > { %v3563_v60 = vrot.slane %v3482_v33, 6  ;;  %3551 = vrot.lane.b32.xlu0 %v3548_v10, %s4390_s13  ;;  %v3484_v11 = vpop.f32.mrb[69].mxu1  ;;  %v3577_v44 = vrot.slane %v3482_v33, 4 }
 0x563   : > { %v3564_v51 = vrot.slane %v3484_v11, 6  ;;  %v3486_v18 = vpop.f32.mrb[70].mxu1  ;;  %v3578_v55 = vrot.slane %v3484_v11, 4 }
 0x564   : > { %v3579_v8 = vrot.slane %v3486_v18, 4  ;;  %v3565_v50 = vsel %vm3513_vm11, %v3561_v12, %v3563_v60  ;;  %v3488_v52 = vpop.f32.mrb[71].mxu1  ;;  %v3593_v28 = vrot.slane %v3486_v18, 2 }
 0x565   : > { %3567 = vrot.lane.b32.xlu1 %v3565_v50, %s4392_s15  ;;  %v3566_v56 = vsel %vm3513_vm11, %v3562_v13, %v3564_v51  ;;  %v3580_v0 = vrot.slane %v3488_v52, 4  ;;  %v3594_v15 = vrot.slane %v3488_v52, 2 }
 0x566   : > { %3569 = vrot.lane.b32.xlu0 %v3566_v56, %s4392_s15  ;;  %v3581_v29 = vsel %vm2722_vm0, %v3577_v44, %v3579_v8 }
 0x567   : > { %v3582_v42 = vsel %vm2722_vm0, %v3578_v55, %v3580_v0 }
 0x569   : > { %v3492_v41 = vpop.f32.mrb[72].mxu1  ;;  %3583 = vrot.lane.b32.xlu1 %v3581_v29, %s4391_s14 }
 0x56a   : > { %v3595_v32 = vrot.slane %v3492_v41, 2  ;;  %3585 = vrot.lane.b32.xlu0 %v3582_v42, %s4391_s14  ;;  %v3494_v30 = vpop.f32.mrb[73].mxu1 }
 0x56b   : > { %v3596_v40 = vrot.slane %v3494_v30, 2  ;;  %v3496_v36 = vpop.f32.mrb[74].mxu1 }
 0x56c   : > { %v3597_v61 = vsel %vm3546_vm12, %v3593_v28, %v3595_v32  ;;  %v3497_v7 = vpop.f32.mrb[75].mxu1 }
 0x56d   : > { %3599 = vrot.lane.b32.xlu1 %v3597_v61, %s4393_s16  ;;  %v3598_v47 = vsel %vm3546_vm12, %v3594_v15, %v3596_v40 }
 0x56e   : > { %3601 = vrot.lane.b32.xlu0 %v3598_v47, %s4393_s16 }
 0x571   : > { %3611 = vrot.lane.b32.xlu1 %v3494_v30, %s4386_s28 }
 0x572   : > { %3609 = vrot.lane.b32.xlu0 %v3492_v41, %s4386_s28 }
 0x576   : > { %3843 = vperm.xlu0 %4360, %v3840_v3  }
 0x5c4   : > { %v3500_v1 = vpop.permute.xlu1 %3499 }
 0x5c5   : > { %v3502_v22 = vpop.permute.xlu0 %3501 }
 0x5c6   : > { %v3503_v24 = vsel %vm2693_vm1, %v3500_v1, %v3502_v22  ;;  %v3504_v62 = vsel %vm2693_vm1, %v3502_v22, %v3500_v1 }
 0x5c7   : > { %v3505_v60 = vmul.f32 %v3504_v62, %v6003_v31  ;;  %v3506_v11 = vmul.f32 %v3503_v24, %v6007_v34 }
 0x5c9   : > { %v3517_v57 = vpop.permute.xlu1 %3516 }
 0x5ca   : > { %v3519_v14 = vpop.permute.xlu0 %3518 }
 0x5cb   : > { %v3520_v45 = vsel %vm2735_vm2, %v3517_v57, %v3519_v14  ;;  %v3521_v54 = vsel %vm2735_vm2, %v3519_v14, %v3517_v57 }
 0x5cc   : > { %v3522_v10 = vmul.f32 %v3521_v54, %v6011_v16  ;;  %v3523_v33 = vmul.f32 %v3520_v45, %v6014_v35 }
 0x5ce   : > { %v3524_v50 = vadd.f32 %v3522_v10, %v3505_v60  ;;  %v3525_v52 = vadd.f32 %v3523_v33, %v3506_v11 }
 0x5cf   : > { %v3533_v46 = vpop.permute.xlu1 %3532 }
 0x5d0   : > { %v3535_v2 = vpop.permute.xlu0 %3534 }
 0x5d1   : > { %v3536_v26 = vsel %vm2764_vm3, %v3533_v46, %v3535_v2  ;;  %v3537_v39 = vsel %vm2764_vm3, %v3535_v2, %v3533_v46 }
 0x5d2   : > { %v3538_v13 = vmul.f32 %v3537_v39, %v6020_v17  ;;  %v3539_v51 = vmul.f32 %v3536_v26, %v6023_v37 }
 0x5d3   : > { %v3550_v12 = vpop.permute.xlu1 %3549 }
 0x5d4   : > { %v3552_v18 = vpop.permute.xlu0 %3551  ;;  %v3540_v29 = vadd.f32 %v3538_v13, %v3524_v50  ;;  %v3541_v42 = vadd.f32 %v3539_v51, %v3525_v52 }
 0x5d5   : > { %v3553_v44 = vsel %vm2803_vm4, %v3550_v12, %v3552_v18  ;;  %v3554_v8 = vsel %vm2803_vm4, %v3552_v18, %v3550_v12 }
 0x5d6   : > { %v3555_v55 = vmul.f32 %v3554_v8, %v6032_v43  ;;  %v3556_v56 = vmul.f32 %v3553_v44, %v6039_v48 }
 0x5d7   : > { %v3568_v0 = vpop.permute.xlu1 %3567 }
 0x5d8   : > { %v3570_v41 = vpop.permute.xlu0 %3569  ;;  %v3557_v28 = vadd.f32 %v3555_v55, %v3540_v29  ;;  %v3558_v32 = vadd.f32 %v3556_v56, %v3541_v42 }
 0x5d9   : > { %v3571_v30 = vsel %vm2846_vm5, %v3568_v0, %v3570_v41  ;;  %v3572_v15 = vsel %vm2846_vm5, %v3570_v41, %v3568_v0 }
 0x5da   : > { %v3559_v47 = vadd.f32 %v3557_v28, %v6436_v21  ;;  %v3560_v3 = vadd.f32 %v3558_v32, %v6442_v49  ;;  %v3573_v1 = vmul.f32 %v3571_v30, %v6053_v38  ;;  %v3574_v22 = vmul.f32 %v3572_v15, %v6081_v63 }
 0x5db   : > { %v3584_v40 = vpop.permute.xlu1 %3583 }
 0x5dc   : > { %v3586_v36 = vpop.permute.xlu0 %3585  ;;  %v3575_v24 = vadd.f32 %v3573_v1, %v3559_v47  ;;  %v3576_v21 = vadd.f32 %v3574_v22, %v3560_v3 }
 0x5dd   : > { %v3587_v61 = vsel %vm2875_vm6, %v3584_v40, %v3586_v36  ;;  %v3588_v7 = vsel %vm2875_vm6, %v3586_v36, %v3584_v40 }
 0x5de   : > { %v3589_v14 = vmul.f32 %v3587_v61, %v6091_v5  ;;  %v3590_v45 = vmul.f32 %v3588_v7, %v6109_v59 }
 0x5df   : > { %v3600_v57 = vpop.permute.xlu1 %3599 }
 0x5e0   : > { %v3602_v54 = vpop.permute.xlu0 %3601  ;;  %v3591_v39 = vadd.f32 %v3589_v14, %v3575_v24  ;;  %v3592_v10 = vadd.f32 %v3590_v45, %v3576_v21 }
 0x5e1   : > { %v3603_v46 = vsel %vm2914_vm7, %v3600_v57, %v3602_v54  ;;  %v3604_v2 = vsel %vm2914_vm7, %v3602_v54, %v3600_v57 }
 0x5e2   : > { %v3605_v49 = vmul.f32 %v3603_v46, %v6115_v23  ;;  %v3606_v62 = vmul.f32 %v3604_v2, %v6118_v27 }
 0x5e3   : > { %v3612_v26 = vpop.permute.xlu1 %3611 }
 0x5e4   : > { %v3610_v33 = vpop.permute.xlu0 %3609  ;;  %v3607_v11 = vadd.f32 %v3605_v49, %v3591_v39  ;;  %v3608_v13 = vadd.f32 %v3606_v62, %v3592_v10 }
 0x5e5   : > { %v3613_v12 = vsel %vm2943_vm8, %v3610_v33, %v3612_v26  ;;  %v3614_v60 = vsel %vm2943_vm8, %v3612_v26, %v3610_v33 }
 0x5e6   : > { %v3615_v51 = vmul.f32 %v6142_v58, %v3613_v12  ;;  %v3616_v18 = vmul.f32 %v6147_v4, %v3614_v60  ;;  %v4373_v58 = vld [vmem:[%s6666_s8] sm:$0xff]   ;;  %v4374_v4 = vld [vmem:[%s6666_s8 + $0x8] sm:$0xff]  }
 0x5e8   : > { %v3617_v44 = vadd.f32 %v3615_v51, %v3607_v11  ;;  %v3618_v8 = vadd.f32 %v3616_v18, %v3608_v13 }
 0x5ea   : > { %v3626_v50 = vadd.f32 %v6480_v53, %v3618_v8  ;;  %v3625_v52 = vadd.f32 %v6480_v53, %v3617_v44 }
 0x5ec   : > { %v3628_v55 = vmax.f32 %v3626_v50, 0.0  ;;  %v3627_v56 = vmax.f32 %v3625_v52, 0.0 }
 0x5ee   : > { %v3630_v0 = vpack.c.bf16 %v3628_v55, %v3628_v55  ;;  %v3629_v29 = vpack.c.bf16 %v3627_v56, %v3627_v56 }
 0x5f0   : > { %4108 = vmatprep.subr.msk.bf16.mxu1 %vm3652_vm13, %v3630_v0  ;;  %v3654_v42 = vsel %vm3652_vm13, %v3629_v29, 0 }
 0x5f1   : > { %3660 = vmatpush1.bf16.msra.mxu1 %v3654_v42 }
 0x5f4   : > { %4109 = vmatmul.mubr.msk.bf16.vlgmr.msra.gmra.mrb[76].mxu1 %vm3645_vm14, %v4373_v58 }
 0x5f5   : > { %3701 = vmatprep.mubr.bf16.mxu1 %v4385_v20 }
 0x5fc   : > { %4110 = vmatmul.mubr.msk.bf16.gmra.mrb[80].mxu1 %vm3645_vm14, %v4374_v4  ;;  %vm3817_vm14 = vcmp.lt.s32.totalorder %v5870_v25, 3 }
 0x6c7   : > { %v3693_v53 = vpop.f32.mrb[76].mxu1 }
 0x6c8   : > { %v3695_v41 = vpop.f32.mrb[77].mxu1  ;;  %3712 = vrot.lane.b32.xlu0 %v3693_v53, %s4387_s29  ;;  %v3722_v32 = vrot.slane %v3693_v53, 3  ;;  %v3739_v30 = vrot.slane %v3693_v53, 6 }
 0x6c9   : > { %v3697_v28 = vpop.f32.mrb[78].mxu1  ;;  %3714 = vrot.lane.b32.xlu1 %v3695_v41, %s4387_s29  ;;  %v3723_v20 = vrot.slane %v3695_v41, 3  ;;  %v3740_v61 = vrot.slane %v3695_v41, 6 }
 0x6ca   : > { %v3699_v15 = vpop.f32.mrb[79].mxu1  ;;  %v3724_v40 = vrot.slane %v3697_v28, 3  ;;  %v3741_v36 = vrot.slane %v3697_v28, 6  ;;  %v3772_v14 = vrot.slane %v3697_v28, 4  ;;  %v3755_v45 = vrot.slane %v3697_v28, 1 }
 0x6cb   : > { %v3725_v7 = vrot.slane %v3699_v15, 3  ;;  %v3742_v47 = vrot.slane %v3699_v15, 6  ;;  %v3773_v54 = vrot.slane %v3699_v15, 4  ;;  %v3780_v2 = vrot.slane %v3697_v28, 7 }
 0x6cc   : > { %v3727_v3 = vsel %vm3726_vm15, %v3722_v32, %v3724_v40  ;;  %v3743_v1 = vsel %vm3513_vm11, %v3739_v30, %v3741_v36  ;;  %v3756_v24 = vrot.slane %v3699_v15, 1  ;;  %v3781_v21 = vrot.slane %v3699_v15, 7  ;;  %v3872_v30 = vld [vmem:[#allocation2] sm:$0x1]  ;;  %v6590_v40 = vpop.permute.xlu0 %3843 }
 0x6cd   : > { %3729 = vrot.lane.b32.xlu0 %v3727_v3, %s4389_s17  ;;  %v3728_v22 = vsel %vm3726_vm15, %v3723_v20, %v3725_v7  ;;  %v3744_v57 = vsel %vm3513_vm11, %v3740_v61, %v3742_v47  ;;  %v3850_v15 = vld [vmem:[%s6668_s10] sm:$0x7] }
 0x6ce   : > { %3731 = vrot.lane.b32.xlu1 %v3728_v22, %s4389_s17 }
 0x6cf   : > { %v3703_v46 = vpop.f32.mrb[80].mxu1 }
 0x6d0   : > { %v3774_v49 = vrot.slane %v3703_v46, 4  ;;  %v3705_v62 = vpop.f32.mrb[81].mxu1  ;;  %v3757_v26 = vrot.slane %v3703_v46, 1  ;;  %v3782_v39 = vrot.slane %v3703_v46, 7  ;;  %v3797_v10 = vrot.slane %v3703_v46, 2 }
 0x6d1   : > { %3745 = vrot.lane.b32.xlu0 %v3743_v1, %s4388_s30  ;;  %v3775_v33 = vrot.slane %v3705_v62, 4  ;;  %v3707_v12 = vpop.f32.mrb[82].mxu1  ;;  %v3758_v60 = vrot.slane %v3705_v62, 1  ;;  %v3783_v11 = vrot.slane %v3705_v62, 7  ;;  %v3813_v13 = vrot.slane %v3703_v46, 5 }
 0x6d2   : > { %3747 = vrot.lane.b32.xlu1 %v3744_v57, %s4388_s30  ;;  %v3760_v51 = vsel %vm3759_vm9, %v3755_v45, %v3757_v26  ;;  %v3799_v18 = vrot.slane %v3707_v12, 2  ;;  %v3815_v44 = vrot.slane %v3707_v12, 5  ;;  %v3785_v8 = vsel %vm3784_vm10, %v3780_v2, %v3782_v39  ;;  %v3709_v50 = vpop.f32.mrb[83].mxu1 }
 0x6d3   : > { %v3761_v52 = vsel %vm3759_vm9, %v3756_v24, %v3758_v60  ;;  %v3786_v55 = vsel %vm3784_vm10, %v3781_v21, %v3783_v11  ;;  %v3800_v56 = vrot.slane %v3709_v50, 2  ;;  %v3816_v0 = vrot.slane %v3709_v50, 5 }
 0x6d4   : > { %v3801_v29 = vsel %vm3546_vm12, %v3797_v10, %v3799_v18  ;;  %v3818_v42 = vsel %vm3817_vm14, %v3813_v13, %v3815_v44  ;;  %v3798_v58 = vrot.slane %v3705_v62, 2  ;;  %v3814_v4 = vrot.slane %v3705_v62, 5 }
 0x6d5   : > { %3762 = vrot.lane.b32.xlu0 %v3760_v51, %s4390_s13  ;;  %v3776_v53 = vsel %vm2722_vm0, %v3772_v14, %v3774_v49  ;;  %v3777_v41 = vsel %vm2722_vm0, %v3773_v54, %v3775_v33  ;;  %vm3904_vm0 = vcmp.lt.s32.totalorder %v2691_v19, 256 }
 0x6d6   : > { %3830 = vrot.lane.b32.xlu1 %v3707_v12, %s4386_s28  ;;  %v3802_v28 = vsel %vm3546_vm12, %v3798_v58, %v3800_v56  ;;  %v3819_v32 = vsel %vm3817_vm14, %v3814_v4, %v3816_v0 }
 0x6d9   : > { %3787 = vrot.lane.b32.xlu0 %v3785_v8, %s4392_s15 }
 0x6da   : > { %3764 = vrot.lane.b32.xlu1 %v3761_v52, %s4390_s13 }
 0x6dd   : > { %3803 = vrot.lane.b32.xlu0 %v3801_v29, %s4391_s14 }
 0x6de   : > { %3789 = vrot.lane.b32.xlu1 %v3786_v55, %s4392_s15  ;;  %s3967_s15 = sshll.u32 %s6672_s24, 1 }
 0x6df   : > { %s413_s11 = scalar_lea.vmem %s6670_s12, %s3967_s15 }
 0x6e1   : > { %3820 = vrot.lane.b32.xlu0 %v3818_v42, %s4393_s16 }
 0x6e2   : > { %3805 = vrot.lane.b32.xlu1 %v3802_v28, %s4391_s14 }
 0x6e5   : > { %3832 = vrot.lane.b32.xlu0 %v3709_v50, %s4386_s28 }
 0x6e6   : > { %3822 = vrot.lane.b32.xlu1 %v3819_v32, %s4393_s16 }
 0x6e9   : > { %3875 = vperm.xlu0 %4360, %v3872_v30  }
 0x6ea   : > { %3853 = vperm.xlu1 %4361, %v3850_v15  }
 0x73a   : > { %v3713_v36 = vpop.permute.xlu0 %3712 }
 0x73b   : > { %v3715_v20 = vpop.permute.xlu1 %3714 }
 0x73c   : > { %v3716_v57 = vsel %vm2693_vm1, %v3713_v36, %v3715_v20  ;;  %v3717_v14 = vsel %vm2693_vm1, %v3715_v20, %v3713_v36 }
 0x73d   : > { %v3718_v49 = vmul.f32 %v3717_v14, %v6003_v31  ;;  %v3719_v62 = vmul.f32 %v3716_v57, %v6007_v34 }
 0x73f   : > { %v3730_v61 = vpop.permute.xlu0 %3729 }
 0x740   : > { %v3732_v7 = vpop.permute.xlu1 %3731 }
 0x741   : > { %v3733_v1 = vsel %vm2735_vm2, %v3730_v61, %v3732_v7  ;;  %v3734_v22 = vsel %vm2735_vm2, %v3732_v7, %v3730_v61  ;;  %v4375_v7 = vld [vmem:[%s6658_s0 + $0x10] ss:$0 sm:$0xff] }
 0x742   : > { %v3735_v2 = vmul.f32 %v3734_v22, %v6011_v16  ;;  %v3736_v24 = vmul.f32 %v3733_v1, %v6014_v35 }
 0x743   : > { %v3746_v47 = vpop.permute.xlu0 %3745 }
 0x744   : > { %v3748_v3 = vpop.permute.xlu1 %3747  ;;  %v3737_v33 = vadd.f32 %v3735_v2, %v3718_v49  ;;  %v3738_v12 = vadd.f32 %v3736_v24, %v3719_v62 }
 0x745   : > { %v3749_v45 = vsel %vm2764_vm3, %v3746_v47, %v3748_v3  ;;  %v3750_v54 = vsel %vm2764_vm3, %v3748_v3, %v3746_v47  ;;  %v4376_v3 = vld [vmem:[%s6658_s0 + $0x18] ss:$0 sm:$0xff] }
 0x746   : > { %v3751_v26 = vmul.f32 %v3750_v54, %v6020_v17  ;;  %v3752_v39 = vmul.f32 %v3749_v45, %v6023_v37 }
 0x747   : > { %v3763_v46 = vpop.permute.xlu0 %3762 }
 0x748   : > { %v3831_v21 = vpop.permute.xlu1 %3830  ;;  %v3753_v35 = vadd.f32 %v3751_v26, %v3737_v33  ;;  %v3754_v13 = vadd.f32 %v3752_v39, %v3738_v12  ;;  %v4394_v39 = vmov 1966171168  }
 0x74b   : > { %v3788_v10 = vpop.permute.xlu0 %3787 }
 0x74c   : > { %v3765_v60 = vpop.permute.xlu1 %3764 }
 0x74d   : > { %v3766_v11 = vsel %vm2803_vm4, %v3763_v46, %v3765_v60  ;;  %v3767_v16 = vsel %vm2803_vm4, %v3765_v60, %v3763_v46 }
 0x74e   : > { %v3768_v31 = vmul.f32 %v3767_v16, %v6032_v43  ;;  %v3769_v34 = vmul.f32 %v3766_v11, %v6039_v48 }
 0x74f   : > { %v3804_v51 = vpop.permute.xlu0 %3803 }
 0x750   : > { %v3770_v17 = vadd.f32 %v3768_v31, %v3753_v35  ;;  %v3771_v18 = vadd.f32 %v3769_v34, %v3754_v13  ;;  %v3790_v37 = vpop.permute.xlu1 %3789 }
 0x751   : > { %v3791_v44 = vsel %vm2846_vm5, %v3788_v10, %v3790_v37  ;;  %v3792_v8 = vsel %vm2846_vm5, %v3790_v37, %v3788_v10  ;;  %v3888_v10 = vunpack.c.l.s4 %v4394_v39 }
 0x752   : > { %v3778_v52 = vadd.f32 %v3776_v53, %v3770_v17  ;;  %v3779_v55 = vadd.f32 %v3777_v41, %v3771_v18  ;;  %v3793_v56 = vmul.f32 %v3791_v44, %v6053_v38  ;;  %v3794_v0 = vmul.f32 %v3792_v8, %v6081_v63 }
 0x753   : > { %v3821_v50 = vpop.permute.xlu0 %3820  ;;  %v3889_v16 = vunpack.c.0.s8 %v3888_v10 }
 0x754   : > { %v3806_v43 = vpop.permute.xlu1 %3805  ;;  %v3795_v4 = vadd.f32 %v3793_v56, %v3778_v52  ;;  %v3796_v28 = vadd.f32 %v3794_v0, %v3779_v55 }
 0x755   : > { %v3807_v48 = vsel %vm2875_vm6, %v3804_v51, %v3806_v43  ;;  %v3808_v29 = vsel %vm2875_vm6, %v3806_v43, %v3804_v51  ;;  %v3892_v17 = vsub.s32 %v3889_v16, %v5870_v25 }
 0x756   : > { %v3809_v42 = vmul.f32 %v3807_v48, %v6091_v5  ;;  %v3810_v58 = vmul.f32 %v3808_v29, %v6109_v59 }
 0x757   : > { %v3833_v53 = vpop.permute.xlu0 %3832 }
 0x758   : > { %v3823_v32 = vpop.permute.xlu1 %3822  ;;  %v3811_v41 = vadd.f32 %v3809_v42, %v3795_v4  ;;  %v3812_v30 = vadd.f32 %v3810_v58, %v3796_v28  ;;  %v3834_v5 = vsel %vm2943_vm8, %v3831_v21, %v3833_v53  ;;  %v3835_v59 = vsel %vm2943_vm8, %v3833_v53, %v3831_v21 }
 0x759   : > { %v3824_v38 = vsel %vm2914_vm7, %v3821_v50, %v3823_v32  ;;  %v3825_v63 = vsel %vm2914_vm7, %v3823_v32, %v3821_v50  ;;  %v3836_v47 = vmul.f32 %v4375_v7, %v3834_v5 }
 0x75a   : > { %v3826_v15 = vmul.f32 %v3824_v38, %v6115_v23  ;;  %v3827_v36 = vmul.f32 %v3825_v63, %v6118_v27  ;;  %v3837_v23 = vmul.f32 %v4376_v3, %v3835_v59 }
 0x75c   : > { %v3828_v20 = vadd.f32 %v3826_v15, %v3811_v41  ;;  %v3829_v61 = vadd.f32 %v3827_v36, %v3812_v30 }
 0x75e   : > { %v3838_v1 = vadd.f32 %v3836_v47, %v3828_v20  ;;  %v3839_v27 = vadd.f32 %v3837_v23, %v3829_v61 }
 0x760   : > { %v3846_v22 = vadd.f32 %v6590_v40, %v3838_v1  ;;  %v3847_v57 = vadd.f32 %v6590_v40, %v3839_v27 }
 0x762   : > { %v3848_v9 = vmax.f32 %v3846_v22, 0.0  ;;  %v3849_v14 = vmax.f32 %v3847_v57, 0.0 }
 0x768   : > { %v3876_v11 = vpop.permute.xlu0 %3875 }
 0x769   : > { %v3854_v45 = vpop.permute.xlu1 %3853  ;;  %v3881_v31 = vrot.slane %v3876_v11, %v5985_v6 }
 0x76a   : > { %v3856_v54 = vmul.f32 %v3854_v45, %v3848_v9  ;;  %v3857_v46 = vmul.f32 %v3854_v45, %v3849_v14 }
 0x76c   : > { %v3858_v2 = vsel %vm3652_vm13, %v3856_v54, 0.0  ;;  %v3865_v24 = vsel %vm3652_vm13, %v3857_v46, 0.0 }
 0x76d   : > { %v3859_v21 = vrot.slane %v3858_v2, 4  ;;  %v3866_v49 = vrot.slane %v3865_v24, 4 }
 0x76f   : > { %v3860_v62 = vadd.f32 %v3859_v21, %v3858_v2  ;;  %v3867_v26 = vadd.f32 %v3866_v49, %v3865_v24 }
 0x771   : > { %v3861_v33 = vrot.slane %v3860_v62, 2  ;;  %v3868_v12 = vrot.slane %v3867_v26, 2 }
 0x773   : > { %v3862_v60 = vadd.f32 %v3861_v33, %v3860_v62  ;;  %v3869_v40 = vadd.f32 %v3868_v12, %v3867_v26 }
 0x775   : > { %v3863_v35 = vrot.slane %v3862_v60, 1  ;;  %v3870_v13 = vrot.slane %v3869_v40, 1 }
 0x777   : > { %v3864_v34 = vadd.f32 %v3863_v35, %v3862_v60  ;;  %v3871_v51 = vadd.f32 %v3870_v13, %v3869_v40 }
 0x779   : > { %v3882_v18 = vadd.f32 %v3881_v31, %v3864_v34  ;;  %v3883_v37 = vadd.f32 %v3881_v31, %v3871_v51 }
 0x77b   : > { %v3886_v44 = vcombine.low %v3882_v18, %v3883_v37 }
 0x77d   : > { %v3893_v8 = vrot.slane %v3886_v44, %v3892_v17 }
 0x77f   : > { %v3900_v50 = vrot.slane %v3893_v8, %v3892_v17 }
 0x781   : > { %3906 = vst.msk [vmem:[%s413_s11] sm:$0x3] %vm3904_vm0, %v3900_v50 }
 0x782 PF: > { %s24_s23 = sadd.s32 1, %s4383_s23  }
 0x783   : > { %p21_p4 = scmp.ge.s32.totalorder %s24_s23, 4  }
 0x785   :  { %23 = sbr.rel (!%p21_p4) target bundleno = 3 (0x3), region = 98 }

</bundles_post_ra>
